<compile_context>
chip_gen: v6e
topology: v6e:2x2x1
jax: 0.10.0
libtpu: 0.0.40
codegen_flags: <defaults>
</compile_context>

<pallas_src>
import jax
import jax.numpy as jnp
import numpy as np
from jax import lax
from jax.experimental import pallas as pl
from jax.experimental.pallas import tpu as pltpu


# --------------------------------- fused kernel ------------------------------------ #
def _lenet_kernel(p1_ref, w1_ref, b1_ref, w2_ref, b2_ref, mp_ref,
                  wf1_ref, bf1_ref, wf2_ref, bf2_ref, wf3_ref, bf3_ref,
                  out_ref, h1_ref, fc_ref):
    f32 = jnp.float32
    B = out_ref.shape[0]
    C1 = h1_ref.shape[-1]            # 8 conv1 channels (6 real, zero-padded)

    # ---- conv1 + tanh + 2x2 avg-pool: ONE merged matmul over all 4 pool quadrants ----
    p1 = p1_ref[...]                                        # (4, B*144, 32) bf16
    nq, r1, k1 = p1.shape
    a1 = jnp.dot(p1.reshape(nq * r1, k1), w1_ref[...],
                 preferred_element_type=f32)                # (4*B*144, C1) f32 acc
    a1 = jnp.tanh(a1 + b1_ref[...])                         # single bias + single tanh
    h1 = 0.25 * jnp.sum(a1.reshape(nq, r1, C1), axis=0)     # (B*144, C1), rows=(b,ph,pw)

    # stage the pooled 12x12 map in a 4-D VMEM scratch for in-kernel conv2 im2col
    for b in range(B):
        for h in range(12):
            r0 = b * 144 + h * 12
            h1_ref[b, h, :, :] = h1[r0:r0 + 12, :]

    # ---- conv2 (5x5, 6->16) + tanh + 2x2 avg-pool, entirely in VMEM ----
    acc = jnp.zeros((B * 64, 16), f32)                      # rows = (b, h_out, w_out)
    for i in range(5):
        for j in range(5):
            slab = h1_ref[:, i:i + 8, j:j + 8, :]           # (B, 8, 8, C1) f32
            lhs = slab.reshape(B * 64, C1).astype(w2_ref.dtype)     # bf16 MXU operand
            acc = acc + jnp.dot(lhs, w2_ref[i * 5 + j, :, :],
                                preferred_element_type=f32)
    y2 = jnp.tanh(acc + b2_ref[...])                        # (B*64, 16) f32

    # 2x2 avg-pool as a constant 0/0.25 matmul; rows of `pooled` ordered (s=ph*4+pw, b)
    pooled = jnp.dot(mp_ref[...], y2, preferred_element_type=f32)   # (B*16, 16)

    # scatter into FC input layout (B, 256) with feature order (s, c); the matching
    # column permutation was folded into wf1 at prep time (PyTorch flatten is (c, s)).
    for s in range(16):
        fc_ref[:, s * 16:(s + 1) * 16] = pooled[s * B:(s + 1) * B, :]

    # ---- FC chain 256 -> 120 -> 84 -> 10, all lane-padded to 128 ----
    h = fc_ref[...]
    h = jnp.tanh(jnp.dot(h, wf1_ref[...], preferred_element_type=f32) + bf1_ref[...])
    h = jnp.tanh(jnp.dot(h, wf2_ref[...], preferred_element_type=f32) + bf2_ref[...])
    out_ref[...] = (jnp.dot(h, wf3_ref[...], preferred_element_type=f32)
                    + bf3_ref[...]).astype(out_ref.dtype)


# ------------------------------ wrapper-side prep ----------------------------------- #
def prepare_params(p):
    """Fold all layout permutations / zero padding into the (tiny) weights, once."""
    f32, bf16 = jnp.float32, jnp.bfloat16
    w = {}
    # conv1: (6,1,5,5) -> (25,6), rows k = kh*5+kw; pad K 25->32, Cout 6->8
    w["w1"] = jnp.pad(p["c1_w"].reshape(6, 25).T, ((0, 7), (0, 2))).astype(bf16)
    w["b1"] = jnp.pad(p["c1_b"], (0, 2)).astype(f32).reshape(1, 8)
    # conv2: (16,6,5,5) -> (25, 8, 16) = [k=(i*5+j), cin(pad 6->8), cout]
    w2 = p["c2_w"].transpose(2, 3, 1, 0).reshape(25, 6, 16)
    w["w2"] = jnp.pad(w2, ((0, 0), (0, 2), (0, 0))).astype(bf16)
    w["b2"] = p["c2_b"].astype(f32).reshape(1, 16)
    # FC1: permute input columns from PyTorch (c*16 + s) to kernel order (s*16 + c)
    wf1 = p["f1_w"].reshape(120, 16, 4, 4).transpose(2, 3, 1, 0).reshape(256, 120)
    w["wf1"] = jnp.pad(wf1, ((0, 0), (0, 8))).astype(f32)                # (256, 128)
    w["bf1"] = jnp.pad(p["f1_b"], (0, 8)).astype(f32).reshape(1, 128)
    w["wf2"] = jnp.pad(p["f2_w"].T, ((0, 8), (0, 44))).astype(f32)       # (128, 128)
    w["bf2"] = jnp.pad(p["f2_b"], (0, 44)).astype(f32).reshape(1, 128)
    w["wf3"] = jnp.pad(p["f3_w"].T, ((0, 44), (0, 118))).astype(f32)     # (128, 128)
    w["bf3"] = jnp.pad(p["f3_b"], (0, 118)).astype(f32).reshape(1, 128)
    return w


def _pool_matrix(B):
    """Constant 0/0.25 matrix implementing conv2's 2x2 avg-pool; rows ordered (s, b)."""
    mp = np.zeros((16 * B, 64 * B), np.float32)
    for ph in range(4):
        for pw in range(4):
            s = ph * 4 + pw
            for b in range(B):
                for a in range(2):
                    for e in range(2):
                        mp[s * B + b, b * 64 + (2 * ph + a) * 8 + (2 * pw + e)] = 0.25
    return jnp.asarray(mp)


def _conv1_patches(x):
    """conv1 im2col, grouped by 2x2 pool quadrant -> (4, B*144, 32) bf16."""
    B = x.shape[0]
    pat = lax.conv_general_dilated_patches(x, (5, 5), (1, 1), "VALID")   # (B,25,24,24)
    pat = pat.transpose(0, 2, 3, 1)                                      # (B,24,24,25)
    pat = pat.reshape(B, 12, 2, 12, 2, 25).transpose(2, 4, 0, 1, 3, 5)   # (a,e,b,ph,pw,k)
    pat = pat.reshape(4, B * 144, 25)
    return jnp.pad(pat, ((0, 0), (0, 0), (0, 7))).astype(jnp.bfloat16)   # K 25 -> 32


def _fullspec(shape):
    n = len(shape)
    return pl.BlockSpec(shape, lambda i, n=n: (0,) * n)


@jax.jit
def lenet_forward(x, w):
    B = x.shape[0]
    p1 = _conv1_patches(x)                       # (4, B*144, 32) bf16
    mp = _pool_matrix(B)                         # compile-time constant
    ops = (p1, w["w1"], w["b1"], w["w2"], w["b2"], mp,
           w["wf1"], w["bf1"], w["wf2"], w["bf2"], w["wf3"], w["bf3"])

    flops = 2 * ((4 * B * 144) * 32 * 8 + 25 * (B * 64) * 8 * 16
                 + (B * 16) * (B * 64) * 16
                 + B * (256 * 128 + 128 * 128 + 128 * 128))
    trans = (4 * B * 144) * 8 + (B * 64) * 16 + 2 * B * 128
    bytes_accessed = int(sum(int(np.prod(a.shape)) * a.dtype.itemsize for a in ops)
                         + B * 128 * 4)

    out = pl.pallas_call(
        _lenet_kernel,
        out_shape=jax.ShapeDtypeStruct((B, 128), jnp.float32),
        grid_spec=pltpu.PrefetchScalarGridSpec(
            num_scalar_prefetch=0,
            grid=(1,),                  # whole network resident in one step (B=2)
            in_specs=[_fullspec(a.shape) for a in ops],
            out_specs=_fullspec((B, 128)),
            scratch_shapes=[
                pltpu.VMEM((B, 12, 12, 8), jnp.float32),   # pooled conv1 map (NHWC)
                pltpu.VMEM((B, 256), jnp.float32),         # FC input layout
            ],
        ),
        compiler_params=pltpu.CompilerParams(dimension_semantics=("arbitrary",)),
        cost_estimate=pl.CostEstimate(flops=flops, transcendentals=trans,
                                      bytes_accessed=bytes_accessed),
    )(*ops)
    return out[:, :10]                  # lane-dense (B,128) store; tiny final slice


# ----------------------------- parameters & reference ------------------------------- #
def _uniform(key, shape, bound):
    return jax.random.uniform(key, shape, jnp.float32, -bound, bound)


def init_params(key):
    ks = jax.random.split(key, 10)
    p = {}
    p["c1_w"] = _uniform(ks[0], (6, 1, 5, 5), 1.0 / np.sqrt(1 * 25))
    p["c1_b"] = _uniform(ks[1], (6,), 1.0 / np.sqrt(1 * 25))
    p["c2_w"] = _uniform(ks[2], (16, 6, 5, 5), 1.0 / np.sqrt(6 * 25))
    p["c2_b"] = _uniform(ks[3], (16,), 1.0 / np.sqrt(6 * 25))
    p["f1_w"] = _uniform(ks[4], (120, 256), 1.0 / np.sqrt(256))
    p["f1_b"] = _uniform(ks[5], (120,), 1.0 / np.sqrt(256))
    p["f2_w"] = _uniform(ks[6], (84, 120), 1.0 / np.sqrt(120))
    p["f2_b"] = _uniform(ks[7], (84,), 1.0 / np.sqrt(120))
    p["f3_w"] = _uniform(ks[8], (10, 84), 1.0 / np.sqrt(84))
    p["f3_b"] = _uniform(ks[9], (10,), 1.0 / np.sqrt(84))
    return p


def reference_forward(x, p):
    """Pure-JAX (XLA) reference with identical semantics, for validation."""
    def conv(x, w, b):
        y = lax.conv_general_dilated(
            x, w, window_strides=(1, 1), padding="VALID",
            dimension_numbers=("NCHW", "OIHW", "NCHW"))
        return jnp.tanh(y + b[None, :, None, None])

    def pool(x):
        s = lax.reduce_window(x, 0.0, lax.add, (1, 1, 2, 2), (1, 1, 2, 2), "VALID")
        return s / 4.0

    y = pool(conv(x, p["c1_w"], p["c1_b"]))
    y = pool(conv(y, p["c2_w"], p["c2_b"]))
    h = y.reshape(x.shape[0], -1)
    h = jnp.tanh(h @ p["f1_w"].T + p["f1_b"])
    h = jnp.tanh(h @ p["f2_w"].T + p["f2_b"])
    return h @ p["f3_w"].T + p["f3_b"]


if __name__ == "__main__":
    key = jax.random.PRNGKey(0)
    pkey, xkey = jax.random.split(key)
    params = init_params(pkey)
    # fc_model expects 256 = 16*4*4 flattened features -> 28x28x1 input, batch=2.
    x = jax.random.normal(xkey, (2, 1, 28, 28), jnp.float32)

    prepped = prepare_params(params)            # one-time weight layout/pad/cast
    out = jax.block_until_ready(lenet_forward(x, prepped))
    assert out.shape == (2, 10) and out.dtype == jnp.float32

    ref = reference_forward(x, params)
    np.testing.assert_allclose(np.asarray(out), np.asarray(ref),
                               atol=2e-2, rtol=2e-2)
    print("KERNEL_OK")
</pallas_src>

<mosaic_0001>
module attributes {stable_mosaic.version = 11 : i64} {
  func.func @_lenet_kernel(%arg0: i32, %arg1: memref<4x288x32xbf16, #tpu.memory_space<vmem>>, %arg2: memref<32x8xbf16, #tpu.memory_space<vmem>>, %arg3: memref<1x8xf32, #tpu.memory_space<vmem>>, %arg4: memref<25x8x16xbf16, #tpu.memory_space<vmem>>, %arg5: memref<1x16xf32, #tpu.memory_space<vmem>>, %arg6: memref<32x128xf32, #tpu.memory_space<vmem>>, %arg7: memref<256x128xf32, #tpu.memory_space<vmem>>, %arg8: memref<1x128xf32, #tpu.memory_space<vmem>>, %arg9: memref<128x128xf32, #tpu.memory_space<vmem>>, %arg10: memref<1x128xf32, #tpu.memory_space<vmem>>, %arg11: memref<128x128xf32, #tpu.memory_space<vmem>>, %arg12: memref<1x128xf32, #tpu.memory_space<vmem>>, %arg13: memref<2x128xf32, #tpu.memory_space<vmem>>, %arg14: memref<2x12x12x8xf32, #tpu.memory_space<vmem>>, %arg15: memref<2x256xf32, #tpu.memory_space<vmem>>) attributes {dimension_semantics = [#tpu.dimension_semantics<arbitrary>], iteration_bounds = array<i64: 1>, scalar_prefetch = 0 : i64, scratch_operands = 2 : i64, tpu.core_type = #tpu.core_type<tc>, window_params = [{pipeline_mode = #tpu.pipeline_mode<synchronous>, transform_indices = @transform_0, window_bounds = array<i64: 4, 288, 32>}, {pipeline_mode = #tpu.pipeline_mode<synchronous>, transform_indices = @transform_1, window_bounds = array<i64: 32, 8>}, {pipeline_mode = #tpu.pipeline_mode<synchronous>, transform_indices = @transform_2, window_bounds = array<i64: 1, 8>}, {pipeline_mode = #tpu.pipeline_mode<synchronous>, transform_indices = @transform_3, window_bounds = array<i64: 25, 8, 16>}, {pipeline_mode = #tpu.pipeline_mode<synchronous>, transform_indices = @transform_4, window_bounds = array<i64: 1, 16>}, {pipeline_mode = #tpu.pipeline_mode<synchronous>, transform_indices = @transform_5, window_bounds = array<i64: 32, 128>}, {pipeline_mode = #tpu.pipeline_mode<synchronous>, transform_indices = @transform_6, window_bounds = array<i64: 256, 128>}, {pipeline_mode = #tpu.pipeline_mode<synchronous>, transform_indices = @transform_7, window_bounds = array<i64: 1, 128>}, {pipeline_mode = #tpu.pipeline_mode<synchronous>, transform_indices = @transform_8, window_bounds = array<i64: 128, 128>}, {pipeline_mode = #tpu.pipeline_mode<synchronous>, transform_indices = @transform_9, window_bounds = array<i64: 1, 128>}, {pipeline_mode = #tpu.pipeline_mode<synchronous>, transform_indices = @transform_10, window_bounds = array<i64: 128, 128>}, {pipeline_mode = #tpu.pipeline_mode<synchronous>, transform_indices = @transform_11, window_bounds = array<i64: 1, 128>}, {pipeline_mode = #tpu.pipeline_mode<synchronous>, transform_indices = @transform_12, window_bounds = array<i64: 2, 128>}]} {
    %c0 = arith.constant 0 : index
    %c0_0 = arith.constant 0 : index
    %c0_1 = arith.constant 0 : index
    %0 = vector.load %arg1[%c0, %c0_0, %c0_1] : memref<4x288x32xbf16, #tpu.memory_space<vmem>>, vector<4x288x32xbf16>
    %1 = vector.shape_cast %0 : vector<4x288x32xbf16> to vector<1152x32xbf16>
    %c0_2 = arith.constant 0 : index
    %c0_3 = arith.constant 0 : index
    %2 = vector.load %arg2[%c0_2, %c0_3] : memref<32x8xbf16, #tpu.memory_space<vmem>>, vector<32x8xbf16>
    %cst = arith.constant dense<0.000000e+00> : vector<1152x8xf32>
    %3 = tpu.matmul %1, %2, %cst {dimension_numbers = #tpu.dot_dimension_numbers<[1], [0], [0], [1], [0, 0, 1, 1], [], []>} : vector<1152x32xbf16>, vector<32x8xbf16>, vector<1152x8xf32> -> vector<1152x8xf32>
    %c0_4 = arith.constant 0 : index
    %c0_5 = arith.constant 0 : index
    %4 = vector.load %arg3[%c0_4, %c0_5] : memref<1x8xf32, #tpu.memory_space<vmem>>, vector<1x8xf32>
    %5 = vector.broadcast %4 : vector<1x8xf32> to vector<1152x8xf32>
    %6 = arith.addf %3, %5 : vector<1152x8xf32>
    %7 = math.tanh %6 : vector<1152x8xf32>
    %8 = vector.shape_cast %7 : vector<1152x8xf32> to vector<4x288x8xf32>
    %cst_6 = arith.constant dense<0.000000e+00> : vector<288x8xf32>
    %9 = vector.multi_reduction <add>, %8, %cst_6 [0] : vector<4x288x8xf32> to vector<288x8xf32>
    %cst_7 = arith.constant 2.500000e-01 : f32
    %10 = vector.broadcast %cst_7 : f32 to vector<288x8xf32>
    %11 = arith.mulf %10, %9 : vector<288x8xf32>
    %12 = vector.extract_strided_slice %11 {offsets = [0, 0], sizes = [12, 8], strides = [1, 1]} : vector<288x8xf32> to vector<12x8xf32>
    %c0_8 = arith.constant 0 : index
    %c0_9 = arith.constant 0 : index
    %c0_10 = arith.constant 0 : index
    %c0_11 = arith.constant 0 : index
    %13 = vector.load %arg14[%c0_8, %c0_9, %c0_10, %c0_11] : memref<2x12x12x8xf32, #tpu.memory_space<vmem>>, vector<1x1x12x8xf32>
    %14 = vector.shape_cast %13 : vector<1x1x12x8xf32> to vector<12x8xf32>
    %15 = vector.shape_cast %12 : vector<12x8xf32> to vector<1x1x12x8xf32>
    tpu.vector_store %arg14[%c0_8, %c0_9, %c0_10, %c0_11], %15 {strides = array<i32>} : memref<2x12x12x8xf32, #tpu.memory_space<vmem>>, vector<1x1x12x8xf32>,
    %16 = vector.extract_strided_slice %11 {offsets = [12, 0], sizes = [12, 8], strides = [1, 1]} : vector<288x8xf32> to vector<12x8xf32>
    %c0_12 = arith.constant 0 : index
    %c1 = arith.constant 1 : index
    %c0_13 = arith.constant 0 : index
    %c0_14 = arith.constant 0 : index
    %17 = vector.load %arg14[%c0_12, %c1, %c0_13, %c0_14] : memref<2x12x12x8xf32, #tpu.memory_space<vmem>>, vector<1x1x12x8xf32>
    %18 = vector.shape_cast %17 : vector<1x1x12x8xf32> to vector<12x8xf32>
    %19 = vector.shape_cast %16 : vector<12x8xf32> to vector<1x1x12x8xf32>
    tpu.vector_store %arg14[%c0_12, %c1, %c0_13, %c0_14], %19 {strides = array<i32>} : memref<2x12x12x8xf32, #tpu.memory_space<vmem>>, vector<1x1x12x8xf32>,
    %20 = vector.extract_strided_slice %11 {offsets = [24, 0], sizes = [12, 8], strides = [1, 1]} : vector<288x8xf32> to vector<12x8xf32>
    %c0_15 = arith.constant 0 : index
    %c2 = arith.constant 2 : index
    %c0_16 = arith.constant 0 : index
    %c0_17 = arith.constant 0 : index
    %21 = vector.load %arg14[%c0_15, %c2, %c0_16, %c0_17] : memref<2x12x12x8xf32, #tpu.memory_space<vmem>>, vector<1x1x12x8xf32>
    %22 = vector.shape_cast %21 : vector<1x1x12x8xf32> to vector<12x8xf32>
    %23 = vector.shape_cast %20 : vector<12x8xf32> to vector<1x1x12x8xf32>
    tpu.vector_store %arg14[%c0_15, %c2, %c0_16, %c0_17], %23 {strides = array<i32>} : memref<2x12x12x8xf32, #tpu.memory_space<vmem>>, vector<1x1x12x8xf32>,
    %24 = vector.extract_strided_slice %11 {offsets = [36, 0], sizes = [12, 8], strides = [1, 1]} : vector<288x8xf32> to vector<12x8xf32>
    %c0_18 = arith.constant 0 : index
    %c3 = arith.constant 3 : index
    %c0_19 = arith.constant 0 : index
    %c0_20 = arith.constant 0 : index
    %25 = vector.load %arg14[%c0_18, %c3, %c0_19, %c0_20] : memref<2x12x12x8xf32, #tpu.memory_space<vmem>>, vector<1x1x12x8xf32>
    %26 = vector.shape_cast %25 : vector<1x1x12x8xf32> to vector<12x8xf32>
    %27 = vector.shape_cast %24 : vector<12x8xf32> to vector<1x1x12x8xf32>
    tpu.vector_store %arg14[%c0_18, %c3, %c0_19, %c0_20], %27 {strides = array<i32>} : memref<2x12x12x8xf32, #tpu.memory_space<vmem>>, vector<1x1x12x8xf32>,
    %28 = vector.extract_strided_slice %11 {offsets = [48, 0], sizes = [12, 8], strides = [1, 1]} : vector<288x8xf32> to vector<12x8xf32>
    %c0_21 = arith.constant 0 : index
    %c4 = arith.constant 4 : index
    %c0_22 = arith.constant 0 : index
    %c0_23 = arith.constant 0 : index
    %29 = vector.load %arg14[%c0_21, %c4, %c0_22, %c0_23] : memref<2x12x12x8xf32, #tpu.memory_space<vmem>>, vector<1x1x12x8xf32>
    %30 = vector.shape_cast %29 : vector<1x1x12x8xf32> to vector<12x8xf32>
    %31 = vector.shape_cast %28 : vector<12x8xf32> to vector<1x1x12x8xf32>
    tpu.vector_store %arg14[%c0_21, %c4, %c0_22, %c0_23], %31 {strides = array<i32>} : memref<2x12x12x8xf32, #tpu.memory_space<vmem>>, vector<1x1x12x8xf32>,
    %32 = vector.extract_strided_slice %11 {offsets = [60, 0], sizes = [12, 8], strides = [1, 1]} : vector<288x8xf32> to vector<12x8xf32>
    %c0_24 = arith.constant 0 : index
    %c5 = arith.constant 5 : index
    %c0_25 = arith.constant 0 : index
    %c0_26 = arith.constant 0 : index
    %33 = vector.load %arg14[%c0_24, %c5, %c0_25, %c0_26] : memref<2x12x12x8xf32, #tpu.memory_space<vmem>>, vector<1x1x12x8xf32>
    %34 = vector.shape_cast %33 : vector<1x1x12x8xf32> to vector<12x8xf32>
    %35 = vector.shape_cast %32 : vector<12x8xf32> to vector<1x1x12x8xf32>
    tpu.vector_store %arg14[%c0_24, %c5, %c0_25, %c0_26], %35 {strides = array<i32>} : memref<2x12x12x8xf32, #tpu.memory_space<vmem>>, vector<1x1x12x8xf32>,
    %36 = vector.extract_strided_slice %11 {offsets = [72, 0], sizes = [12, 8], strides = [1, 1]} : vector<288x8xf32> to vector<12x8xf32>
    %c0_27 = arith.constant 0 : index
    %c6 = arith.constant 6 : index
    %c0_28 = arith.constant 0 : index
    %c0_29 = arith.constant 0 : index
    %37 = vector.load %arg14[%c0_27, %c6, %c0_28, %c0_29] : memref<2x12x12x8xf32, #tpu.memory_space<vmem>>, vector<1x1x12x8xf32>
    %38 = vector.shape_cast %37 : vector<1x1x12x8xf32> to vector<12x8xf32>
    %39 = vector.shape_cast %36 : vector<12x8xf32> to vector<1x1x12x8xf32>
    tpu.vector_store %arg14[%c0_27, %c6, %c0_28, %c0_29], %39 {strides = array<i32>} : memref<2x12x12x8xf32, #tpu.memory_space<vmem>>, vector<1x1x12x8xf32>,
    %40 = vector.extract_strided_slice %11 {offsets = [84, 0], sizes = [12, 8], strides = [1, 1]} : vector<288x8xf32> to vector<12x8xf32>
    %c0_30 = arith.constant 0 : index
    %c7 = arith.constant 7 : index
    %c0_31 = arith.constant 0 : index
    %c0_32 = arith.constant 0 : index
    %41 = vector.load %arg14[%c0_30, %c7, %c0_31, %c0_32] : memref<2x12x12x8xf32, #tpu.memory_space<vmem>>, vector<1x1x12x8xf32>
    %42 = vector.shape_cast %41 : vector<1x1x12x8xf32> to vector<12x8xf32>
    %43 = vector.shape_cast %40 : vector<12x8xf32> to vector<1x1x12x8xf32>
    tpu.vector_store %arg14[%c0_30, %c7, %c0_31, %c0_32], %43 {strides = array<i32>} : memref<2x12x12x8xf32, #tpu.memory_space<vmem>>, vector<1x1x12x8xf32>,
    %44 = vector.extract_strided_slice %11 {offsets = [96, 0], sizes = [12, 8], strides = [1, 1]} : vector<288x8xf32> to vector<12x8xf32>
    %c0_33 = arith.constant 0 : index
    %c8 = arith.constant 8 : index
    %c0_34 = arith.constant 0 : index
    %c0_35 = arith.constant 0 : index
    %45 = vector.load %arg14[%c0_33, %c8, %c0_34, %c0_35] : memref<2x12x12x8xf32, #tpu.memory_space<vmem>>, vector<1x1x12x8xf32>
    %46 = vector.shape_cast %45 : vector<1x1x12x8xf32> to vector<12x8xf32>
    %47 = vector.shape_cast %44 : vector<12x8xf32> to vector<1x1x12x8xf32>
    tpu.vector_store %arg14[%c0_33, %c8, %c0_34, %c0_35], %47 {strides = array<i32>} : memref<2x12x12x8xf32, #tpu.memory_space<vmem>>, vector<1x1x12x8xf32>,
    %48 = vector.extract_strided_slice %11 {offsets = [108, 0], sizes = [12, 8], strides = [1, 1]} : vector<288x8xf32> to vector<12x8xf32>
    %c0_36 = arith.constant 0 : index
    %c9 = arith.constant 9 : index
    %c0_37 = arith.constant 0 : index
    %c0_38 = arith.constant 0 : index
    %49 = vector.load %arg14[%c0_36, %c9, %c0_37, %c0_38] : memref<2x12x12x8xf32, #tpu.memory_space<vmem>>, vector<1x1x12x8xf32>
    %50 = vector.shape_cast %49 : vector<1x1x12x8xf32> to vector<12x8xf32>
    %51 = vector.shape_cast %48 : vector<12x8xf32> to vector<1x1x12x8xf32>
    tpu.vector_store %arg14[%c0_36, %c9, %c0_37, %c0_38], %51 {strides = array<i32>} : memref<2x12x12x8xf32, #tpu.memory_space<vmem>>, vector<1x1x12x8xf32>,
    %52 = vector.extract_strided_slice %11 {offsets = [120, 0], sizes = [12, 8], strides = [1, 1]} : vector<288x8xf32> to vector<12x8xf32>
    %c0_39 = arith.constant 0 : index
    %c10 = arith.constant 10 : index
    %c0_40 = arith.constant 0 : index
    %c0_41 = arith.constant 0 : index
    %53 = vector.load %arg14[%c0_39, %c10, %c0_40, %c0_41] : memref<2x12x12x8xf32, #tpu.memory_space<vmem>>, vector<1x1x12x8xf32>
    %54 = vector.shape_cast %53 : vector<1x1x12x8xf32> to vector<12x8xf32>
    %55 = vector.shape_cast %52 : vector<12x8xf32> to vector<1x1x12x8xf32>
    tpu.vector_store %arg14[%c0_39, %c10, %c0_40, %c0_41], %55 {strides = array<i32>} : memref<2x12x12x8xf32, #tpu.memory_space<vmem>>, vector<1x1x12x8xf32>,
    %56 = vector.extract_strided_slice %11 {offsets = [132, 0], sizes = [12, 8], strides = [1, 1]} : vector<288x8xf32> to vector<12x8xf32>
    %c0_42 = arith.constant 0 : index
    %c11 = arith.constant 11 : index
    %c0_43 = arith.constant 0 : index
    %c0_44 = arith.constant 0 : index
    %57 = vector.load %arg14[%c0_42, %c11, %c0_43, %c0_44] : memref<2x12x12x8xf32, #tpu.memory_space<vmem>>, vector<1x1x12x8xf32>
    %58 = vector.shape_cast %57 : vector<1x1x12x8xf32> to vector<12x8xf32>
    %59 = vector.shape_cast %56 : vector<12x8xf32> to vector<1x1x12x8xf32>
    tpu.vector_store %arg14[%c0_42, %c11, %c0_43, %c0_44], %59 {strides = array<i32>} : memref<2x12x12x8xf32, #tpu.memory_space<vmem>>, vector<1x1x12x8xf32>,
    %60 = vector.extract_strided_slice %11 {offsets = [144, 0], sizes = [12, 8], strides = [1, 1]} : vector<288x8xf32> to vector<12x8xf32>
    %c1_45 = arith.constant 1 : index
    %c0_46 = arith.constant 0 : index
    %c0_47 = arith.constant 0 : index
    %c0_48 = arith.constant 0 : index
    %61 = vector.load %arg14[%c1_45, %c0_46, %c0_47, %c0_48] : memref<2x12x12x8xf32, #tpu.memory_space<vmem>>, vector<1x1x12x8xf32>
    %62 = vector.shape_cast %61 : vector<1x1x12x8xf32> to vector<12x8xf32>
    %63 = vector.shape_cast %60 : vector<12x8xf32> to vector<1x1x12x8xf32>
    tpu.vector_store %arg14[%c1_45, %c0_46, %c0_47, %c0_48], %63 {strides = array<i32>} : memref<2x12x12x8xf32, #tpu.memory_space<vmem>>, vector<1x1x12x8xf32>,
    %64 = vector.extract_strided_slice %11 {offsets = [156, 0], sizes = [12, 8], strides = [1, 1]} : vector<288x8xf32> to vector<12x8xf32>
    %c1_49 = arith.constant 1 : index
    %c1_50 = arith.constant 1 : index
    %c0_51 = arith.constant 0 : index
    %c0_52 = arith.constant 0 : index
    %65 = vector.load %arg14[%c1_49, %c1_50, %c0_51, %c0_52] : memref<2x12x12x8xf32, #tpu.memory_space<vmem>>, vector<1x1x12x8xf32>
    %66 = vector.shape_cast %65 : vector<1x1x12x8xf32> to vector<12x8xf32>
    %67 = vector.shape_cast %64 : vector<12x8xf32> to vector<1x1x12x8xf32>
    tpu.vector_store %arg14[%c1_49, %c1_50, %c0_51, %c0_52], %67 {strides = array<i32>} : memref<2x12x12x8xf32, #tpu.memory_space<vmem>>, vector<1x1x12x8xf32>,
    %68 = vector.extract_strided_slice %11 {offsets = [168, 0], sizes = [12, 8], strides = [1, 1]} : vector<288x8xf32> to vector<12x8xf32>
    %c1_53 = arith.constant 1 : index
    %c2_54 = arith.constant 2 : index
    %c0_55 = arith.constant 0 : index
    %c0_56 = arith.constant 0 : index
    %69 = vector.load %arg14[%c1_53, %c2_54, %c0_55, %c0_56] : memref<2x12x12x8xf32, #tpu.memory_space<vmem>>, vector<1x1x12x8xf32>
    %70 = vector.shape_cast %69 : vector<1x1x12x8xf32> to vector<12x8xf32>
    %71 = vector.shape_cast %68 : vector<12x8xf32> to vector<1x1x12x8xf32>
    tpu.vector_store %arg14[%c1_53, %c2_54, %c0_55, %c0_56], %71 {strides = array<i32>} : memref<2x12x12x8xf32, #tpu.memory_space<vmem>>, vector<1x1x12x8xf32>,
    %72 = vector.extract_strided_slice %11 {offsets = [180, 0], sizes = [12, 8], strides = [1, 1]} : vector<288x8xf32> to vector<12x8xf32>
    %c1_57 = arith.constant 1 : index
    %c3_58 = arith.constant 3 : index
    %c0_59 = arith.constant 0 : index
    %c0_60 = arith.constant 0 : index
    %73 = vector.load %arg14[%c1_57, %c3_58, %c0_59, %c0_60] : memref<2x12x12x8xf32, #tpu.memory_space<vmem>>, vector<1x1x12x8xf32>
    %74 = vector.shape_cast %73 : vector<1x1x12x8xf32> to vector<12x8xf32>
    %75 = vector.shape_cast %72 : vector<12x8xf32> to vector<1x1x12x8xf32>
    tpu.vector_store %arg14[%c1_57, %c3_58, %c0_59, %c0_60], %75 {strides = array<i32>} : memref<2x12x12x8xf32, #tpu.memory_space<vmem>>, vector<1x1x12x8xf32>,
    %76 = vector.extract_strided_slice %11 {offsets = [192, 0], sizes = [12, 8], strides = [1, 1]} : vector<288x8xf32> to vector<12x8xf32>
    %c1_61 = arith.constant 1 : index
    %c4_62 = arith.constant 4 : index
    %c0_63 = arith.constant 0 : index
    %c0_64 = arith.constant 0 : index
    %77 = vector.load %arg14[%c1_61, %c4_62, %c0_63, %c0_64] : memref<2x12x12x8xf32, #tpu.memory_space<vmem>>, vector<1x1x12x8xf32>
    %78 = vector.shape_cast %77 : vector<1x1x12x8xf32> to vector<12x8xf32>
    %79 = vector.shape_cast %76 : vector<12x8xf32> to vector<1x1x12x8xf32>
    tpu.vector_store %arg14[%c1_61, %c4_62, %c0_63, %c0_64], %79 {strides = array<i32>} : memref<2x12x12x8xf32, #tpu.memory_space<vmem>>, vector<1x1x12x8xf32>,
    %80 = vector.extract_strided_slice %11 {offsets = [204, 0], sizes = [12, 8], strides = [1, 1]} : vector<288x8xf32> to vector<12x8xf32>
    %c1_65 = arith.constant 1 : index
    %c5_66 = arith.constant 5 : index
    %c0_67 = arith.constant 0 : index
    %c0_68 = arith.constant 0 : index
    %81 = vector.load %arg14[%c1_65, %c5_66, %c0_67, %c0_68] : memref<2x12x12x8xf32, #tpu.memory_space<vmem>>, vector<1x1x12x8xf32>
    %82 = vector.shape_cast %81 : vector<1x1x12x8xf32> to vector<12x8xf32>
    %83 = vector.shape_cast %80 : vector<12x8xf32> to vector<1x1x12x8xf32>
    tpu.vector_store %arg14[%c1_65, %c5_66, %c0_67, %c0_68], %83 {strides = array<i32>} : memref<2x12x12x8xf32, #tpu.memory_space<vmem>>, vector<1x1x12x8xf32>,
    %84 = vector.extract_strided_slice %11 {offsets = [216, 0], sizes = [12, 8], strides = [1, 1]} : vector<288x8xf32> to vector<12x8xf32>
    %c1_69 = arith.constant 1 : index
    %c6_70 = arith.constant 6 : index
    %c0_71 = arith.constant 0 : index
    %c0_72 = arith.constant 0 : index
    %85 = vector.load %arg14[%c1_69, %c6_70, %c0_71, %c0_72] : memref<2x12x12x8xf32, #tpu.memory_space<vmem>>, vector<1x1x12x8xf32>
    %86 = vector.shape_cast %85 : vector<1x1x12x8xf32> to vector<12x8xf32>
    %87 = vector.shape_cast %84 : vector<12x8xf32> to vector<1x1x12x8xf32>
    tpu.vector_store %arg14[%c1_69, %c6_70, %c0_71, %c0_72], %87 {strides = array<i32>} : memref<2x12x12x8xf32, #tpu.memory_space<vmem>>, vector<1x1x12x8xf32>,
    %88 = vector.extract_strided_slice %11 {offsets = [228, 0], sizes = [12, 8], strides = [1, 1]} : vector<288x8xf32> to vector<12x8xf32>
    %c1_73 = arith.constant 1 : index
    %c7_74 = arith.constant 7 : index
    %c0_75 = arith.constant 0 : index
    %c0_76 = arith.constant 0 : index
    %89 = vector.load %arg14[%c1_73, %c7_74, %c0_75, %c0_76] : memref<2x12x12x8xf32, #tpu.memory_space<vmem>>, vector<1x1x12x8xf32>
    %90 = vector.shape_cast %89 : vector<1x1x12x8xf32> to vector<12x8xf32>
    %91 = vector.shape_cast %88 : vector<12x8xf32> to vector<1x1x12x8xf32>
    tpu.vector_store %arg14[%c1_73, %c7_74, %c0_75, %c0_76], %91 {strides = array<i32>} : memref<2x12x12x8xf32, #tpu.memory_space<vmem>>, vector<1x1x12x8xf32>,
    %92 = vector.extract_strided_slice %11 {offsets = [240, 0], sizes = [12, 8], strides = [1, 1]} : vector<288x8xf32> to vector<12x8xf32>
    %c1_77 = arith.constant 1 : index
    %c8_78 = arith.constant 8 : index
    %c0_79 = arith.constant 0 : index
    %c0_80 = arith.constant 0 : index
    %93 = vector.load %arg14[%c1_77, %c8_78, %c0_79, %c0_80] : memref<2x12x12x8xf32, #tpu.memory_space<vmem>>, vector<1x1x12x8xf32>
    %94 = vector.shape_cast %93 : vector<1x1x12x8xf32> to vector<12x8xf32>
    %95 = vector.shape_cast %92 : vector<12x8xf32> to vector<1x1x12x8xf32>
    tpu.vector_store %arg14[%c1_77, %c8_78, %c0_79, %c0_80], %95 {strides = array<i32>} : memref<2x12x12x8xf32, #tpu.memory_space<vmem>>, vector<1x1x12x8xf32>,
    %96 = vector.extract_strided_slice %11 {offsets = [252, 0], sizes = [12, 8], strides = [1, 1]} : vector<288x8xf32> to vector<12x8xf32>
    %c1_81 = arith.constant 1 : index
    %c9_82 = arith.constant 9 : index
    %c0_83 = arith.constant 0 : index
    %c0_84 = arith.constant 0 : index
    %97 = vector.load %arg14[%c1_81, %c9_82, %c0_83, %c0_84] : memref<2x12x12x8xf32, #tpu.memory_space<vmem>>, vector<1x1x12x8xf32>
    %98 = vector.shape_cast %97 : vector<1x1x12x8xf32> to vector<12x8xf32>
    %99 = vector.shape_cast %96 : vector<12x8xf32> to vector<1x1x12x8xf32>
    tpu.vector_store %arg14[%c1_81, %c9_82, %c0_83, %c0_84], %99 {strides = array<i32>} : memref<2x12x12x8xf32, #tpu.memory_space<vmem>>, vector<1x1x12x8xf32>,
    %100 = vector.extract_strided_slice %11 {offsets = [264, 0], sizes = [12, 8], strides = [1, 1]} : vector<288x8xf32> to vector<12x8xf32>
    %c1_85 = arith.constant 1 : index
    %c10_86 = arith.constant 10 : index
    %c0_87 = arith.constant 0 : index
    %c0_88 = arith.constant 0 : index
    %101 = vector.load %arg14[%c1_85, %c10_86, %c0_87, %c0_88] : memref<2x12x12x8xf32, #tpu.memory_space<vmem>>, vector<1x1x12x8xf32>
    %102 = vector.shape_cast %101 : vector<1x1x12x8xf32> to vector<12x8xf32>
    %103 = vector.shape_cast %100 : vector<12x8xf32> to vector<1x1x12x8xf32>
    tpu.vector_store %arg14[%c1_85, %c10_86, %c0_87, %c0_88], %103 {strides = array<i32>} : memref<2x12x12x8xf32, #tpu.memory_space<vmem>>, vector<1x1x12x8xf32>,
    %104 = vector.extract_strided_slice %11 {offsets = [276, 0], sizes = [12, 8], strides = [1, 1]} : vector<288x8xf32> to vector<12x8xf32>
    %c1_89 = arith.constant 1 : index
    %c11_90 = arith.constant 11 : index
    %c0_91 = arith.constant 0 : index
    %c0_92 = arith.constant 0 : index
    %105 = vector.load %arg14[%c1_89, %c11_90, %c0_91, %c0_92] : memref<2x12x12x8xf32, #tpu.memory_space<vmem>>, vector<1x1x12x8xf32>
    %106 = vector.shape_cast %105 : vector<1x1x12x8xf32> to vector<12x8xf32>
    %107 = vector.shape_cast %104 : vector<12x8xf32> to vector<1x1x12x8xf32>
    tpu.vector_store %arg14[%c1_89, %c11_90, %c0_91, %c0_92], %107 {strides = array<i32>} : memref<2x12x12x8xf32, #tpu.memory_space<vmem>>, vector<1x1x12x8xf32>,
    %cst_93 = arith.constant 0.000000e+00 : f32
    %108 = vector.broadcast %cst_93 : f32 to vector<128x16xf32>
    %c0_94 = arith.constant 0 : index
    %c0_95 = arith.constant 0 : index
    %c0_96 = arith.constant 0 : index
    %c0_97 = arith.constant 0 : index
    %109 = vector.load %arg14[%c0_94, %c0_95, %c0_96, %c0_97] : memref<2x12x12x8xf32, #tpu.memory_space<vmem>>, vector<2x8x8x8xf32>
    %110 = vector.shape_cast %109 : vector<2x8x8x8xf32> to vector<128x8xf32>
    %111 = arith.truncf %110 : vector<128x8xf32> to vector<128x8xbf16>
    %c0_98 = arith.constant 0 : index
    %c0_99 = arith.constant 0 : index
    %c0_100 = arith.constant 0 : index
    %112 = vector.load %arg4[%c0_98, %c0_99, %c0_100] : memref<25x8x16xbf16, #tpu.memory_space<vmem>>, vector<1x8x16xbf16>
    %113 = vector.shape_cast %112 : vector<1x8x16xbf16> to vector<8x16xbf16>
    %cst_101 = arith.constant dense<0.000000e+00> : vector<128x16xf32>
    %114 = tpu.matmul %111, %113, %cst_101 {dimension_numbers = #tpu.dot_dimension_numbers<[1], [0], [0], [1], [0, 0, 1, 1], [], []>} : vector<128x8xbf16>, vector<8x16xbf16>, vector<128x16xf32> -> vector<128x16xf32>
    %115 = arith.addf %108, %114 : vector<128x16xf32>
    %c0_102 = arith.constant 0 : index
    %c0_103 = arith.constant 0 : index
    %c1_104 = arith.constant 1 : index
    %c0_105 = arith.constant 0 : index
    %116 = vector.load %arg14[%c0_102, %c0_103, %c1_104, %c0_105] : memref<2x12x12x8xf32, #tpu.memory_space<vmem>>, vector<2x8x8x8xf32>
    %117 = vector.shape_cast %116 : vector<2x8x8x8xf32> to vector<128x8xf32>
    %118 = arith.truncf %117 : vector<128x8xf32> to vector<128x8xbf16>
    %c1_106 = arith.constant 1 : index
    %c0_107 = arith.constant 0 : index
    %c0_108 = arith.constant 0 : index
    %119 = vector.load %arg4[%c1_106, %c0_107, %c0_108] : memref<25x8x16xbf16, #tpu.memory_space<vmem>>, vector<1x8x16xbf16>
    %120 = vector.shape_cast %119 : vector<1x8x16xbf16> to vector<8x16xbf16>
    %cst_109 = arith.constant dense<0.000000e+00> : vector<128x16xf32>
    %121 = tpu.matmul %118, %120, %cst_109 {dimension_numbers = #tpu.dot_dimension_numbers<[1], [0], [0], [1], [0, 0, 1, 1], [], []>} : vector<128x8xbf16>, vector<8x16xbf16>, vector<128x16xf32> -> vector<128x16xf32>
    %122 = arith.addf %115, %121 : vector<128x16xf32>
    %c0_110 = arith.constant 0 : index
    %c0_111 = arith.constant 0 : index
    %c2_112 = arith.constant 2 : index
    %c0_113 = arith.constant 0 : index
    %123 = vector.load %arg14[%c0_110, %c0_111, %c2_112, %c0_113] : memref<2x12x12x8xf32, #tpu.memory_space<vmem>>, vector<2x8x8x8xf32>
    %124 = vector.shape_cast %123 : vector<2x8x8x8xf32> to vector<128x8xf32>
    %125 = arith.truncf %124 : vector<128x8xf32> to vector<128x8xbf16>
    %c2_114 = arith.constant 2 : index
    %c0_115 = arith.constant 0 : index
    %c0_116 = arith.constant 0 : index
    %126 = vector.load %arg4[%c2_114, %c0_115, %c0_116] : memref<25x8x16xbf16, #tpu.memory_space<vmem>>, vector<1x8x16xbf16>
    %127 = vector.shape_cast %126 : vector<1x8x16xbf16> to vector<8x16xbf16>
    %cst_117 = arith.constant dense<0.000000e+00> : vector<128x16xf32>
    %128 = tpu.matmul %125, %127, %cst_117 {dimension_numbers = #tpu.dot_dimension_numbers<[1], [0], [0], [1], [0, 0, 1, 1], [], []>} : vector<128x8xbf16>, vector<8x16xbf16>, vector<128x16xf32> -> vector<128x16xf32>
    %129 = arith.addf %122, %128 : vector<128x16xf32>
    %c0_118 = arith.constant 0 : index
    %c0_119 = arith.constant 0 : index
    %c3_120 = arith.constant 3 : index
    %c0_121 = arith.constant 0 : index
    %130 = vector.load %arg14[%c0_118, %c0_119, %c3_120, %c0_121] : memref<2x12x12x8xf32, #tpu.memory_space<vmem>>, vector<2x8x8x8xf32>
    %131 = vector.shape_cast %130 : vector<2x8x8x8xf32> to vector<128x8xf32>
    %132 = arith.truncf %131 : vector<128x8xf32> to vector<128x8xbf16>
    %c3_122 = arith.constant 3 : index
    %c0_123 = arith.constant 0 : index
    %c0_124 = arith.constant 0 : index
    %133 = vector.load %arg4[%c3_122, %c0_123, %c0_124] : memref<25x8x16xbf16, #tpu.memory_space<vmem>>, vector<1x8x16xbf16>
    %134 = vector.shape_cast %133 : vector<1x8x16xbf16> to vector<8x16xbf16>
    %cst_125 = arith.constant dense<0.000000e+00> : vector<128x16xf32>
    %135 = tpu.matmul %132, %134, %cst_125 {dimension_numbers = #tpu.dot_dimension_numbers<[1], [0], [0], [1], [0, 0, 1, 1], [], []>} : vector<128x8xbf16>, vector<8x16xbf16>, vector<128x16xf32> -> vector<128x16xf32>
    %136 = arith.addf %129, %135 : vector<128x16xf32>
    %c0_126 = arith.constant 0 : index
    %c0_127 = arith.constant 0 : index
    %c4_128 = arith.constant 4 : index
    %c0_129 = arith.constant 0 : index
    %137 = vector.load %arg14[%c0_126, %c0_127, %c4_128, %c0_129] : memref<2x12x12x8xf32, #tpu.memory_space<vmem>>, vector<2x8x8x8xf32>
    %138 = vector.shape_cast %137 : vector<2x8x8x8xf32> to vector<128x8xf32>
    %139 = arith.truncf %138 : vector<128x8xf32> to vector<128x8xbf16>
    %c4_130 = arith.constant 4 : index
    %c0_131 = arith.constant 0 : index
    %c0_132 = arith.constant 0 : index
    %140 = vector.load %arg4[%c4_130, %c0_131, %c0_132] : memref<25x8x16xbf16, #tpu.memory_space<vmem>>, vector<1x8x16xbf16>
    %141 = vector.shape_cast %140 : vector<1x8x16xbf16> to vector<8x16xbf16>
    %cst_133 = arith.constant dense<0.000000e+00> : vector<128x16xf32>
    %142 = tpu.matmul %139, %141, %cst_133 {dimension_numbers = #tpu.dot_dimension_numbers<[1], [0], [0], [1], [0, 0, 1, 1], [], []>} : vector<128x8xbf16>, vector<8x16xbf16>, vector<128x16xf32> -> vector<128x16xf32>
    %143 = arith.addf %136, %142 : vector<128x16xf32>
    %c0_134 = arith.constant 0 : index
    %c1_135 = arith.constant 1 : index
    %c0_136 = arith.constant 0 : index
    %c0_137 = arith.constant 0 : index
    %144 = vector.load %arg14[%c0_134, %c1_135, %c0_136, %c0_137] : memref<2x12x12x8xf32, #tpu.memory_space<vmem>>, vector<2x8x8x8xf32>
    %145 = vector.shape_cast %144 : vector<2x8x8x8xf32> to vector<128x8xf32>
    %146 = arith.truncf %145 : vector<128x8xf32> to vector<128x8xbf16>
    %c5_138 = arith.constant 5 : index
    %c0_139 = arith.constant 0 : index
    %c0_140 = arith.constant 0 : index
    %147 = vector.load %arg4[%c5_138, %c0_139, %c0_140] : memref<25x8x16xbf16, #tpu.memory_space<vmem>>, vector<1x8x16xbf16>
    %148 = vector.shape_cast %147 : vector<1x8x16xbf16> to vector<8x16xbf16>
    %cst_141 = arith.constant dense<0.000000e+00> : vector<128x16xf32>
    %149 = tpu.matmul %146, %148, %cst_141 {dimension_numbers = #tpu.dot_dimension_numbers<[1], [0], [0], [1], [0, 0, 1, 1], [], []>} : vector<128x8xbf16>, vector<8x16xbf16>, vector<128x16xf32> -> vector<128x16xf32>
    %150 = arith.addf %143, %149 : vector<128x16xf32>
    %c0_142 = arith.constant 0 : index
    %c1_143 = arith.constant 1 : index
    %c1_144 = arith.constant 1 : index
    %c0_145 = arith.constant 0 : index
    %151 = vector.load %arg14[%c0_142, %c1_143, %c1_144, %c0_145] : memref<2x12x12x8xf32, #tpu.memory_space<vmem>>, vector<2x8x8x8xf32>
    %152 = vector.shape_cast %151 : vector<2x8x8x8xf32> to vector<128x8xf32>
    %153 = arith.truncf %152 : vector<128x8xf32> to vector<128x8xbf16>
    %c6_146 = arith.constant 6 : index
    %c0_147 = arith.constant 0 : index
    %c0_148 = arith.constant 0 : index
    %154 = vector.load %arg4[%c6_146, %c0_147, %c0_148] : memref<25x8x16xbf16, #tpu.memory_space<vmem>>, vector<1x8x16xbf16>
    %155 = vector.shape_cast %154 : vector<1x8x16xbf16> to vector<8x16xbf16>
    %cst_149 = arith.constant dense<0.000000e+00> : vector<128x16xf32>
    %156 = tpu.matmul %153, %155, %cst_149 {dimension_numbers = #tpu.dot_dimension_numbers<[1], [0], [0], [1], [0, 0, 1, 1], [], []>} : vector<128x8xbf16>, vector<8x16xbf16>, vector<128x16xf32> -> vector<128x16xf32>
    %157 = arith.addf %150, %156 : vector<128x16xf32>
    %c0_150 = arith.constant 0 : index
    %c1_151 = arith.constant 1 : index
    %c2_152 = arith.constant 2 : index
    %c0_153 = arith.constant 0 : index
    %158 = vector.load %arg14[%c0_150, %c1_151, %c2_152, %c0_153] : memref<2x12x12x8xf32, #tpu.memory_space<vmem>>, vector<2x8x8x8xf32>
    %159 = vector.shape_cast %158 : vector<2x8x8x8xf32> to vector<128x8xf32>
    %160 = arith.truncf %159 : vector<128x8xf32> to vector<128x8xbf16>
    %c7_154 = arith.constant 7 : index
    %c0_155 = arith.constant 0 : index
    %c0_156 = arith.constant 0 : index
    %161 = vector.load %arg4[%c7_154, %c0_155, %c0_156] : memref<25x8x16xbf16, #tpu.memory_space<vmem>>, vector<1x8x16xbf16>
    %162 = vector.shape_cast %161 : vector<1x8x16xbf16> to vector<8x16xbf16>
    %cst_157 = arith.constant dense<0.000000e+00> : vector<128x16xf32>
    %163 = tpu.matmul %160, %162, %cst_157 {dimension_numbers = #tpu.dot_dimension_numbers<[1], [0], [0], [1], [0, 0, 1, 1], [], []>} : vector<128x8xbf16>, vector<8x16xbf16>, vector<128x16xf32> -> vector<128x16xf32>
    %164 = arith.addf %157, %163 : vector<128x16xf32>
    %c0_158 = arith.constant 0 : index
    %c1_159 = arith.constant 1 : index
    %c3_160 = arith.constant 3 : index
    %c0_161 = arith.constant 0 : index
    %165 = vector.load %arg14[%c0_158, %c1_159, %c3_160, %c0_161] : memref<2x12x12x8xf32, #tpu.memory_space<vmem>>, vector<2x8x8x8xf32>
    %166 = vector.shape_cast %165 : vector<2x8x8x8xf32> to vector<128x8xf32>
    %167 = arith.truncf %166 : vector<128x8xf32> to vector<128x8xbf16>
    %c8_162 = arith.constant 8 : index
    %c0_163 = arith.constant 0 : index
    %c0_164 = arith.constant 0 : index
    %168 = vector.load %arg4[%c8_162, %c0_163, %c0_164] : memref<25x8x16xbf16, #tpu.memory_space<vmem>>, vector<1x8x16xbf16>
    %169 = vector.shape_cast %168 : vector<1x8x16xbf16> to vector<8x16xbf16>
    %cst_165 = arith.constant dense<0.000000e+00> : vector<128x16xf32>
    %170 = tpu.matmul %167, %169, %cst_165 {dimension_numbers = #tpu.dot_dimension_numbers<[1], [0], [0], [1], [0, 0, 1, 1], [], []>} : vector<128x8xbf16>, vector<8x16xbf16>, vector<128x16xf32> -> vector<128x16xf32>
    %171 = arith.addf %164, %170 : vector<128x16xf32>
    %c0_166 = arith.constant 0 : index
    %c1_167 = arith.constant 1 : index
    %c4_168 = arith.constant 4 : index
    %c0_169 = arith.constant 0 : index
    %172 = vector.load %arg14[%c0_166, %c1_167, %c4_168, %c0_169] : memref<2x12x12x8xf32, #tpu.memory_space<vmem>>, vector<2x8x8x8xf32>
    %173 = vector.shape_cast %172 : vector<2x8x8x8xf32> to vector<128x8xf32>
    %174 = arith.truncf %173 : vector<128x8xf32> to vector<128x8xbf16>
    %c9_170 = arith.constant 9 : index
    %c0_171 = arith.constant 0 : index
    %c0_172 = arith.constant 0 : index
    %175 = vector.load %arg4[%c9_170, %c0_171, %c0_172] : memref<25x8x16xbf16, #tpu.memory_space<vmem>>, vector<1x8x16xbf16>
    %176 = vector.shape_cast %175 : vector<1x8x16xbf16> to vector<8x16xbf16>
    %cst_173 = arith.constant dense<0.000000e+00> : vector<128x16xf32>
    %177 = tpu.matmul %174, %176, %cst_173 {dimension_numbers = #tpu.dot_dimension_numbers<[1], [0], [0], [1], [0, 0, 1, 1], [], []>} : vector<128x8xbf16>, vector<8x16xbf16>, vector<128x16xf32> -> vector<128x16xf32>
    %178 = arith.addf %171, %177 : vector<128x16xf32>
    %c0_174 = arith.constant 0 : index
    %c2_175 = arith.constant 2 : index
    %c0_176 = arith.constant 0 : index
    %c0_177 = arith.constant 0 : index
    %179 = vector.load %arg14[%c0_174, %c2_175, %c0_176, %c0_177] : memref<2x12x12x8xf32, #tpu.memory_space<vmem>>, vector<2x8x8x8xf32>
    %180 = vector.shape_cast %179 : vector<2x8x8x8xf32> to vector<128x8xf32>
    %181 = arith.truncf %180 : vector<128x8xf32> to vector<128x8xbf16>
    %c10_178 = arith.constant 10 : index
    %c0_179 = arith.constant 0 : index
    %c0_180 = arith.constant 0 : index
    %182 = vector.load %arg4[%c10_178, %c0_179, %c0_180] : memref<25x8x16xbf16, #tpu.memory_space<vmem>>, vector<1x8x16xbf16>
    %183 = vector.shape_cast %182 : vector<1x8x16xbf16> to vector<8x16xbf16>
    %cst_181 = arith.constant dense<0.000000e+00> : vector<128x16xf32>
    %184 = tpu.matmul %181, %183, %cst_181 {dimension_numbers = #tpu.dot_dimension_numbers<[1], [0], [0], [1], [0, 0, 1, 1], [], []>} : vector<128x8xbf16>, vector<8x16xbf16>, vector<128x16xf32> -> vector<128x16xf32>
    %185 = arith.addf %178, %184 : vector<128x16xf32>
    %c0_182 = arith.constant 0 : index
    %c2_183 = arith.constant 2 : index
    %c1_184 = arith.constant 1 : index
    %c0_185 = arith.constant 0 : index
    %186 = vector.load %arg14[%c0_182, %c2_183, %c1_184, %c0_185] : memref<2x12x12x8xf32, #tpu.memory_space<vmem>>, vector<2x8x8x8xf32>
    %187 = vector.shape_cast %186 : vector<2x8x8x8xf32> to vector<128x8xf32>
    %188 = arith.truncf %187 : vector<128x8xf32> to vector<128x8xbf16>
    %c11_186 = arith.constant 11 : index
    %c0_187 = arith.constant 0 : index
    %c0_188 = arith.constant 0 : index
    %189 = vector.load %arg4[%c11_186, %c0_187, %c0_188] : memref<25x8x16xbf16, #tpu.memory_space<vmem>>, vector<1x8x16xbf16>
    %190 = vector.shape_cast %189 : vector<1x8x16xbf16> to vector<8x16xbf16>
    %cst_189 = arith.constant dense<0.000000e+00> : vector<128x16xf32>
    %191 = tpu.matmul %188, %190, %cst_189 {dimension_numbers = #tpu.dot_dimension_numbers<[1], [0], [0], [1], [0, 0, 1, 1], [], []>} : vector<128x8xbf16>, vector<8x16xbf16>, vector<128x16xf32> -> vector<128x16xf32>
    %192 = arith.addf %185, %191 : vector<128x16xf32>
    %c0_190 = arith.constant 0 : index
    %c2_191 = arith.constant 2 : index
    %c2_192 = arith.constant 2 : index
    %c0_193 = arith.constant 0 : index
    %193 = vector.load %arg14[%c0_190, %c2_191, %c2_192, %c0_193] : memref<2x12x12x8xf32, #tpu.memory_space<vmem>>, vector<2x8x8x8xf32>
    %194 = vector.shape_cast %193 : vector<2x8x8x8xf32> to vector<128x8xf32>
    %195 = arith.truncf %194 : vector<128x8xf32> to vector<128x8xbf16>
    %c12 = arith.constant 12 : index
    %c0_194 = arith.constant 0 : index
    %c0_195 = arith.constant 0 : index
    %196 = vector.load %arg4[%c12, %c0_194, %c0_195] : memref<25x8x16xbf16, #tpu.memory_space<vmem>>, vector<1x8x16xbf16>
    %197 = vector.shape_cast %196 : vector<1x8x16xbf16> to vector<8x16xbf16>
    %cst_196 = arith.constant dense<0.000000e+00> : vector<128x16xf32>
    %198 = tpu.matmul %195, %197, %cst_196 {dimension_numbers = #tpu.dot_dimension_numbers<[1], [0], [0], [1], [0, 0, 1, 1], [], []>} : vector<128x8xbf16>, vector<8x16xbf16>, vector<128x16xf32> -> vector<128x16xf32>
    %199 = arith.addf %192, %198 : vector<128x16xf32>
    %c0_197 = arith.constant 0 : index
    %c2_198 = arith.constant 2 : index
    %c3_199 = arith.constant 3 : index
    %c0_200 = arith.constant 0 : index
    %200 = vector.load %arg14[%c0_197, %c2_198, %c3_199, %c0_200] : memref<2x12x12x8xf32, #tpu.memory_space<vmem>>, vector<2x8x8x8xf32>
    %201 = vector.shape_cast %200 : vector<2x8x8x8xf32> to vector<128x8xf32>
    %202 = arith.truncf %201 : vector<128x8xf32> to vector<128x8xbf16>
    %c13 = arith.constant 13 : index
    %c0_201 = arith.constant 0 : index
    %c0_202 = arith.constant 0 : index
    %203 = vector.load %arg4[%c13, %c0_201, %c0_202] : memref<25x8x16xbf16, #tpu.memory_space<vmem>>, vector<1x8x16xbf16>
    %204 = vector.shape_cast %203 : vector<1x8x16xbf16> to vector<8x16xbf16>
    %cst_203 = arith.constant dense<0.000000e+00> : vector<128x16xf32>
    %205 = tpu.matmul %202, %204, %cst_203 {dimension_numbers = #tpu.dot_dimension_numbers<[1], [0], [0], [1], [0, 0, 1, 1], [], []>} : vector<128x8xbf16>, vector<8x16xbf16>, vector<128x16xf32> -> vector<128x16xf32>
    %206 = arith.addf %199, %205 : vector<128x16xf32>
    %c0_204 = arith.constant 0 : index
    %c2_205 = arith.constant 2 : index
    %c4_206 = arith.constant 4 : index
    %c0_207 = arith.constant 0 : index
    %207 = vector.load %arg14[%c0_204, %c2_205, %c4_206, %c0_207] : memref<2x12x12x8xf32, #tpu.memory_space<vmem>>, vector<2x8x8x8xf32>
    %208 = vector.shape_cast %207 : vector<2x8x8x8xf32> to vector<128x8xf32>
    %209 = arith.truncf %208 : vector<128x8xf32> to vector<128x8xbf16>
    %c14 = arith.constant 14 : index
    %c0_208 = arith.constant 0 : index
    %c0_209 = arith.constant 0 : index
    %210 = vector.load %arg4[%c14, %c0_208, %c0_209] : memref<25x8x16xbf16, #tpu.memory_space<vmem>>, vector<1x8x16xbf16>
    %211 = vector.shape_cast %210 : vector<1x8x16xbf16> to vector<8x16xbf16>
    %cst_210 = arith.constant dense<0.000000e+00> : vector<128x16xf32>
    %212 = tpu.matmul %209, %211, %cst_210 {dimension_numbers = #tpu.dot_dimension_numbers<[1], [0], [0], [1], [0, 0, 1, 1], [], []>} : vector<128x8xbf16>, vector<8x16xbf16>, vector<128x16xf32> -> vector<128x16xf32>
    %213 = arith.addf %206, %212 : vector<128x16xf32>
    %c0_211 = arith.constant 0 : index
    %c3_212 = arith.constant 3 : index
    %c0_213 = arith.constant 0 : index
    %c0_214 = arith.constant 0 : index
    %214 = vector.load %arg14[%c0_211, %c3_212, %c0_213, %c0_214] : memref<2x12x12x8xf32, #tpu.memory_space<vmem>>, vector<2x8x8x8xf32>
    %215 = vector.shape_cast %214 : vector<2x8x8x8xf32> to vector<128x8xf32>
    %216 = arith.truncf %215 : vector<128x8xf32> to vector<128x8xbf16>
    %c15 = arith.constant 15 : index
    %c0_215 = arith.constant 0 : index
    %c0_216 = arith.constant 0 : index
    %217 = vector.load %arg4[%c15, %c0_215, %c0_216] : memref<25x8x16xbf16, #tpu.memory_space<vmem>>, vector<1x8x16xbf16>
    %218 = vector.shape_cast %217 : vector<1x8x16xbf16> to vector<8x16xbf16>
    %cst_217 = arith.constant dense<0.000000e+00> : vector<128x16xf32>
    %219 = tpu.matmul %216, %218, %cst_217 {dimension_numbers = #tpu.dot_dimension_numbers<[1], [0], [0], [1], [0, 0, 1, 1], [], []>} : vector<128x8xbf16>, vector<8x16xbf16>, vector<128x16xf32> -> vector<128x16xf32>
    %220 = arith.addf %213, %219 : vector<128x16xf32>
    %c0_218 = arith.constant 0 : index
    %c3_219 = arith.constant 3 : index
    %c1_220 = arith.constant 1 : index
    %c0_221 = arith.constant 0 : index
    %221 = vector.load %arg14[%c0_218, %c3_219, %c1_220, %c0_221] : memref<2x12x12x8xf32, #tpu.memory_space<vmem>>, vector<2x8x8x8xf32>
    %222 = vector.shape_cast %221 : vector<2x8x8x8xf32> to vector<128x8xf32>
    %223 = arith.truncf %222 : vector<128x8xf32> to vector<128x8xbf16>
    %c16 = arith.constant 16 : index
    %c0_222 = arith.constant 0 : index
    %c0_223 = arith.constant 0 : index
    %224 = vector.load %arg4[%c16, %c0_222, %c0_223] : memref<25x8x16xbf16, #tpu.memory_space<vmem>>, vector<1x8x16xbf16>
    %225 = vector.shape_cast %224 : vector<1x8x16xbf16> to vector<8x16xbf16>
    %cst_224 = arith.constant dense<0.000000e+00> : vector<128x16xf32>
    %226 = tpu.matmul %223, %225, %cst_224 {dimension_numbers = #tpu.dot_dimension_numbers<[1], [0], [0], [1], [0, 0, 1, 1], [], []>} : vector<128x8xbf16>, vector<8x16xbf16>, vector<128x16xf32> -> vector<128x16xf32>
    %227 = arith.addf %220, %226 : vector<128x16xf32>
    %c0_225 = arith.constant 0 : index
    %c3_226 = arith.constant 3 : index
    %c2_227 = arith.constant 2 : index
    %c0_228 = arith.constant 0 : index
    %228 = vector.load %arg14[%c0_225, %c3_226, %c2_227, %c0_228] : memref<2x12x12x8xf32, #tpu.memory_space<vmem>>, vector<2x8x8x8xf32>
    %229 = vector.shape_cast %228 : vector<2x8x8x8xf32> to vector<128x8xf32>
    %230 = arith.truncf %229 : vector<128x8xf32> to vector<128x8xbf16>
    %c17 = arith.constant 17 : index
    %c0_229 = arith.constant 0 : index
    %c0_230 = arith.constant 0 : index
    %231 = vector.load %arg4[%c17, %c0_229, %c0_230] : memref<25x8x16xbf16, #tpu.memory_space<vmem>>, vector<1x8x16xbf16>
    %232 = vector.shape_cast %231 : vector<1x8x16xbf16> to vector<8x16xbf16>
    %cst_231 = arith.constant dense<0.000000e+00> : vector<128x16xf32>
    %233 = tpu.matmul %230, %232, %cst_231 {dimension_numbers = #tpu.dot_dimension_numbers<[1], [0], [0], [1], [0, 0, 1, 1], [], []>} : vector<128x8xbf16>, vector<8x16xbf16>, vector<128x16xf32> -> vector<128x16xf32>
    %234 = arith.addf %227, %233 : vector<128x16xf32>
    %c0_232 = arith.constant 0 : index
    %c3_233 = arith.constant 3 : index
    %c3_234 = arith.constant 3 : index
    %c0_235 = arith.constant 0 : index
    %235 = vector.load %arg14[%c0_232, %c3_233, %c3_234, %c0_235] : memref<2x12x12x8xf32, #tpu.memory_space<vmem>>, vector<2x8x8x8xf32>
    %236 = vector.shape_cast %235 : vector<2x8x8x8xf32> to vector<128x8xf32>
    %237 = arith.truncf %236 : vector<128x8xf32> to vector<128x8xbf16>
    %c18 = arith.constant 18 : index
    %c0_236 = arith.constant 0 : index
    %c0_237 = arith.constant 0 : index
    %238 = vector.load %arg4[%c18, %c0_236, %c0_237] : memref<25x8x16xbf16, #tpu.memory_space<vmem>>, vector<1x8x16xbf16>
    %239 = vector.shape_cast %238 : vector<1x8x16xbf16> to vector<8x16xbf16>
    %cst_238 = arith.constant dense<0.000000e+00> : vector<128x16xf32>
    %240 = tpu.matmul %237, %239, %cst_238 {dimension_numbers = #tpu.dot_dimension_numbers<[1], [0], [0], [1], [0, 0, 1, 1], [], []>} : vector<128x8xbf16>, vector<8x16xbf16>, vector<128x16xf32> -> vector<128x16xf32>
    %241 = arith.addf %234, %240 : vector<128x16xf32>
    %c0_239 = arith.constant 0 : index
    %c3_240 = arith.constant 3 : index
    %c4_241 = arith.constant 4 : index
    %c0_242 = arith.constant 0 : index
    %242 = vector.load %arg14[%c0_239, %c3_240, %c4_241, %c0_242] : memref<2x12x12x8xf32, #tpu.memory_space<vmem>>, vector<2x8x8x8xf32>
    %243 = vector.shape_cast %242 : vector<2x8x8x8xf32> to vector<128x8xf32>
    %244 = arith.truncf %243 : vector<128x8xf32> to vector<128x8xbf16>
    %c19 = arith.constant 19 : index
    %c0_243 = arith.constant 0 : index
    %c0_244 = arith.constant 0 : index
    %245 = vector.load %arg4[%c19, %c0_243, %c0_244] : memref<25x8x16xbf16, #tpu.memory_space<vmem>>, vector<1x8x16xbf16>
    %246 = vector.shape_cast %245 : vector<1x8x16xbf16> to vector<8x16xbf16>
    %cst_245 = arith.constant dense<0.000000e+00> : vector<128x16xf32>
    %247 = tpu.matmul %244, %246, %cst_245 {dimension_numbers = #tpu.dot_dimension_numbers<[1], [0], [0], [1], [0, 0, 1, 1], [], []>} : vector<128x8xbf16>, vector<8x16xbf16>, vector<128x16xf32> -> vector<128x16xf32>
    %248 = arith.addf %241, %247 : vector<128x16xf32>
    %c0_246 = arith.constant 0 : index
    %c4_247 = arith.constant 4 : index
    %c0_248 = arith.constant 0 : index
    %c0_249 = arith.constant 0 : index
    %249 = vector.load %arg14[%c0_246, %c4_247, %c0_248, %c0_249] : memref<2x12x12x8xf32, #tpu.memory_space<vmem>>, vector<2x8x8x8xf32>
    %250 = vector.shape_cast %249 : vector<2x8x8x8xf32> to vector<128x8xf32>
    %251 = arith.truncf %250 : vector<128x8xf32> to vector<128x8xbf16>
    %c20 = arith.constant 20 : index
    %c0_250 = arith.constant 0 : index
    %c0_251 = arith.constant 0 : index
    %252 = vector.load %arg4[%c20, %c0_250, %c0_251] : memref<25x8x16xbf16, #tpu.memory_space<vmem>>, vector<1x8x16xbf16>
    %253 = vector.shape_cast %252 : vector<1x8x16xbf16> to vector<8x16xbf16>
    %cst_252 = arith.constant dense<0.000000e+00> : vector<128x16xf32>
    %254 = tpu.matmul %251, %253, %cst_252 {dimension_numbers = #tpu.dot_dimension_numbers<[1], [0], [0], [1], [0, 0, 1, 1], [], []>} : vector<128x8xbf16>, vector<8x16xbf16>, vector<128x16xf32> -> vector<128x16xf32>
    %255 = arith.addf %248, %254 : vector<128x16xf32>
    %c0_253 = arith.constant 0 : index
    %c4_254 = arith.constant 4 : index
    %c1_255 = arith.constant 1 : index
    %c0_256 = arith.constant 0 : index
    %256 = vector.load %arg14[%c0_253, %c4_254, %c1_255, %c0_256] : memref<2x12x12x8xf32, #tpu.memory_space<vmem>>, vector<2x8x8x8xf32>
    %257 = vector.shape_cast %256 : vector<2x8x8x8xf32> to vector<128x8xf32>
    %258 = arith.truncf %257 : vector<128x8xf32> to vector<128x8xbf16>
    %c21 = arith.constant 21 : index
    %c0_257 = arith.constant 0 : index
    %c0_258 = arith.constant 0 : index
    %259 = vector.load %arg4[%c21, %c0_257, %c0_258] : memref<25x8x16xbf16, #tpu.memory_space<vmem>>, vector<1x8x16xbf16>
    %260 = vector.shape_cast %259 : vector<1x8x16xbf16> to vector<8x16xbf16>
    %cst_259 = arith.constant dense<0.000000e+00> : vector<128x16xf32>
    %261 = tpu.matmul %258, %260, %cst_259 {dimension_numbers = #tpu.dot_dimension_numbers<[1], [0], [0], [1], [0, 0, 1, 1], [], []>} : vector<128x8xbf16>, vector<8x16xbf16>, vector<128x16xf32> -> vector<128x16xf32>
    %262 = arith.addf %255, %261 : vector<128x16xf32>
    %c0_260 = arith.constant 0 : index
    %c4_261 = arith.constant 4 : index
    %c2_262 = arith.constant 2 : index
    %c0_263 = arith.constant 0 : index
    %263 = vector.load %arg14[%c0_260, %c4_261, %c2_262, %c0_263] : memref<2x12x12x8xf32, #tpu.memory_space<vmem>>, vector<2x8x8x8xf32>
    %264 = vector.shape_cast %263 : vector<2x8x8x8xf32> to vector<128x8xf32>
    %265 = arith.truncf %264 : vector<128x8xf32> to vector<128x8xbf16>
    %c22 = arith.constant 22 : index
    %c0_264 = arith.constant 0 : index
    %c0_265 = arith.constant 0 : index
    %266 = vector.load %arg4[%c22, %c0_264, %c0_265] : memref<25x8x16xbf16, #tpu.memory_space<vmem>>, vector<1x8x16xbf16>
    %267 = vector.shape_cast %266 : vector<1x8x16xbf16> to vector<8x16xbf16>
    %cst_266 = arith.constant dense<0.000000e+00> : vector<128x16xf32>
    %268 = tpu.matmul %265, %267, %cst_266 {dimension_numbers = #tpu.dot_dimension_numbers<[1], [0], [0], [1], [0, 0, 1, 1], [], []>} : vector<128x8xbf16>, vector<8x16xbf16>, vector<128x16xf32> -> vector<128x16xf32>
    %269 = arith.addf %262, %268 : vector<128x16xf32>
    %c0_267 = arith.constant 0 : index
    %c4_268 = arith.constant 4 : index
    %c3_269 = arith.constant 3 : index
    %c0_270 = arith.constant 0 : index
    %270 = vector.load %arg14[%c0_267, %c4_268, %c3_269, %c0_270] : memref<2x12x12x8xf32, #tpu.memory_space<vmem>>, vector<2x8x8x8xf32>
    %271 = vector.shape_cast %270 : vector<2x8x8x8xf32> to vector<128x8xf32>
    %272 = arith.truncf %271 : vector<128x8xf32> to vector<128x8xbf16>
    %c23 = arith.constant 23 : index
    %c0_271 = arith.constant 0 : index
    %c0_272 = arith.constant 0 : index
    %273 = vector.load %arg4[%c23, %c0_271, %c0_272] : memref<25x8x16xbf16, #tpu.memory_space<vmem>>, vector<1x8x16xbf16>
    %274 = vector.shape_cast %273 : vector<1x8x16xbf16> to vector<8x16xbf16>
    %cst_273 = arith.constant dense<0.000000e+00> : vector<128x16xf32>
    %275 = tpu.matmul %272, %274, %cst_273 {dimension_numbers = #tpu.dot_dimension_numbers<[1], [0], [0], [1], [0, 0, 1, 1], [], []>} : vector<128x8xbf16>, vector<8x16xbf16>, vector<128x16xf32> -> vector<128x16xf32>
    %276 = arith.addf %269, %275 : vector<128x16xf32>
    %c0_274 = arith.constant 0 : index
    %c4_275 = arith.constant 4 : index
    %c4_276 = arith.constant 4 : index
    %c0_277 = arith.constant 0 : index
    %277 = vector.load %arg14[%c0_274, %c4_275, %c4_276, %c0_277] : memref<2x12x12x8xf32, #tpu.memory_space<vmem>>, vector<2x8x8x8xf32>
    %278 = vector.shape_cast %277 : vector<2x8x8x8xf32> to vector<128x8xf32>
    %279 = arith.truncf %278 : vector<128x8xf32> to vector<128x8xbf16>
    %c24 = arith.constant 24 : index
    %c0_278 = arith.constant 0 : index
    %c0_279 = arith.constant 0 : index
    %280 = vector.load %arg4[%c24, %c0_278, %c0_279] : memref<25x8x16xbf16, #tpu.memory_space<vmem>>, vector<1x8x16xbf16>
    %281 = vector.shape_cast %280 : vector<1x8x16xbf16> to vector<8x16xbf16>
    %cst_280 = arith.constant dense<0.000000e+00> : vector<128x16xf32>
    %282 = tpu.matmul %279, %281, %cst_280 {dimension_numbers = #tpu.dot_dimension_numbers<[1], [0], [0], [1], [0, 0, 1, 1], [], []>} : vector<128x8xbf16>, vector<8x16xbf16>, vector<128x16xf32> -> vector<128x16xf32>
    %283 = arith.addf %276, %282 : vector<128x16xf32>
    %c0_281 = arith.constant 0 : index
    %c0_282 = arith.constant 0 : index
    %284 = vector.load %arg5[%c0_281, %c0_282] : memref<1x16xf32, #tpu.memory_space<vmem>>, vector<1x16xf32>
    %285 = vector.broadcast %284 : vector<1x16xf32> to vector<128x16xf32>
    %286 = arith.addf %283, %285 : vector<128x16xf32>
    %287 = math.tanh %286 : vector<128x16xf32>
    %c0_283 = arith.constant 0 : index
    %c0_284 = arith.constant 0 : index
    %288 = vector.load %arg6[%c0_283, %c0_284] : memref<32x128xf32, #tpu.memory_space<vmem>>, vector<32x128xf32>
    %cst_285 = arith.constant dense<0.000000e+00> : vector<32x16xf32>
    %289 = tpu.matmul %288, %287, %cst_285 {dimension_numbers = #tpu.dot_dimension_numbers<[1], [0], [0], [1], [0, 0, 1, 1], [], []>} : vector<32x128xf32>, vector<128x16xf32>, vector<32x16xf32> -> vector<32x16xf32>
    %290 = vector.extract_strided_slice %289 {offsets = [0, 0], sizes = [2, 16], strides = [1, 1]} : vector<32x16xf32> to vector<2x16xf32>
    %c0_286 = arith.constant 0 : index
    %c0_287 = arith.constant 0 : index
    %291 = vector.load %arg15[%c0_286, %c0_287] : memref<2x256xf32, #tpu.memory_space<vmem>>, vector<2x16xf32>
    tpu.vector_store %arg15[%c0_286, %c0_287], %290 {strides = array<i32>} : memref<2x256xf32, #tpu.memory_space<vmem>>, vector<2x16xf32>,
    %292 = vector.extract_strided_slice %289 {offsets = [2, 0], sizes = [2, 16], strides = [1, 1]} : vector<32x16xf32> to vector<2x16xf32>
    %c0_288 = arith.constant 0 : index
    %c16_289 = arith.constant 16 : index
    %293 = vector.load %arg15[%c0_288, %c16_289] : memref<2x256xf32, #tpu.memory_space<vmem>>, vector<2x16xf32>
    tpu.vector_store %arg15[%c0_288, %c16_289], %292 {strides = array<i32>} : memref<2x256xf32, #tpu.memory_space<vmem>>, vector<2x16xf32>,
    %294 = vector.extract_strided_slice %289 {offsets = [4, 0], sizes = [2, 16], strides = [1, 1]} : vector<32x16xf32> to vector<2x16xf32>
    %c0_290 = arith.constant 0 : index
    %c32 = arith.constant 32 : index
    %295 = vector.load %arg15[%c0_290, %c32] : memref<2x256xf32, #tpu.memory_space<vmem>>, vector<2x16xf32>
    tpu.vector_store %arg15[%c0_290, %c32], %294 {strides = array<i32>} : memref<2x256xf32, #tpu.memory_space<vmem>>, vector<2x16xf32>,
    %296 = vector.extract_strided_slice %289 {offsets = [6, 0], sizes = [2, 16], strides = [1, 1]} : vector<32x16xf32> to vector<2x16xf32>
    %c0_291 = arith.constant 0 : index
    %c48 = arith.constant 48 : index
    %297 = vector.load %arg15[%c0_291, %c48] : memref<2x256xf32, #tpu.memory_space<vmem>>, vector<2x16xf32>
    tpu.vector_store %arg15[%c0_291, %c48], %296 {strides = array<i32>} : memref<2x256xf32, #tpu.memory_space<vmem>>, vector<2x16xf32>,
    %298 = vector.extract_strided_slice %289 {offsets = [8, 0], sizes = [2, 16], strides = [1, 1]} : vector<32x16xf32> to vector<2x16xf32>
    %c0_292 = arith.constant 0 : index
    %c64 = arith.constant 64 : index
    %299 = vector.load %arg15[%c0_292, %c64] : memref<2x256xf32, #tpu.memory_space<vmem>>, vector<2x16xf32>
    tpu.vector_store %arg15[%c0_292, %c64], %298 {strides = array<i32>} : memref<2x256xf32, #tpu.memory_space<vmem>>, vector<2x16xf32>,
    %300 = vector.extract_strided_slice %289 {offsets = [10, 0], sizes = [2, 16], strides = [1, 1]} : vector<32x16xf32> to vector<2x16xf32>
    %c0_293 = arith.constant 0 : index
    %c80 = arith.constant 80 : index
    %301 = vector.load %arg15[%c0_293, %c80] : memref<2x256xf32, #tpu.memory_space<vmem>>, vector<2x16xf32>
    tpu.vector_store %arg15[%c0_293, %c80], %300 {strides = array<i32>} : memref<2x256xf32, #tpu.memory_space<vmem>>, vector<2x16xf32>,
    %302 = vector.extract_strided_slice %289 {offsets = [12, 0], sizes = [2, 16], strides = [1, 1]} : vector<32x16xf32> to vector<2x16xf32>
    %c0_294 = arith.constant 0 : index
    %c96 = arith.constant 96 : index
    %303 = vector.load %arg15[%c0_294, %c96] : memref<2x256xf32, #tpu.memory_space<vmem>>, vector<2x16xf32>
    tpu.vector_store %arg15[%c0_294, %c96], %302 {strides = array<i32>} : memref<2x256xf32, #tpu.memory_space<vmem>>, vector<2x16xf32>,
    %304 = vector.extract_strided_slice %289 {offsets = [14, 0], sizes = [2, 16], strides = [1, 1]} : vector<32x16xf32> to vector<2x16xf32>
    %c0_295 = arith.constant 0 : index
    %c112 = arith.constant 112 : index
    %305 = vector.load %arg15[%c0_295, %c112] : memref<2x256xf32, #tpu.memory_space<vmem>>, vector<2x16xf32>
    tpu.vector_store %arg15[%c0_295, %c112], %304 {strides = array<i32>} : memref<2x256xf32, #tpu.memory_space<vmem>>, vector<2x16xf32>,
    %306 = vector.extract_strided_slice %289 {offsets = [16, 0], sizes = [2, 16], strides = [1, 1]} : vector<32x16xf32> to vector<2x16xf32>
    %c0_296 = arith.constant 0 : index
    %c128 = arith.constant 128 : index
    %307 = vector.load %arg15[%c0_296, %c128] : memref<2x256xf32, #tpu.memory_space<vmem>>, vector<2x16xf32>
    tpu.vector_store %arg15[%c0_296, %c128], %306 {strides = array<i32>} : memref<2x256xf32, #tpu.memory_space<vmem>>, vector<2x16xf32>,
    %308 = vector.extract_strided_slice %289 {offsets = [18, 0], sizes = [2, 16], strides = [1, 1]} : vector<32x16xf32> to vector<2x16xf32>
    %c0_297 = arith.constant 0 : index
    %c144 = arith.constant 144 : index
    %309 = vector.load %arg15[%c0_297, %c144] : memref<2x256xf32, #tpu.memory_space<vmem>>, vector<2x16xf32>
    tpu.vector_store %arg15[%c0_297, %c144], %308 {strides = array<i32>} : memref<2x256xf32, #tpu.memory_space<vmem>>, vector<2x16xf32>,
    %310 = vector.extract_strided_slice %289 {offsets = [20, 0], sizes = [2, 16], strides = [1, 1]} : vector<32x16xf32> to vector<2x16xf32>
    %c0_298 = arith.constant 0 : index
    %c160 = arith.constant 160 : index
    %311 = vector.load %arg15[%c0_298, %c160] : memref<2x256xf32, #tpu.memory_space<vmem>>, vector<2x16xf32>
    tpu.vector_store %arg15[%c0_298, %c160], %310 {strides = array<i32>} : memref<2x256xf32, #tpu.memory_space<vmem>>, vector<2x16xf32>,
    %312 = vector.extract_strided_slice %289 {offsets = [22, 0], sizes = [2, 16], strides = [1, 1]} : vector<32x16xf32> to vector<2x16xf32>
    %c0_299 = arith.constant 0 : index
    %c176 = arith.constant 176 : index
    %313 = vector.load %arg15[%c0_299, %c176] : memref<2x256xf32, #tpu.memory_space<vmem>>, vector<2x16xf32>
    tpu.vector_store %arg15[%c0_299, %c176], %312 {strides = array<i32>} : memref<2x256xf32, #tpu.memory_space<vmem>>, vector<2x16xf32>,
    %314 = vector.extract_strided_slice %289 {offsets = [24, 0], sizes = [2, 16], strides = [1, 1]} : vector<32x16xf32> to vector<2x16xf32>
    %c0_300 = arith.constant 0 : index
    %c192 = arith.constant 192 : index
    %315 = vector.load %arg15[%c0_300, %c192] : memref<2x256xf32, #tpu.memory_space<vmem>>, vector<2x16xf32>
    tpu.vector_store %arg15[%c0_300, %c192], %314 {strides = array<i32>} : memref<2x256xf32, #tpu.memory_space<vmem>>, vector<2x16xf32>,
    %316 = vector.extract_strided_slice %289 {offsets = [26, 0], sizes = [2, 16], strides = [1, 1]} : vector<32x16xf32> to vector<2x16xf32>
    %c0_301 = arith.constant 0 : index
    %c208 = arith.constant 208 : index
    %317 = vector.load %arg15[%c0_301, %c208] : memref<2x256xf32, #tpu.memory_space<vmem>>, vector<2x16xf32>
    tpu.vector_store %arg15[%c0_301, %c208], %316 {strides = array<i32>} : memref<2x256xf32, #tpu.memory_space<vmem>>, vector<2x16xf32>,
    %318 = vector.extract_strided_slice %289 {offsets = [28, 0], sizes = [2, 16], strides = [1, 1]} : vector<32x16xf32> to vector<2x16xf32>
    %c0_302 = arith.constant 0 : index
    %c224 = arith.constant 224 : index
    %319 = vector.load %arg15[%c0_302, %c224] : memref<2x256xf32, #tpu.memory_space<vmem>>, vector<2x16xf32>
    tpu.vector_store %arg15[%c0_302, %c224], %318 {strides = array<i32>} : memref<2x256xf32, #tpu.memory_space<vmem>>, vector<2x16xf32>,
    %320 = vector.extract_strided_slice %289 {offsets = [30, 0], sizes = [2, 16], strides = [1, 1]} : vector<32x16xf32> to vector<2x16xf32>
    %c0_303 = arith.constant 0 : index
    %c240 = arith.constant 240 : index
    %321 = vector.load %arg15[%c0_303, %c240] : memref<2x256xf32, #tpu.memory_space<vmem>>, vector<2x16xf32>
    tpu.vector_store %arg15[%c0_303, %c240], %320 {strides = array<i32>} : memref<2x256xf32, #tpu.memory_space<vmem>>, vector<2x16xf32>,
    %c0_304 = arith.constant 0 : index
    %c0_305 = arith.constant 0 : index
    %322 = vector.load %arg15[%c0_304, %c0_305] : memref<2x256xf32, #tpu.memory_space<vmem>>, vector<2x256xf32>
    %c0_306 = arith.constant 0 : index
    %c0_307 = arith.constant 0 : index
    %323 = vector.load %arg7[%c0_306, %c0_307] : memref<256x128xf32, #tpu.memory_space<vmem>>, vector<256x128xf32>
    %cst_308 = arith.constant dense<0.000000e+00> : vector<2x128xf32>
    %324 = tpu.matmul %322, %323, %cst_308 {dimension_numbers = #tpu.dot_dimension_numbers<[1], [0], [0], [1], [0, 0, 1, 1], [], []>} : vector<2x256xf32>, vector<256x128xf32>, vector<2x128xf32> -> vector<2x128xf32>
    %c0_309 = arith.constant 0 : index
    %c0_310 = arith.constant 0 : index
    %325 = vector.load %arg8[%c0_309, %c0_310] : memref<1x128xf32, #tpu.memory_space<vmem>>, vector<1x128xf32>
    %326 = vector.broadcast %325 : vector<1x128xf32> to vector<2x128xf32>
    %327 = arith.addf %324, %326 : vector<2x128xf32>
    %328 = math.tanh %327 : vector<2x128xf32>
    %c0_311 = arith.constant 0 : index
    %c0_312 = arith.constant 0 : index
    %329 = vector.load %arg9[%c0_311, %c0_312] : memref<128x128xf32, #tpu.memory_space<vmem>>, vector<128x128xf32>
    %cst_313 = arith.constant dense<0.000000e+00> : vector<2x128xf32>
    %330 = tpu.matmul %328, %329, %cst_313 {dimension_numbers = #tpu.dot_dimension_numbers<[1], [0], [0], [1], [0, 0, 1, 1], [], []>} : vector<2x128xf32>, vector<128x128xf32>, vector<2x128xf32> -> vector<2x128xf32>
    %c0_314 = arith.constant 0 : index
    %c0_315 = arith.constant 0 : index
    %331 = vector.load %arg10[%c0_314, %c0_315] : memref<1x128xf32, #tpu.memory_space<vmem>>, vector<1x128xf32>
    %332 = vector.broadcast %331 : vector<1x128xf32> to vector<2x128xf32>
    %333 = arith.addf %330, %332 : vector<2x128xf32>
    %334 = math.tanh %333 : vector<2x128xf32>
    %c0_316 = arith.constant 0 : index
    %c0_317 = arith.constant 0 : index
    %335 = vector.load %arg11[%c0_316, %c0_317] : memref<128x128xf32, #tpu.memory_space<vmem>>, vector<128x128xf32>
    %cst_318 = arith.constant dense<0.000000e+00> : vector<2x128xf32>
    %336 = tpu.matmul %334, %335, %cst_318 {dimension_numbers = #tpu.dot_dimension_numbers<[1], [0], [0], [1], [0, 0, 1, 1], [], []>} : vector<2x128xf32>, vector<128x128xf32>, vector<2x128xf32> -> vector<2x128xf32>
    %c0_319 = arith.constant 0 : index
    %c0_320 = arith.constant 0 : index
    %337 = vector.load %arg12[%c0_319, %c0_320] : memref<1x128xf32, #tpu.memory_space<vmem>>, vector<1x128xf32>
    %338 = vector.broadcast %337 : vector<1x128xf32> to vector<2x128xf32>
    %339 = arith.addf %336, %338 : vector<2x128xf32>
    %c0_321 = arith.constant 0 : index
    %c0_322 = arith.constant 0 : index
    %340 = vector.load %arg13[%c0_321, %c0_322] : memref<2x128xf32, #tpu.memory_space<vmem>>, vector<2x128xf32>
    tpu.vector_store %arg13[%c0_321, %c0_322], %339 {strides = array<i32>} : memref<2x128xf32, #tpu.memory_space<vmem>>, vector<2x128xf32>,
    return
  }
  func.func @transform_0(%arg0: i32) -> (i32, i32, i32) {
    %c0_i32 = arith.constant 0 : i32
    %c0_i32_0 = arith.constant 0 : i32
    %c0_i32_1 = arith.constant 0 : i32
    %c0_i32_2 = arith.constant 0 : i32
    return %c0_i32, %c0_i32_0, %c0_i32_1 : i32, i32, i32
  }
  func.func @transform_1(%arg0: i32) -> (i32, i32) {
    %c0_i32 = arith.constant 0 : i32
    %c0_i32_0 = arith.constant 0 : i32
    %c0_i32_1 = arith.constant 0 : i32
    return %c0_i32, %c0_i32_0 : i32, i32
  }
  func.func @transform_2(%arg0: i32) -> (i32, i32) {
    %c0_i32 = arith.constant 0 : i32
    %c0_i32_0 = arith.constant 0 : i32
    %c0_i32_1 = arith.constant 0 : i32
    return %c0_i32, %c0_i32_0 : i32, i32
  }
  func.func @transform_3(%arg0: i32) -> (i32, i32, i32) {
    %c0_i32 = arith.constant 0 : i32
    %c0_i32_0 = arith.constant 0 : i32
    %c0_i32_1 = arith.constant 0 : i32
    %c0_i32_2 = arith.constant 0 : i32
    return %c0_i32, %c0_i32_0, %c0_i32_1 : i32, i32, i32
  }
  func.func @transform_4(%arg0: i32) -> (i32, i32) {
    %c0_i32 = arith.constant 0 : i32
    %c0_i32_0 = arith.constant 0 : i32
    %c0_i32_1 = arith.constant 0 : i32
    return %c0_i32, %c0_i32_0 : i32, i32
  }
  func.func @transform_5(%arg0: i32) -> (i32, i32) {
    %c0_i32 = arith.constant 0 : i32
    %c0_i32_0 = arith.constant 0 : i32
    %c0_i32_1 = arith.constant 0 : i32
    return %c0_i32, %c0_i32_0 : i32, i32
  }
  func.func @transform_6(%arg0: i32) -> (i32, i32) {
    %c0_i32 = arith.constant 0 : i32
    %c0_i32_0 = arith.constant 0 : i32
    %c0_i32_1 = arith.constant 0 : i32
    return %c0_i32, %c0_i32_0 : i32, i32
  }
  func.func @transform_7(%arg0: i32) -> (i32, i32) {
    %c0_i32 = arith.constant 0 : i32
    %c0_i32_0 = arith.constant 0 : i32
    %c0_i32_1 = arith.constant 0 : i32
    return %c0_i32, %c0_i32_0 : i32, i32
  }
  func.func @transform_8(%arg0: i32) -> (i32, i32) {
    %c0_i32 = arith.constant 0 : i32
    %c0_i32_0 = arith.constant 0 : i32
    %c0_i32_1 = arith.constant 0 : i32
    return %c0_i32, %c0_i32_0 : i32, i32
  }
  func.func @transform_9(%arg0: i32) -> (i32, i32) {
    %c0_i32 = arith.constant 0 : i32
    %c0_i32_0 = arith.constant 0 : i32
    %c0_i32_1 = arith.constant 0 : i32
    return %c0_i32, %c0_i32_0 : i32, i32
  }
  func.func @transform_10(%arg0: i32) -> (i32, i32) {
    %c0_i32 = arith.constant 0 : i32
    %c0_i32_0 = arith.constant 0 : i32
    %c0_i32_1 = arith.constant 0 : i32
    return %c0_i32, %c0_i32_0 : i32, i32
  }
  func.func @transform_11(%arg0: i32) -> (i32, i32) {
    %c0_i32 = arith.constant 0 : i32
    %c0_i32_0 = arith.constant 0 : i32
    %c0_i32_1 = arith.constant 0 : i32
    return %c0_i32, %c0_i32_0 : i32, i32
  }
  func.func @transform_12(%arg0: i32) -> (i32, i32) {
    %c0_i32 = arith.constant 0 : i32
    %c0_i32_0 = arith.constant 0 : i32
    %c0_i32_1 = arith.constant 0 : i32
    return %c0_i32, %c0_i32_0 : i32, i32
  }
}

</mosaic_0001>

<bundles_post_ra>
// kernel: lenet_forward.1
= control target key start
LH: loop header
LB: loop body
LE: loop exit
PB: predicated region body
PF: predicated region fallthrough
CT: control target
= control target key end

     0   :  { %vm570_vm0 = vcmask 261120   ;;  %s11545_s0 = inlined_call_operand.vmem [shape: bf16[4,288,32], index: 0, kind: input, shape index: {}]   ;;  %s11546_s1 = inlined_call_operand.vmem [shape: bf16[32,8], index: 1, kind: input, shape index: {}]   ;;  %s11547_s2 = inlined_call_operand.vmem [shape: f32[1,8], index: 2, kind: input, shape index: {}]   ;;  %s11548_s3 = inlined_call_operand.vmem [shape: bf16[25,8,16], index: 3, kind: input, shape index: {}]   ;;  %s11549_s4 = inlined_call_operand.vmem [shape: f32[1,16], index: 4, kind: input, shape index: {}]   ;;  %s11550_s5 = inlined_call_operand.vmem [shape: f32[32,128], index: 5, kind: input, shape index: {}]   ;;  %s11551_s6 = inlined_call_operand.vmem [shape: f32[256,128], index: 6, kind: input, shape index: {}]   ;;  %s11552_s7 = inlined_call_operand.vmem [shape: f32[1,128], index: 7, kind: input, shape index: {}]   ;;  %s11553_s8 = inlined_call_operand.vmem [shape: f32[128,128], index: 8, kind: input, shape index: {}]   ;;  %s11554_s9 = inlined_call_operand.vmem [shape: f32[1,128], index: 9, kind: input, shape index: {}]   ;;  %s11555_s10 = inlined_call_operand.vmem [shape: f32[128,128], index: 10, kind: input, shape index: {}]   ;;  %s11556_s11 = inlined_call_operand.vmem [shape: f32[1,128], index: 11, kind: input, shape index: {}]   ;;  %s11557_s12 = inlined_call_operand.hbm [shape: f32[2,128], index: 12, kind: output, shape index: {}]  }
   0x1   :  { %v8116_v0 = vld [vmem:[%s11546_s1 + $0x8] sm:$0xff]   ;;  %v8117_v1 = vld [vmem:[%s11546_s1] sm:$0xff]   ;;  %v8120_v4 = vld [vmem:[%s11545_s0 + $0x10] sm:$0xff]  }
   0x2   :  { %7374 = vmatprep.subr.bf16.mxu0 %v8116_v0  ;;  %v8118_v2 = vld [vmem:[%s11545_s0] sm:$0xff]   ;;  %v8119_v3 = vld [vmem:[%s11545_s0 + $0x8] sm:$0xff]   ;;  %v8121_v5 = vld [vmem:[%s11545_s0 + $0x18] sm:$0xff]  }
   0x3   :  { %7375 = vmatpush3.bf16.msra.mxu0 %v8116_v0  ;;  %7378 = vmatprep.mubr.msk.bf16.mxu0 %vm570_vm0, %v8118_v2  ;;  %v8122_v6 = vld [vmem:[%s11545_s0 + $0x20] sm:$0xff]   ;;  %v8123_v7 = vld [vmem:[%s11545_s0 + $0x28] sm:$0xff]   ;;  %v8124_v8 = vld [vmem:[%s11545_s0 + $0x30] sm:$0xff]  }
   0x4   :  { %7376 = vmatprep.subr.bf16.mxu0 %v8117_v1  ;;  %v8125_v9 = vld [vmem:[%s11545_s0 + $0x38] sm:$0xff]   ;;  %v8126_v10 = vld [vmem:[%s11545_s0 + $0x40] sm:$0xff]   ;;  %v8127_v11 = vld [vmem:[%s11545_s0 + $0x48] sm:$0xff]  }
   0x5   :  { %v8128_v12 = vld [vmem:[%s11545_s0 + $0x50] sm:$0xff]   ;;  %v8129_v13 = vld [vmem:[%s11545_s0 + $0x58] sm:$0xff]   ;;  %v8130_v14 = vld [vmem:[%s11545_s0 + $0x60] sm:$0xff]  }
   0x6   :  { %v8131_v15 = vld [vmem:[%s11545_s0 + $0x68] sm:$0xff]   ;;  %v8132_v16 = vld [vmem:[%s11545_s0 + $0x70] sm:$0xff]   ;;  %v8133_v17 = vld [vmem:[%s11545_s0 + $0x78] sm:$0xff]  }
   0x7   :  { %7377 = vmatpush3.bf16.msra.mxu0 %v8117_v1  ;;  %v8134_v18 = vld [vmem:[%s11545_s0 + $0x80] sm:$0xff]  }
   0xa   :  { %7379 = vmatmul.mubr.msk.bf16.vlgmr.msra.gmra.mxu0 %vm570_vm0, %v8119_v3 }
   0xb   :  { %7382 = vmatprep.mubr.msk.bf16.mxu0 %vm570_vm0, %v8120_v4 }
  0x12   :  { %7383 = vmatmul.mubr.msk.bf16.gmra.mxu0 %vm570_vm0, %v8121_v5 }
  0x13   :  { %7386 = vmatprep.mubr.msk.bf16.mxu0 %vm570_vm0, %v8122_v6 }
  0x1a   :  { %7387 = vmatmul.mubr.msk.bf16.gmra.mxu0 %vm570_vm0, %v8123_v7 }
  0x1b   :  { %7390 = vmatprep.mubr.msk.bf16.mxu0 %vm570_vm0, %v8124_v8 }
  0x22   :  { %7391 = vmatmul.mubr.msk.bf16.gmra.mxu0 %vm570_vm0, %v8125_v9 }
  0x23   :  { %7394 = vmatprep.mubr.msk.bf16.mxu0 %vm570_vm0, %v8126_v10 }
  0x2a   :  { %7395 = vmatmul.mubr.msk.bf16.gmra.mxu0 %vm570_vm0, %v8127_v11 }
  0x2b   :  { %7398 = vmatprep.mubr.msk.bf16.mxu0 %vm570_vm0, %v8128_v12 }
  0x32   :  { %7399 = vmatmul.mubr.msk.bf16.gmra.mxu0 %vm570_vm0, %v8129_v13 }
  0x33   :  { %7402 = vmatprep.mubr.msk.bf16.mxu0 %vm570_vm0, %v8130_v14 }
  0x3a   :  { %7403 = vmatmul.mubr.msk.bf16.gmra.mxu0 %vm570_vm0, %v8131_v15 }
  0x3b   :  { %7406 = vmatprep.mubr.msk.bf16.mxu0 %vm570_vm0, %v8132_v16 }
  0x42   :  { %7407 = vmatmul.mubr.msk.bf16.gmra.mxu0 %vm570_vm0, %v8133_v17 }
  0x43   :  { %17 = vsyncpa [#allocation5], 0  ;;  %7410 = vmatprep.mubr.msk.bf16.mxu0 %vm570_vm0, %v8134_v18  ;;  %v8135_v19 = vld [vmem:[%s11545_s0 + $0x88] sm:$0xff]   ;;  %v8136_v20 = vld [vmem:[%s11545_s0 + $0x90] sm:$0xff]   ;;  %vm1540_vm1 = vcmask 64512   ;;  %vm1977_vm2 = vcmask 1043456  }
  0x44   :  { %v8137_v21 = vld [vmem:[%s11545_s0 + $0x98] sm:$0xff]   ;;  %v8138_v22 = vld [vmem:[%s11545_s0 + $0xa0] sm:$0xff]   ;;  %v8139_v23 = vld [vmem:[%s11545_s0 + $0xa8] sm:$0xff]   ;;  %vm1830_vm3 = vcmask 60416   ;;  %vm1833_vm4 = vcmask 64516   ;;  %vm6148_vm5 = vcmask 123904  }
  0x45   :  { %v8140_v24 = vld [vmem:[%s11545_s0 + $0xb0] sm:$0xff]   ;;  %v8141_v25 = vld [vmem:[%s11545_s0 + $0xb8] sm:$0xff]   ;;  %v8142_v26 = vld [vmem:[%s11545_s0 + $0xc0] sm:$0xff]   ;;  %s8538_s24 = smov 64   ;;  %s8539_s13 = smov 80   ;;  %vm6162_vm6 = vcmask 255104  }
  0x46   :  { %v8143_v27 = vld [vmem:[%s11545_s0 + $0xc8] sm:$0xff]   ;;  %v8144_v28 = vld [vmem:[%s11545_s0 + $0xd0] sm:$0xff]   ;;  %v8145_v29 = vld [vmem:[%s11545_s0 + $0xd8] sm:$0xff]   ;;  %s8540_s14 = smov 32   ;;  %s8541_s20 = smov 16   ;;  %vm6175_vm7 = vcmask 386304  }
  0x47   :  { %v8146_v30 = vld [vmem:[%s11545_s0 + $0xe0] sm:$0xff]   ;;  %v8147_v31 = vld [vmem:[%s11545_s0 + $0xe8] sm:$0xff]   ;;  %v8148_v32 = vld [vmem:[%s11545_s0 + $0xf0] sm:$0xff]   ;;  %s8543_s30 = smov 96   ;;  %vm6181_vm8 = vcmask 517504   ;;  %vm6194_vm9 = vcmask 648704  }
  0x48   :  { %v8149_v33 = vld [vmem:[%s11545_s0 + $0xf8] sm:$0xff]   ;;  %v8150_v34 = vld [vmem:[%s11545_s0 + $0x100] sm:$0xff]   ;;  %v8151_v35 = vld [vmem:[%s11545_s0 + $0x108] sm:$0xff]   ;;  %vm6200_vm10 = vcmask 779904   ;;  %vm6213_vm11 = vcmask 911104   ;;  %vm6219_vm12 = vcmask 1042304  }
  0x49   :  { %v8152_v36 = vld [vmem:[%s11545_s0 + $0x110] sm:$0xff]   ;;  %v8153_v37 = vld [vmem:[%s11545_s0 + $0x118] sm:$0xff]   ;;  %v8154_v38 = vld [vmem:[%s11545_s0 + $0x120] sm:$0xff]   ;;  %vm8546_vm13 = vmmov 0   ;;  %s8547_s28 = smov [#allocation4]  }
  0x4a   :  { %7411 = vmatmul.mubr.msk.bf16.gmra.mxu0 %vm570_vm0, %v8135_v19  ;;  %v8155_v39 = vld [vmem:[%s11545_s0 + $0x128] sm:$0xff]   ;;  %v8156_v40 = vld [vmem:[%s11545_s0 + $0x130] sm:$0xff]   ;;  %v8157_v41 = vld [vmem:[%s11545_s0 + $0x138] sm:$0xff]  }
  0x4b   :  { %7414 = vmatprep.mubr.msk.bf16.mxu0 %vm570_vm0, %v8136_v20  ;;  %v8158_v42 = vld [vmem:[%s11545_s0 + $0x140] sm:$0xff]   ;;  %v8159_v43 = vld [vmem:[%s11545_s0 + $0x148] sm:$0xff]   ;;  %v8160_v44 = vld [vmem:[%s11545_s0 + $0x150] sm:$0xff]  }
  0x4c   :  { %v8161_v45 = vld [vmem:[%s11545_s0 + $0x158] sm:$0xff]   ;;  %v8162_v46 = vld [vmem:[%s11545_s0 + $0x160] sm:$0xff]   ;;  %v8163_v47 = vld [vmem:[%s11545_s0 + $0x168] sm:$0xff]  }
  0x4d   :  { %v8164_v48 = vld [vmem:[%s11545_s0 + $0x170] sm:$0xff]   ;;  %v8165_v49 = vld [vmem:[%s11545_s0 + $0x178] sm:$0xff]   ;;  %v8166_v50 = vld [vmem:[%s11545_s0 + $0x180] sm:$0xff]  }
  0x4e   :  { %v8167_v51 = vld [vmem:[%s11545_s0 + $0x188] sm:$0xff]   ;;  %v8168_v52 = vld [vmem:[%s11545_s0 + $0x190] sm:$0xff]   ;;  %v8169_v56 = vld [vmem:[%s11545_s0 + $0x198] sm:$0xff]  }
  0x4f   :  { %v8170_v57 = vld [vmem:[%s11545_s0 + $0x1a0] sm:$0xff]   ;;  %v8171_v62 = vld [vmem:[%s11545_s0 + $0x1a8] sm:$0xff]   ;;  %v8172_v63 = vld [vmem:[%s11545_s0 + $0x1b0] sm:$0xff]  }
  0x50   :  { %v8173_v4 = vld [vmem:[%s11545_s0 + $0x1b8] sm:$0xff]   ;;  %v8174_v5 = vld [vmem:[%s11545_s0 + $0x1c0] sm:$0xff]   ;;  %v8175_v10 = vld [vmem:[%s11545_s0 + $0x1c8] sm:$0xff]  }
  0x51   :  { %v8176_v11 = vld [vmem:[%s11545_s0 + $0x1d0] sm:$0xff]   ;;  %v8177_v16 = vld [vmem:[%s11545_s0 + $0x1d8] sm:$0xff]   ;;  %v8178_v17 = vld [vmem:[%s11545_s0 + $0x1e0] sm:$0xff]  }
  0x52   :  { %7415 = vmatmul.mubr.msk.bf16.gmra.mxu0 %vm570_vm0, %v8137_v21 }
  0x53   :  { %7418 = vmatprep.mubr.msk.bf16.mxu0 %vm570_vm0, %v8138_v22  ;;  %v8179_v22 = vld [vmem:[%s11545_s0 + $0x1e8] sm:$0xff]  }
  0x5a   :  { %7419 = vmatmul.mubr.msk.bf16.gmra.mxu0 %vm570_vm0, %v8139_v23  ;;  %v8180_v23 = vld [vmem:[%s11545_s0 + $0x1f0] sm:$0xff]  }
  0x5b   :  { %7422 = vmatprep.mubr.msk.bf16.mxu0 %vm570_vm0, %v8140_v24 }
  0x62   :  { %7423 = vmatmul.mubr.msk.bf16.gmra.mxu0 %vm570_vm0, %v8141_v25 }
  0x63   :  { %7426 = vmatprep.mubr.msk.bf16.mxu0 %vm570_vm0, %v8142_v26 }
  0x6a   :  { %7427 = vmatmul.mubr.msk.bf16.gmra.mxu0 %vm570_vm0, %v8143_v27 }
  0x6b   :  { %7430 = vmatprep.mubr.msk.bf16.mxu0 %vm570_vm0, %v8144_v28  ;;  %v8181_v28 = vld [vmem:[%s11545_s0 + $0x1f8] sm:$0xff]  }
  0x72   :  { %7431 = vmatmul.mubr.msk.bf16.gmra.mxu0 %vm570_vm0, %v8145_v29  ;;  %v8182_v29 = vld [vmem:[%s11545_s0 + $0x200] sm:$0xff]  }
  0x73   :  { %7434 = vmatprep.mubr.msk.bf16.mxu0 %vm570_vm0, %v8146_v30 }
  0x7a   :  { %7435 = vmatmul.mubr.msk.bf16.gmra.mxu0 %vm570_vm0, %v8147_v31 }
  0x7b   :  { %7438 = vmatprep.mubr.msk.bf16.mxu0 %vm570_vm0, %v8148_v32 }
  0x82   :  { %7439 = vmatmul.mubr.msk.bf16.gmra.mxu0 %vm570_vm0, %v8149_v33 }
  0x83   :  { %7442 = vmatprep.mubr.msk.bf16.mxu0 %vm570_vm0, %v8150_v34  ;;  %v8183_v34 = vld [vmem:[%s11545_s0 + $0x208] sm:$0xff]  }
  0x8a   :  { %7443 = vmatmul.mubr.msk.bf16.gmra.mxu0 %vm570_vm0, %v8151_v35  ;;  %v8184_v35 = vld [vmem:[%s11545_s0 + $0x210] sm:$0xff]  }
  0x8b   :  { %7446 = vmatprep.mubr.msk.bf16.mxu0 %vm570_vm0, %v8152_v36 }
  0x92   :  { %7447 = vmatmul.mubr.msk.bf16.gmra.mxu0 %vm570_vm0, %v8153_v37 }
  0x93   :  { %7450 = vmatprep.mubr.msk.bf16.mxu0 %vm570_vm0, %v8154_v38  ;;  %v8956_v38 = vld [vmem:[%s11547_s2] ss:$0 sm:$0xff] }
  0x9a   :  { %7451 = vmatmul.mubr.msk.bf16.gmra.mxu0 %vm570_vm0, %v8155_v39 }
  0x9b   :  { %7454 = vmatprep.mubr.msk.bf16.mxu0 %vm570_vm0, %v8156_v40 }
  0xa2   :  { %7455 = vmatmul.mubr.msk.bf16.gmra.mxu0 %vm570_vm0, %v8157_v41  ;;  %v8185_v41 = vld [vmem:[%s11545_s0 + $0x218] sm:$0xff]  }
  0xa3   :  { %7458 = vmatprep.mubr.msk.bf16.mxu0 %vm570_vm0, %v8158_v42 }
  0xaa   :  { %7459 = vmatmul.mubr.msk.bf16.gmra.mxu0 %vm570_vm0, %v8159_v43  ;;  %v8186_v43 = vld [vmem:[%s11545_s0 + $0x220] sm:$0xff]  }
  0xab   :  { %7462 = vmatprep.mubr.msk.bf16.mxu0 %vm570_vm0, %v8160_v44 }
  0xb2   :  { %7463 = vmatmul.mubr.msk.bf16.gmra.mxu0 %vm570_vm0, %v8161_v45 }
  0xb3   :  { %7466 = vmatprep.mubr.msk.bf16.mxu0 %vm570_vm0, %v8162_v46 }
  0xba   :  { %7467 = vmatmul.mubr.msk.bf16.gmra.mxu0 %vm570_vm0, %v8163_v47 }
  0xbb   :  { %7470 = vmatprep.mubr.msk.bf16.mxu0 %vm570_vm0, %v8164_v48 }
  0xc2   :  { %7471 = vmatmul.mubr.msk.bf16.gmra.mxu0 %vm570_vm0, %v8165_v49 }
  0xc3   :  { %7474 = vmatprep.mubr.msk.bf16.mxu0 %vm570_vm0, %v8166_v50 }
  0xca   :  { %v8821_v53 = vpop.f32.mrf.mxu0  ;;  %7475 = vmatmul.mubr.msk.bf16.gmra.mxu0 %vm570_vm0, %v8167_v51 }
  0xcb   :  { %7478 = vmatprep.mubr.msk.bf16.mxu0 %vm570_vm0, %v8168_v52  ;;  %v830_v42 = vadd.f32 %v8821_v53, %v8956_v38  ;;  %v8187_v52 = vld [vmem:[%s11545_s0 + $0x228] sm:$0xff]  }
  0xcc   :  { %v8825_v54 = vpop.f32.mrf.mxu0 }
  0xcd   :  { %v822_v44 = vadd.f32 %v8956_v38, %v8825_v54  ;;  %8190 = vtanh.f32 %v830_v42 }
  0xce   :  { %v8827_v55 = vpop.f32.mrf.mxu0 }
  0xcf   :  { %v833_v46 = vadd.f32 %v8827_v55, %v8956_v38  ;;  %8192 = vtanh.f32 %v822_v44  ;;  %v8188_v55 = vld [vmem:[%s11545_s0 + $0x230] sm:$0xff]  }
  0xd0   :  { %v8835_v58 = vpop.f32.mrf.mxu0 }
  0xd2   :  { %v8837_v59 = vpop.f32.mrf.mxu0  ;;  %7479 = vmatmul.mubr.msk.bf16.gmra.mxu0 %vm570_vm0, %v8169_v56 }
  0xd3   :  { %7482 = vmatprep.mubr.msk.bf16.mxu0 %vm570_vm0, %v8170_v57  ;;  %v846_v53 = vadd.f32 %v8837_v59, %v8956_v38 }
  0xd4   :  { %v8841_v60 = vpop.f32.mrf.mxu0 }
  0xd5   :  { %v838_v56 = vadd.f32 %v8956_v38, %v8841_v60 }
  0xd6   :  { %v8843_v61 = vpop.f32.mrf.mxu0 }
  0xd8   :  { %v8851_v0 = vpop.f32.mrf.mxu0 }
  0xda   :  { %v8853_v1 = vpop.f32.mrf.mxu0  ;;  %7483 = vmatmul.mubr.msk.bf16.gmra.mxu0 %vm570_vm0, %v8171_v62  ;;  %v849_v62 = vadd.f32 %v8843_v61, %v8956_v38 }
  0xdb   :  { %7486 = vmatprep.mubr.msk.bf16.mxu0 %vm570_vm0, %v8172_v63  ;;  %v862_v61 = vadd.f32 %v8853_v1, %v8956_v38 }
  0xdc   :  { %v8857_v2 = vpop.f32.mrf.mxu0 }
  0xde   :  { %v8859_v3 = vpop.f32.mrf.mxu0 }
  0xe0   :  { %v8867_v6 = vpop.f32.mrf.mxu0 }
  0xe2   :  { %v8869_v7 = vpop.f32.mrf.mxu0  ;;  %7487 = vmatmul.mubr.msk.bf16.gmra.mxu0 %vm570_vm0, %v8173_v4 }
  0xe3   :  { %7490 = vmatprep.mubr.msk.bf16.mxu0 %vm570_vm0, %v8174_v5 }
  0xe4   :  { %v8873_v8 = vpop.f32.mrf.mxu0 }
  0xe6   :  { %v8875_v9 = vpop.f32.mrf.mxu0 }
  0xe8   :  { %v8883_v12 = vpop.f32.mrf.mxu0 }
  0xea   :  { %v8885_v13 = vpop.f32.mrf.mxu0  ;;  %7491 = vmatmul.mubr.msk.bf16.gmra.mxu0 %vm570_vm0, %v8175_v10  ;;  %v8189_v10 = vld [vmem:[%s11545_s0 + $0x238] sm:$0xff]  }
  0xeb   :  { %7494 = vmatprep.mubr.msk.bf16.mxu0 %vm570_vm0, %v8176_v11 }
  0xec   :  { %v8889_v14 = vpop.f32.mrf.mxu0 }
  0xee   :  { %v8891_v15 = vpop.f32.mrf.mxu0 }
  0xf0   :  { %v8899_v18 = vpop.f32.mrf.mxu0 }
  0xf2   :  { %v8901_v19 = vpop.f32.mrf.mxu0  ;;  %7495 = vmatmul.mubr.msk.bf16.gmra.mxu0 %vm570_vm0, %v8177_v16  ;;  %v8191_v16 = vpop.eup %8190 }
  0xf3   :  { %7498 = vmatprep.mubr.msk.bf16.mxu0 %vm570_vm0, %v8178_v17  ;;  %v854_v17 = vadd.f32 %v8956_v38, %v8857_v2 }
  0xf4   :  { %v8905_v20 = vpop.f32.mrf.mxu0 }
  0xf6   :  { %v8907_v21 = vpop.f32.mrf.mxu0 }
  0xf8   :  { %v8915_v24 = vpop.f32.mrf.mxu0 }
  0xfa   :  { %v8917_v25 = vpop.f32.mrf.mxu0  ;;  %7499 = vmatmul.mubr.msk.bf16.gmra.mxu0 %vm570_vm0, %v8179_v22 }
  0xfb   :  { %7502 = vmatprep.mubr.msk.bf16.mxu0 %vm570_vm0, %v8180_v23  ;;  %v8193_v23 = vpop.eup %8192 }
  0xfc   :  { %v8921_v26 = vpop.f32.mrf.mxu0 }
  0xfe   :  { %v8923_v27 = vpop.f32.mrf.mxu0 }
 0x100   :  { %v8931_v30 = vpop.f32.mrf.mxu0 }
 0x102   :  { %v8933_v31 = vpop.f32.mrf.mxu0  ;;  %7503 = vmatmul.mubr.msk.bf16.gmra.mxu0 %vm570_vm0, %v8181_v28 }
 0x103   :  { %7506 = vmatprep.mubr.msk.bf16.mxu0 %vm570_vm0, %v8182_v29  ;;  %v865_v29 = vadd.f32 %v8859_v3, %v8956_v38 }
 0x104   :  { %v8937_v32 = vpop.f32.mrf.mxu0 }
 0x106   :  { %v8939_v33 = vpop.f32.mrf.mxu0 }
 0x108   :  { %v8947_v36 = vpop.f32.mrf.mxu0 }
 0x10a   :  { %v8949_v37 = vpop.f32.mrf.mxu0  ;;  %7507 = vmatmul.mubr.msk.bf16.gmra.mxu0 %vm570_vm0, %v8183_v34 }
 0x10b   :  { %7510 = vmatprep.mubr.msk.bf16.mxu0 %vm570_vm0, %v8184_v35  ;;  %v1555_v35 = vsel %vm1540_vm1, %v8191_v16, 0.0 }
 0x10c   :  { %v8958_v39 = vpop.f32.mrf.mxu0 }
 0x10e   :  { %v8960_v40 = vpop.f32.mrf.mxu0 }
 0x110   :  { %v8972_v45 = vpop.f32.mrf.mxu0 }
 0x112   :  { %v7416_v47 = vpop.f32.mrf.mxu0  ;;  %7511 = vmatmul.mubr.msk.bf16.gmra.mxu0 %vm570_vm0, %v8185_v41 }
 0x113   :  { %v974_v48 = vadd.f32 %v7416_v47, %v8956_v38  ;;  %7514 = vmatprep.mubr.msk.bf16.mxu0 %vm570_vm0, %v8186_v43 }
 0x114   :  { %v965_v49 = vpop.f32.mrf.mxu0 }
 0x115   :  { %8194 = vtanh.f32 %v974_v48  ;;  %v966_v50 = vadd.f32 %v8956_v38, %v965_v49 }
 0x116   :  { %8196 = vtanh.f32 %v833_v46  ;;  %v7417_v51 = vpop.f32.mrf.mxu0  ;;  %v1541_v46 = vsel %vm1540_vm1, %v8193_v23, 0.0 }
 0x117   :  { %8198 = vtanh.f32 %v966_v50  ;;  %v977_v54 = vadd.f32 %v7417_v51, %v8956_v38 }
 0x118   :  { %v8991_v57 = vpop.f32.mrf.mxu0 }
 0x119   :  { %8200 = vtanh.f32 %v977_v54 }
 0x11a   :  { %v7420_v63 = vpop.f32.mrf.mxu0  ;;  %7515 = vmatmul.mubr.msk.bf16.gmra.mxu0 %vm570_vm0, %v8187_v52  ;;  %8202 = vtanh.f32 %v846_v53  ;;  %v878_v52 = vadd.f32 %v8869_v7, %v8956_v38 }
 0x11b   :  { %v990_v59 = vadd.f32 %v7420_v63, %v8956_v38  ;;  %7518 = vmatprep.mubr.msk.bf16.mxu0 %vm570_vm0, %v8188_v55  ;;  %8204 = vtanh.f32 %v838_v56  ;;  %v870_v56 = vadd.f32 %v8956_v38, %v8873_v8 }
 0x11c   :  { %v981_v4 = vpop.f32.mrf.mxu0 }
 0x11d   :  { %8206 = vtanh.f32 %v990_v59  ;;  %v982_v5 = vadd.f32 %v8956_v38, %v981_v4 }
 0x11e   :  { %8208 = vtanh.f32 %v849_v62  ;;  %v7421_v60 = vpop.f32.mrf.mxu0 }
 0x11f   :  { %8210 = vtanh.f32 %v982_v5  ;;  %v993_v11 = vadd.f32 %v7421_v60, %v8956_v38  ;;  %v881_v5 = vadd.f32 %v8875_v9, %v8956_v38 }
 0x120   :  { %v9007_v22 = vpop.f32.mrf.mxu0 }
 0x121   :  { %8212 = vtanh.f32 %v993_v11 }
 0x122   :  { %v8195_v28 = vpop.eup %8194  ;;  %v7424_v34 = vpop.f32.mrf.mxu0  ;;  %7519 = vmatmul.mubr.msk.bf16.gmra.mxu0 %vm570_vm0, %v8189_v10  ;;  %8214 = vtanh.f32 %v862_v61 }
 0x123   :  { %v8197_v1 = vpop.eup %8196  ;;  %v1556_v41 = vsel %vm1540_vm1, %v8195_v28, 0.0  ;;  %v1006_v42 = vadd.f32 %v7424_v34, %v8956_v38  ;;  %8216 = vtanh.f32 %v854_v17 }
 0x124   :  { %v8199_v2 = vpop.eup %8198  ;;  %v9015_v43 = vadd.f32 %v1556_v41, %v1555_v35  ;;  %v997_v44 = vpop.f32.mrf.mxu0  ;;  %v1562_v49 = vsel %vm1540_vm1, %v8197_v1, 0.0  ;;  %v894_v41 = vadd.f32 %v8885_v13, %v8956_v38 }
 0x125   :  { %v1542_v3 = vsel %vm1540_vm1, %v8199_v2, 0.0  ;;  %8218 = vtanh.f32 %v1006_v42  ;;  %v998_v47 = vadd.f32 %v8956_v38, %v997_v44 }
 0x126   :  { %v8201_v48 = vpop.eup %8200  ;;  %8220 = vtanh.f32 %v865_v29  ;;  %v9021_v50 = vadd.f32 %v1542_v3, %v1541_v46  ;;  %v7425_v51 = vpop.f32.mrf.mxu0  ;;  %v886_v46 = vadd.f32 %v8956_v38, %v8889_v14 }
 0x127   :  { %v1563_v53 = vsel %vm1540_vm1, %v8201_v48, 0.0  ;;  %8222 = vtanh.f32 %v998_v47  ;;  %v1009_v54 = vadd.f32 %v7425_v51, %v8956_v38  ;;  %v8203_v55 = vpop.eup %8202  ;;  %v897_v51 = vadd.f32 %v8891_v15, %v8956_v38 }
 0x128   :  { %v9029_v62 = vadd.f32 %v1563_v53, %v1562_v49  ;;  %v9031_v63 = vpop.f32.mrf.mxu0  ;;  %v8205_v59 = vpop.eup %8204  ;;  %v1583_v10 = vsel %vm1540_vm1, %v8203_v55, 0.0 }
 0x129   :  { %8224 = vtanh.f32 %v1009_v54  ;;  %v1569_v23 = vsel %vm1540_vm1, %v8205_v59, 0.0 }
 0x12a   :  { %v8207_v4 = vpop.eup %8206  ;;  %v7428_v7 = vpop.f32.mrf.mxu0  ;;  %8226 = vtanh.f32 %v878_v52 }
 0x12b   :  { %v8209_v60 = vpop.eup %8208  ;;  %v1584_v61 = vsel %vm1540_vm1, %v8207_v4, 0.0  ;;  %v1022_v11 = vadd.f32 %v7428_v7, %v8956_v38  ;;  %8228 = vtanh.f32 %v870_v56 }
 0x12c   :  { %v8211_v8 = vpop.eup %8210  ;;  %v9038_v16 = vadd.f32 %v1584_v61, %v1583_v10  ;;  %v1013_v17 = vpop.f32.mrf.mxu0  ;;  %v1590_v34 = vsel %vm1540_vm1, %v8209_v60, 0.0  ;;  %v910_v60 = vadd.f32 %v8901_v19, %v8956_v38 }
 0x12d   :  { %v1570_v28 = vsel %vm1540_vm1, %v8211_v8, 0.0  ;;  %8230 = vtanh.f32 %v1022_v11  ;;  %v1014_v9 = vadd.f32 %v8956_v38, %v1013_v17 }
 0x12e   :  { %v8213_v29 = vpop.eup %8212  ;;  %8232 = vtanh.f32 %v881_v5  ;;  %v9044_v1 = vadd.f32 %v1570_v28, %v1569_v23  ;;  %v7429_v35 = vpop.f32.mrf.mxu0  ;;  %v902_v28 = vadd.f32 %v8956_v38, %v8905_v20 }
 0x12f   :  { %v1591_v42 = vsel %vm1540_vm1, %v8213_v29, 0.0  ;;  %8234 = vtanh.f32 %v1014_v9  ;;  %v1025_v2 = vadd.f32 %v7429_v35, %v8956_v38  ;;  %v8215_v44 = vpop.eup %8214  ;;  %v913_v35 = vadd.f32 %v8907_v21, %v8956_v38 }
 0x130   :  { %v9052_v3 = vadd.f32 %v1591_v42, %v1590_v34  ;;  %v9054_v47 = vpop.f32.mrf.mxu0  ;;  %v8217_v48 = vpop.eup %8216  ;;  %v1611_v53 = vsel %vm1540_vm1, %v8215_v44, 0.0 }
 0x131   :  { %8236 = vtanh.f32 %v1025_v2  ;;  %v1597_v4 = vsel %vm1540_vm1, %v8217_v48, 0.0 }
 0x132   :  { %v8219_v49 = vpop.eup %8218  ;;  %v7432_v13 = vpop.f32.mrf.mxu0  ;;  %8238 = vtanh.f32 %v894_v41 }
 0x133   :  { %v8221_v52 = vpop.eup %8220  ;;  %v1612_v54 = vsel %vm1540_vm1, %v8219_v49, 0.0  ;;  %v1038_v55 = vadd.f32 %v7432_v13, %v8956_v38  ;;  %8240 = vtanh.f32 %v886_v46 }
 0x134   :  { %v8223_v14 = vpop.eup %8222  ;;  %v9061_v56 = vadd.f32 %v1612_v54, %v1611_v53  ;;  %v1029_v59 = vpop.f32.mrf.mxu0  ;;  %v1618_v11 = vsel %vm1540_vm1, %v8221_v52, 0.0 }
 0x135   :  { %v1598_v5 = vsel %vm1540_vm1, %v8223_v14, 0.0  ;;  %8242 = vtanh.f32 %v1038_v55  ;;  %v1030_v15 = vadd.f32 %v8956_v38, %v1029_v59  ;;  %v926_v14 = vadd.f32 %v8917_v25, %v8956_v38 }
 0x136   :  { %v8225_v7 = vpop.eup %8224  ;;  %8244 = vtanh.f32 %v897_v51  ;;  %v9068_v10 = vadd.f32 %v1598_v5, %v1597_v4  ;;  %v7433_v61 = vpop.f32.mrf.mxu0 }
 0x137   :  { %v1619_v8 = vsel %vm1540_vm1, %v8225_v7, 0.0  ;;  %8246 = vtanh.f32 %v1030_v15  ;;  %v1041_v17 = vadd.f32 %v7433_v61, %v8956_v38  ;;  %v8227_v23 = vpop.eup %8226  ;;  %v918_v15 = vadd.f32 %v8956_v38, %v8921_v26 }
 0x138   :  { %v9075_v9 = vadd.f32 %v1619_v8, %v1618_v11  ;;  %v9077_v29 = vpop.f32.mrf.mxu0  ;;  %v8229_v34 = vpop.eup %8228  ;;  %v1639_v2 = vsel %vm1540_vm1, %v8227_v23, 0.0  ;;  %v929_v8 = vadd.f32 %v8923_v27, %v8956_v38 }
 0x139   :  { %8248 = vtanh.f32 %v1041_v17  ;;  %v1625_v51 = vsel %vm1540_vm1, %v8229_v34, 0.0 }
 0x13a   :  { %v8231_v19 = vpop.eup %8230  ;;  %8250 = vtanh.f32 %v910_v60  ;;  %v7436_v41 = vpop.f32.mrf.mxu0 }
 0x13b   :  { %v8233_v42 = vpop.eup %8232  ;;  %v1640_v44 = vsel %vm1540_vm1, %v8231_v19, 0.0  ;;  %v1054_v46 = vadd.f32 %v7436_v41, %v8956_v38  ;;  %8252 = vtanh.f32 %v902_v28 }
 0x13c   :  { %v8235_v20 = vpop.eup %8234  ;;  %v9084_v48 = vadd.f32 %v1640_v44, %v1639_v2  ;;  %v1045_v49 = vpop.f32.mrf.mxu0  ;;  %v1646_v53 = vsel %vm1540_vm1, %v8233_v42, 0.0 }
 0x13d   :  { %v1626_v13 = vsel %vm1540_vm1, %v8235_v20, 0.0  ;;  %8254 = vtanh.f32 %v1054_v46  ;;  %v1046_v21 = vadd.f32 %v8956_v38, %v1045_v49 }
 0x13e   :  { %v8237_v52 = vpop.eup %8236  ;;  %8256 = vtanh.f32 %v913_v35  ;;  %v9090_v54 = vadd.f32 %v1626_v13, %v1625_v51  ;;  %v7437_v55 = vpop.f32.mrf.mxu0  ;;  %v942_v51 = vadd.f32 %v8933_v31, %v8956_v38  ;;  %v945_v31 = vadd.f32 %v8939_v33, %v8956_v38 }
 0x13f   :  { %v1647_v59 = vsel %vm1540_vm1, %v8237_v52, 0.0  ;;  %8258 = vtanh.f32 %v1046_v21  ;;  %v1057_v4 = vadd.f32 %v7437_v55, %v8956_v38  ;;  %v8239_v5 = vpop.eup %8238  ;;  %v934_v52 = vadd.f32 %v8956_v38, %v8937_v32  ;;  %v6757_v32 = vld [vmem:[%s11548_s3 + $0x4] sm:$0xf] }
 0x140   :  { %v9098_v7 = vadd.f32 %v1647_v59, %v1646_v53  ;;  %v9100_v60 = vpop.f32.mrf.mxu0  ;;  %v8241_v61 = vpop.eup %8240  ;;  %v1667_v23 = vsel %vm1540_vm1, %v8239_v5, 0.0  ;;  %8080 = vmatprep.subr.msk.bf16.mxu1 %vm1977_vm2, %v6757_v32  ;;  %v1979_v33 = vsel %vm1977_vm2, %v6757_v32, 0 }
 0x141   :  { %8260 = vtanh.f32 %v1057_v4  ;;  %v1653_v41 = vsel %vm1540_vm1, %v8241_v61, 0.0  ;;  %7523 = vmatpush3.bf16.msra.mxu1 %v1979_v33 }
 0x142   :  { %v8243_v11 = vpop.eup %8242  ;;  %v7440_v25 = vpop.f32.mrf.mxu0  ;;  %8262 = vtanh.f32 %v926_v14 }
 0x143   :  { %v8245_v17 = vpop.eup %8244  ;;  %v1668_v28 = vsel %vm1540_vm1, %v8243_v11, 0.0  ;;  %v1070_v34 = vadd.f32 %v7440_v25, %v8956_v38  ;;  %8264 = vtanh.f32 %v918_v15 }
 0x144   :  { %v8247_v26 = vpop.eup %8246  ;;  %v9107_v19 = vadd.f32 %v1668_v28, %v1667_v23  ;;  %v1061_v35 = vpop.f32.mrf.mxu0  ;;  %v1674_v44 = vsel %vm1540_vm1, %v8245_v17, 0.0 }
 0x145   :  { %v1654_v42 = vsel %vm1540_vm1, %v8247_v26, 0.0  ;;  %8266 = vtanh.f32 %v1070_v34  ;;  %v1062_v27 = vadd.f32 %v8956_v38, %v1061_v35 }
 0x146   :  { %v8249_v2 = vpop.eup %8248  ;;  %8268 = vtanh.f32 %v929_v8  ;;  %v9113_v46 = vadd.f32 %v1654_v42, %v1653_v41  ;;  %v7441_v20 = vpop.f32.mrf.mxu0 }
 0x147   :  { %v8251_v49 = vpop.eup %8250  ;;  %v1675_v13 = vsel %vm1540_vm1, %v8249_v2, 0.0  ;;  %8270 = vtanh.f32 %v1062_v27  ;;  %v1073_v21 = vadd.f32 %v7441_v20, %v8956_v38  ;;  %v958_v27 = vadd.f32 %v8949_v37, %v8956_v38  ;;  %v6846_v20 = vld [vmem:[%s11548_s3 + $0x28] sm:$0xf] }
 0x148   :  { %v9121_v53 = vadd.f32 %v1675_v13, %v1674_v44  ;;  %v9123_v55 = vpop.f32.mrf.mxu0  ;;  %v8253_v14 = vpop.eup %8252  ;;  %v1695_v4 = vsel %vm1540_vm1, %v8251_v49, 0.0  ;;  %8090 = vmatprep.subr.msk.bf16.mxu0 %vm1977_vm2, %v6846_v20  ;;  %v3581_v37 = vsel %vm1977_vm2, %v6846_v20, 0 }
 0x149   :  { %8272 = vtanh.f32 %v1073_v21  ;;  %v1681_v23 = vsel %vm1540_vm1, %v8253_v14, 0.0  ;;  %7703 = vmatpush3.bf16.msra.mxu0 %v3581_v37 }
 0x14a   :  { %v8255_v59 = vpop.eup %8254  ;;  %v7444_v5 = vpop.f32.mrf.mxu0  ;;  %8274 = vtanh.f32 %v942_v51  ;;  %v950_v51 = vadd.f32 %v8956_v38, %v8958_v39 }
 0x14b   :  { %v8257_v15 = vpop.eup %8256  ;;  %v1696_v61 = vsel %vm1540_vm1, %v8255_v59, 0.0  ;;  %v1086_v11 = vadd.f32 %v7444_v5, %v8956_v38  ;;  %8276 = vtanh.f32 %v934_v52  ;;  %v961_v59 = vadd.f32 %v8960_v40, %v8956_v38 }
 0x14c   :  { %v8259_v8 = vpop.eup %8258  ;;  %v9133_v25 = vadd.f32 %v1696_v61, %v1695_v4  ;;  %v1077_v17 = vpop.f32.mrf.mxu0  ;;  %v1702_v35 = vsel %vm1540_vm1, %v8257_v15, 0.0 }
 0x14d   :  { %v1682_v28 = vsel %vm1540_vm1, %v8259_v8, 0.0  ;;  %8278 = vtanh.f32 %v1086_v11  ;;  %v1078_v34 = vadd.f32 %v8956_v38, %v1077_v17 }
 0x14e   :  { %v8261_v26 = vpop.eup %8260  ;;  %8280 = vtanh.f32 %v945_v31  ;;  %v9141_v41 = vadd.f32 %v1682_v28, %v1681_v23  ;;  %v7445_v42 = vpop.f32.mrf.mxu0 }
 0x14f   :  { %v1703_v2 = vsel %vm1540_vm1, %v8261_v26, 0.0  ;;  %8282 = vtanh.f32 %v1078_v34  ;;  %v1089_v44 = vadd.f32 %v7445_v42, %v8956_v38  ;;  %v8263_v49 = vpop.eup %8262 }
 0x150   :  { %v9152_v13 = vadd.f32 %v1703_v2, %v1702_v35  ;;  %v9154_v21 = vpop.f32.mrf.mxu0  ;;  %v8265_v52 = vpop.eup %8264  ;;  %v1723_v5 = vsel %vm1540_vm1, %v8263_v49, 0.0 }
 0x151   :  { %8284 = vtanh.f32 %v1089_v44  ;;  %v1709_v8 = vsel %vm1540_vm1, %v8265_v52, 0.0 }
 0x152   :  { %v8267_v14 = vpop.eup %8266  ;;  %v7448_v4 = vpop.f32.mrf.mxu0  ;;  %8286 = vtanh.f32 %v958_v27 }
 0x153   :  { %v8269_v31 = vpop.eup %8268  ;;  %v1724_v39 = vsel %vm1540_vm1, %v8267_v14, 0.0  ;;  %v1102_v15 = vadd.f32 %v7448_v4, %v8956_v38  ;;  %8288 = vtanh.f32 %v950_v51 }
 0x154   :  { %v8271_v61 = vpop.eup %8270  ;;  %v9163_v11 = vadd.f32 %v1724_v39, %v1723_v5  ;;  %v1093_v32 = vpop.f32.mrf.mxu0  ;;  %v1730_v34 = vsel %vm1540_vm1, %v8269_v31, 0.0 }
 0x155   :  { %v1710_v17 = vsel %vm1540_vm1, %v8271_v61, 0.0  ;;  %8290 = vtanh.f32 %v1102_v15  ;;  %v1094_v40 = vadd.f32 %v8956_v38, %v1093_v32 }
 0x156   :  { %v8273_v33 = vpop.eup %8272  ;;  %8292 = vtanh.f32 %v961_v59  ;;  %v9168_v23 = vadd.f32 %v1710_v17, %v1709_v8  ;;  %v7449_v28 = vpop.f32.mrf.mxu0 }
 0x157   :  { %v1731_v26 = vsel %vm1540_vm1, %v8273_v33, 0.0  ;;  %8294 = vtanh.f32 %v1094_v40  ;;  %v1105_v35 = vadd.f32 %v7449_v28, %v8956_v38  ;;  %v8275_v42 = vpop.eup %8274 }
 0x158   :  { %v9173_v27 = vadd.f32 %v1731_v26, %v1730_v34  ;;  %v9175_v2 = vpop.f32.mrf.mxu0  ;;  %v8277_v44 = vpop.eup %8276  ;;  %v1751_v37 = vsel %vm1540_vm1, %v8275_v42, 0.0 }
 0x159   :  { %11584 = vst [vmem:[#allocation7_spill] sm:$0xff] %v9175_v2  ;;  %8296 = vtanh.f32 %v1105_v35  ;;  %v1737_v5 = vsel %vm1540_vm1, %v8277_v44, 0.0 }
 0x15a   :  { %v8279_v20 = vpop.eup %8278  ;;  %v7452_v49 = vpop.f32.mrf.mxu0 }
 0x15b   :  { %v8281_v51 = vpop.eup %8280  ;;  %v1752_v52 = vsel %vm1540_vm1, %v8279_v20, 0.0  ;;  %v1118_v14 = vadd.f32 %v7452_v49, %v8956_v38 }
 0x15c   :  { %v8283_v59 = vpop.eup %8282  ;;  %v9180_v4 = vadd.f32 %v1752_v52, %v1751_v37  ;;  %v1109_v31 = vpop.f32.mrf.mxu0  ;;  %v1758_v17 = vsel %vm1540_vm1, %v8281_v51, 0.0 }
 0x15d   :  { %v1738_v39 = vsel %vm1540_vm1, %v8283_v59, 0.0  ;;  %8298 = vtanh.f32 %v1118_v14  ;;  %v1110_v15 = vadd.f32 %v8956_v38, %v1109_v31 }
 0x15e   :  { %v8285_v61 = vpop.eup %8284  ;;  %v9185_v32 = vadd.f32 %v1738_v39, %v1737_v5  ;;  %v7453_v8 = vpop.f32.mrf.mxu0 }
 0x15f   :  { %v1759_v40 = vsel %vm1540_vm1, %v8285_v61, 0.0  ;;  %8300 = vtanh.f32 %v1110_v15  ;;  %v1121_v33 = vadd.f32 %v7453_v8, %v8956_v38  ;;  %v8287_v28 = vpop.eup %8286 }
 0x160   :  { %v9190_v34 = vadd.f32 %v1759_v40, %v1758_v17  ;;  %v9192_v26 = vpop.f32.mrf.mxu0  ;;  %v8289_v35 = vpop.eup %8288  ;;  %v1779_v49 = vsel %vm1540_vm1, %v8287_v28, 0.0 }
 0x161   :  { %8302 = vtanh.f32 %v1121_v33  ;;  %v1765_v31 = vsel %vm1540_vm1, %v8289_v35, 0.0 }
 0x162   :  { %v8291_v42 = vpop.eup %8290  ;;  %v7456_v44 = vpop.f32.mrf.mxu0 }
 0x163   :  { %v8293_v20 = vpop.eup %8292  ;;  %v1780_v37 = vsel %vm1540_vm1, %v8291_v42, 0.0  ;;  %v1134_v51 = vadd.f32 %v7456_v44, %v8956_v38 }
 0x164   :  { %v8295_v52 = vpop.eup %8294  ;;  %v9197_v14 = vadd.f32 %v1780_v37, %v1779_v49  ;;  %v1125_v59 = vpop.f32.mrf.mxu0  ;;  %v1786_v17 = vsel %vm1540_vm1, %v8293_v20, 0.0 }
 0x165   :  { %v1766_v5 = vsel %vm1540_vm1, %v8295_v52, 0.0  ;;  %8304 = vtanh.f32 %v1134_v51  ;;  %v1126_v39 = vadd.f32 %v8956_v38, %v1125_v59 }
 0x166   :  { %v8297_v15 = vpop.eup %8296  ;;  %v9202_v61 = vadd.f32 %v1766_v5, %v1765_v31  ;;  %v7457_v8 = vpop.f32.mrf.mxu0 }
 0x167   :  { %v1787_v40 = vsel %vm1540_vm1, %v8297_v15, 0.0  ;;  %8306 = vtanh.f32 %v1126_v39  ;;  %v1137_v33 = vadd.f32 %v7457_v8, %v8956_v38 }
 0x168   :  { %v9207_v28 = vadd.f32 %v1787_v40, %v1786_v17  ;;  %v9209_v42 = vpop.f32.mrf.mxu0 }
 0x169   :  { %8308 = vtanh.f32 %v1137_v33 }
 0x16a   :  { %v8299_v35 = vpop.eup %8298  ;;  %v7460_v44 = vpop.f32.mrf.mxu0 }
 0x16b   :  { %v1558_v49 = vsel %vm1540_vm1, %v8299_v35, 0.0  ;;  %v1150_v37 = vadd.f32 %v7460_v44, %v8956_v38 }
 0x16c   :  { %v8301_v51 = vpop.eup %8300  ;;  %v9214_v52 = vadd.f32 %v1558_v49, %v9015_v43  ;;  %v1141_v20 = vpop.f32.mrf.mxu0 }
 0x16d   :  { %v1544_v59 = vsel %vm1540_vm1, %v8301_v51, 0.0  ;;  %8310 = vtanh.f32 %v1150_v37  ;;  %v1142_v31 = vadd.f32 %v8956_v38, %v1141_v20 }
 0x16e   :  { %v8303_v5 = vpop.eup %8302  ;;  %v9219_v39 = vadd.f32 %v1544_v59, %v9021_v50  ;;  %v7461_v15 = vpop.f32.mrf.mxu0 }
 0x16f   :  { %v1565_v8 = vsel %vm1540_vm1, %v8303_v5, 0.0  ;;  %8312 = vtanh.f32 %v1142_v31  ;;  %v1153_v17 = vadd.f32 %v7461_v15, %v8956_v38 }
 0x170   :  { %v9224_v40 = vadd.f32 %v1565_v8, %v9029_v62  ;;  %v9226_v43 = vpop.f32.mrf.mxu0 }
 0x171   :  { %8314 = vtanh.f32 %v1153_v17 }
 0x172   :  { %v8305_v33 = vpop.eup %8304  ;;  %v7464_v35 = vpop.f32.mrf.mxu0 }
 0x173   :  { %v1586_v44 = vsel %vm1540_vm1, %v8305_v33, 0.0  ;;  %v1166_v49 = vadd.f32 %v7464_v35, %v8956_v38 }
 0x174   :  { %v8307_v50 = vpop.eup %8306  ;;  %v9231_v37 = vadd.f32 %v1586_v44, %v9038_v16  ;;  %v1157_v51 = vpop.f32.mrf.mxu0 }
 0x175   :  { %v1572_v20 = vsel %vm1540_vm1, %v8307_v50, 0.0  ;;  %8316 = vtanh.f32 %v1166_v49  ;;  %v1158_v62 = vadd.f32 %v8956_v38, %v1157_v51 }
 0x176   :  { %v8309_v59 = vpop.eup %8308  ;;  %v9236_v31 = vadd.f32 %v1572_v20, %v9044_v1  ;;  %v7465_v5 = vpop.f32.mrf.mxu0 }
 0x177   :  { %v1593_v15 = vsel %vm1540_vm1, %v8309_v59, 0.0  ;;  %8318 = vtanh.f32 %v1158_v62  ;;  %v1169_v8 = vadd.f32 %v7465_v5, %v8956_v38 }
 0x178   :  { %v9241_v17 = vadd.f32 %v1593_v15, %v9052_v3  ;;  %v9243_v16 = vpop.f32.mrf.mxu0  ;;  %v9258_v15 = vld [vmem:[%s11548_s3] sm:$0xf] }
 0x179   :  { %8320 = vtanh.f32 %v1169_v8  ;;  %8081 = vmatprep.subr.msk.bf16.mxu1 %vm1977_vm2, %v9258_v15 }
 0x17a   :  { %v8311_v33 = vpop.eup %8310  ;;  %v7468_v35 = vpop.f32.mrf.mxu0 }
 0x17b   :  { %v1614_v44 = vsel %vm1540_vm1, %v8311_v33, 0.0  ;;  %v1182_v49 = vadd.f32 %v7468_v35, %v8956_v38 }
 0x17c   :  { %v8313_v1 = vpop.eup %8312  ;;  %v9248_v50 = vadd.f32 %v1614_v44, %v9061_v56  ;;  %v1173_v51 = vpop.f32.mrf.mxu0 }
 0x17d   :  { %v1600_v20 = vsel %vm1540_vm1, %v8313_v1, 0.0  ;;  %8322 = vtanh.f32 %v1182_v49  ;;  %v1174_v3 = vadd.f32 %v8956_v38, %v1173_v51 }
 0x17e   :  { %v8315_v62 = vpop.eup %8314  ;;  %v9253_v59 = vadd.f32 %v1600_v20, %v9068_v10  ;;  %v7469_v5 = vpop.f32.mrf.mxu0 }
 0x17f   :  { %v1621_v8 = vsel %vm1540_vm1, %v8315_v62, 0.0  ;;  %8324 = vtanh.f32 %v1174_v3  ;;  %v1185_v56 = vadd.f32 %v7469_v5, %v8956_v38 }
 0x180   :  { %v9265_v33 = vadd.f32 %v1621_v8, %v9075_v9  ;;  %v9267_v35 = vpop.f32.mrf.mxu0 }
 0x181   :  { %8326 = vtanh.f32 %v1185_v56 }
 0x182   :  { %v8317_v10 = vpop.eup %8316  ;;  %v7472_v44 = vpop.f32.mrf.mxu0 }
 0x183   :  { %v1642_v49 = vsel %vm1540_vm1, %v8317_v10, 0.0  ;;  %v1198_v1 = vadd.f32 %v7472_v44, %v8956_v38 }
 0x184   :  { %v8319_v51 = vpop.eup %8318  ;;  %v9272_v20 = vadd.f32 %v1642_v49, %v9084_v48  ;;  %v1189_v3 = vpop.f32.mrf.mxu0  ;;  %v9289_v49 = vld [vmem:[%s11548_s3 + $0x30] sm:$0xf] }
 0x185   :  { %v1628_v62 = vsel %vm1540_vm1, %v8319_v51, 0.0  ;;  %8328 = vtanh.f32 %v1198_v1  ;;  %v1190_v9 = vadd.f32 %v8956_v38, %v1189_v3  ;;  %11586 = vst [vmem:[#allocation9_spill] sm:$0xff] %v9289_v49  ;;  %8092 = vmatprep.subr.msk.bf16.mxu0 %vm1977_vm2, %v9289_v49 }
 0x186   :  { %v8321_v5 = vpop.eup %8320  ;;  %v9277_v8 = vadd.f32 %v1628_v62, %v9090_v54  ;;  %v7473_v56 = vpop.f32.mrf.mxu0 }
 0x187   :  { %v1649_v2 = vsel %vm1540_vm1, %v8321_v5, 0.0  ;;  %8330 = vtanh.f32 %v1190_v9  ;;  %v1201_v10 = vadd.f32 %v7473_v56, %v8956_v38 }
 0x188   :  { %v9282_v44 = vadd.f32 %v1649_v2, %v9098_v7  ;;  %v9284_v48 = vpop.f32.mrf.mxu0 }
 0x189   :  { %8332 = vtanh.f32 %v1201_v10 }
 0x18a   :  { %11585 = vst [vmem:[#allocation8_spill] sm:$0xff] %v9282_v44  ;;  %v8323_v54 = vpop.eup %8322  ;;  %v7476_v1 = vpop.f32.mrf.mxu0 }
 0x18b   :  { %v1670_v51 = vsel %vm1540_vm1, %v8323_v54, 0.0  ;;  %v1214_v3 = vadd.f32 %v7476_v1, %v8956_v38 }
 0x18c   :  { %v8325_v62 = vpop.eup %8324  ;;  %v9296_v7 = vadd.f32 %v1670_v51, %v9107_v19  ;;  %v1205_v2 = vpop.f32.mrf.mxu0 }
 0x18d   :  { %v1656_v9 = vsel %vm1540_vm1, %v8325_v62, 0.0  ;;  %8334 = vtanh.f32 %v1214_v3  ;;  %v1206_v5 = vadd.f32 %v8956_v38, %v1205_v2 }
 0x18e   :  { %v8327_v56 = vpop.eup %8326  ;;  %v9301_v10 = vadd.f32 %v1656_v9, %v9113_v46  ;;  %v7477_v49 = vpop.f32.mrf.mxu0 }
 0x18f   :  { %v1677_v44 = vsel %vm1540_vm1, %v8327_v56, 0.0  ;;  %8336 = vtanh.f32 %v1206_v5  ;;  %v1217_v54 = vadd.f32 %v7477_v49, %v8956_v38 }
 0x190   :  { %v9306_v1 = vadd.f32 %v1677_v44, %v9121_v53  ;;  %v9308_v19 = vpop.f32.mrf.mxu0 }
 0x191   :  { %8338 = vtanh.f32 %v1217_v54 }
 0x192   :  { %v8329_v51 = vpop.eup %8328  ;;  %v7480_v3 = vpop.f32.mrf.mxu0 }
 0x193   :  { %v1698_v62 = vsel %vm1540_vm1, %v8329_v51, 0.0  ;;  %v1230_v2 = vadd.f32 %v7480_v3, %v8956_v38  ;;  %v825_v51 = vadd.f32 %v8956_v38, %v8835_v58 }
 0x194   :  { %v8331_v46 = vpop.eup %8330  ;;  %v9313_v9 = vadd.f32 %v1698_v62, %v9133_v25  ;;  %v1221_v56 = vpop.f32.mrf.mxu0  ;;  %v841_v62 = vadd.f32 %v8956_v38, %v8851_v0  ;;  %v873_v0 = vadd.f32 %v8956_v38, %v8883_v12  ;;  %v969_v12 = vadd.f32 %v8956_v38, %v8991_v57 }
 0x195   :  { %v1684_v5 = vsel %vm1540_vm1, %v8331_v46, 0.0  ;;  %8340 = vtanh.f32 %v1230_v2  ;;  %v1222_v53 = vadd.f32 %v8956_v38, %v1221_v56  ;;  %v857_v56 = vadd.f32 %v8956_v38, %v8867_v6 }
 0x196   :  { %v8333_v44 = vpop.eup %8332  ;;  %v9318_v49 = vadd.f32 %v1684_v5, %v9141_v41  ;;  %v7481_v54 = vpop.f32.mrf.mxu0  ;;  %v985_v57 = vadd.f32 %v8956_v38, %v9007_v22 }
 0x197   :  { %v1705_v3 = vsel %vm1540_vm1, %v8333_v44, 0.0  ;;  %8342 = vtanh.f32 %v1222_v53  ;;  %v1233_v25 = vadd.f32 %v7481_v54, %v8956_v38 }
 0x198   :  { %v9327_v2 = vadd.f32 %v1705_v3, %v9152_v13  ;;  %v9329_v46 = vpop.f32.mrf.mxu0 }
 0x199   :  { %8344 = vtanh.f32 %v1233_v25 }
 0x19a   :  { %v8335_v41 = vpop.eup %8334  ;;  %v7484_v5 = vpop.f32.mrf.mxu0  ;;  %8346 = vtanh.f32 %v825_v51  ;;  %v889_v51 = vadd.f32 %v8956_v38, %v8899_v18 }
 0x19b   :  { %v1726_v58 = vsel %vm1540_vm1, %v8335_v41, 0.0  ;;  %v1246_v53 = vadd.f32 %v7484_v5, %v8956_v38  ;;  %8348 = vtanh.f32 %v841_v62 }
 0x19c   :  { %v8337_v44 = vpop.eup %8336  ;;  %v9338_v13 = vadd.f32 %v1726_v58, %v9163_v11  ;;  %v1237_v54 = vpop.f32.mrf.mxu0  ;;  %v1113_v58 = vadd.f32 %v8956_v38, %v9192_v26  ;;  %v905_v26 = vadd.f32 %v8956_v38, %v8915_v24 }
 0x19d   :  { %v1712_v3 = vsel %vm1540_vm1, %v8337_v44, 0.0  ;;  %8350 = vtanh.f32 %v1246_v53  ;;  %v1238_v6 = vadd.f32 %v8956_v38, %v1237_v54 }
 0x19e   :  { %v8339_v25 = vpop.eup %8338  ;;  %8352 = vtanh.f32 %v857_v56  ;;  %v9345_v41 = vadd.f32 %v1712_v3, %v9168_v23  ;;  %v7485_v62 = vpop.f32.mrf.mxu0 }
 0x19f   :  { %v1733_v11 = vsel %vm1540_vm1, %v8339_v25, 0.0  ;;  %8354 = vtanh.f32 %v1238_v6  ;;  %v1249_v5 = vadd.f32 %v7485_v62, %v8956_v38 }
 0x1a0   :  { %8356 = vtanh.f32 %v873_v0  ;;  %v9354_v56 = vadd.f32 %v1733_v11, %v9173_v27  ;;  %v9356_v18 = vpop.f32.mrf.mxu0 }
 0x1a1   :  { %8358 = vtanh.f32 %v1249_v5  ;;  %v1129_v5 = vadd.f32 %v8956_v38, %v9209_v42 }
 0x1a2   :  { %v8341_v23 = vpop.eup %8340  ;;  %8360 = vtanh.f32 %v889_v51  ;;  %v7488_v53 = vpop.f32.mrf.mxu0  ;;  %v921_v51 = vadd.f32 %v8956_v38, %v8931_v30 }
 0x1a3   :  { %8362 = vtanh.f32 %v969_v12  ;;  %v1754_v44 = vsel %vm1540_vm1, %v8341_v23, 0.0  ;;  %v1262_v0 = vadd.f32 %v7488_v53, %v8956_v38  ;;  %v1001_v53 = vadd.f32 %v8956_v38, %v9031_v63  ;;  %v9395_v63 = vld [vmem:[%s11547_s2] ss:$0 sm:$0xff] }
 0x1a4   :  { %v8343_v54 = vpop.eup %8342  ;;  %8364 = vtanh.f32 %v1113_v58  ;;  %v9365_v27 = vadd.f32 %v1754_v44, %v9180_v4  ;;  %v1253_v3 = vpop.f32.mrf.mxu0 }
 0x1a5   :  { %v1740_v6 = vsel %vm1540_vm1, %v8343_v54, 0.0  ;;  %8366 = vtanh.f32 %v1262_v0  ;;  %v1254_v22 = vadd.f32 %v8956_v38, %v1253_v3 }
 0x1a6   :  { %v8345_v25 = vpop.eup %8344  ;;  %8368 = vtanh.f32 %v985_v57  ;;  %v9372_v62 = vadd.f32 %v1740_v6, %v9185_v32  ;;  %v7489_v12 = vpop.f32.mrf.mxu0 }
 0x1a7   :  { %v1761_v24 = vsel %vm1540_vm1, %v8345_v25, 0.0  ;;  %8370 = vtanh.f32 %v1254_v22  ;;  %v1265_v4 = vadd.f32 %v7489_v12, %v8956_v38  ;;  %v8347_v11 = vpop.eup %8346 }
 0x1a8   :  { %8372 = vtanh.f32 %v905_v26  ;;  %v9379_v58 = vadd.f32 %v1761_v24, %v9190_v34  ;;  %v1256_v23 = vpop.f32.mrf.mxu0  ;;  %v8349_v30 = vpop.eup %8348  ;;  %v937_v34 = vadd.f32 %v8956_v38, %v8947_v36  ;;  %v1017_v36 = vadd.f32 %v9395_v63, %v9054_v47 }
 0x1a9   :  { %8374 = vtanh.f32 %v1265_v4  ;;  %v1257_v32 = vadd.f32 %v8956_v38, %v1256_v23 }
 0x1aa   :  { %v8351_v57 = vpop.eup %8350  ;;  %8376 = vtanh.f32 %v921_v51  ;;  %v7492_v44 = vpop.f32.mrf.mxu0 }
 0x1ab   :  { %v8353_v0 = vpop.eup %8352  ;;  %v1782_v54 = vsel %vm1540_vm1, %v8351_v57, 0.0  ;;  %8378 = vtanh.f32 %v1257_v32  ;;  %v1278_v42 = vadd.f32 %v7492_v44, %v8956_v38  ;;  %v1145_v32 = vadd.f32 %v9395_v63, %v9226_v43 }
 0x1ac   :  { %v8355_v26 = vpop.eup %8354  ;;  %8380 = vtanh.f32 %v1129_v5  ;;  %v9389_v3 = vadd.f32 %v1782_v54, %v9197_v14  ;;  %v1269_v6 = vpop.f32.mrf.mxu0  ;;  %v1576_v44 = vsel %vm1540_vm1, %v8349_v30, 0.0 }
 0x1ad   :  { %v8357_v22 = vpop.eup %8356  ;;  %v1768_v25 = vsel %vm1540_vm1, %v8355_v26, 0.0  ;;  %8382 = vtanh.f32 %v1278_v42  ;;  %v1270_v51 = vadd.f32 %v9395_v63, %v1269_v6  ;;  %v9414_v26 = vsel %vm1540_vm1, %v8353_v0, 0.0 }
 0x1ae   :  { %v8359_v12 = vpop.eup %8358  ;;  %8384 = vtanh.f32 %v1001_v53  ;;  %v9401_v38 = vadd.f32 %v1768_v25, %v9202_v61  ;;  %v7493_v14 = vpop.f32.mrf.mxu0  ;;  %v1548_v61 = vsel %vm1540_vm1, %v8347_v11, 0.0  ;;  %v953_v0 = vadd.f32 %v9395_v63, %v8972_v45 }
 0x1af   :  { %v8361_v24 = vpop.eup %8360  ;;  %v1789_v4 = vsel %vm1540_vm1, %v8359_v12, 0.0  ;;  %8386 = vtanh.f32 %v1270_v51  ;;  %v1281_v5 = vadd.f32 %v9395_v63, %v7493_v14  ;;  %v1161_v45 = vadd.f32 %v9395_v63, %v9243_v16 }
 0x1b0   :  { %v8363_v23 = vpop.eup %8362  ;;  %8388 = vtanh.f32 %v937_v34  ;;  %v9408_v57 = vadd.f32 %v1789_v4, %v9207_v28  ;;  %v1272_v53 = vpop.f32.mrf.mxu0  ;;  %v9417_v34 = vsel %vm1540_vm1, %v8357_v22, 0.0  ;;  %v9420_v43 = vsel %vm1540_vm1, %v8361_v24, 0.0 }
 0x1b1   :  { %v8365_v47 = vpop.eup %8364  ;;  %8390 = vtanh.f32 %v1281_v5  ;;  %v1273_v54 = vadd.f32 %v9395_v63, %v1272_v53  ;;  %v1549_v11 = vsel %vm1540_vm1, %v8363_v23, 0.0  ;;  %v1033_v22 = vadd.f32 %v9395_v63, %v9077_v29 }
 0x1b2   :  { %v8367_v42 = vpop.eup %8366  ;;  %8392 = vtanh.f32 %v1017_v36  ;;  %v7496_v28 = vpop.f32.mrf.mxu0  ;;  %v1551_v24 = vsel %vm1540_vm1, %v8365_v47, 0.0  ;;  %v1550_v53 = vadd.f32 %v1549_v11, %v1548_v61 }
 0x1b3   :  { %v8369_v6 = vpop.eup %8368  ;;  %v1560_v30 = vsel %vm1540_vm1, %v8367_v42, 0.0  ;;  %8394 = vtanh.f32 %v1273_v54  ;;  %v1294_v25 = vadd.f32 %v9395_v63, %v7496_v28 }
 0x1b4   :  { %v8371_v51 = vpop.eup %8370  ;;  %8396 = vtanh.f32 %v1145_v32  ;;  %v1561_v12 = vadd.f32 %v1560_v30, %v9214_v52  ;;  %v1285_v36 = vpop.f32.mrf.mxu0  ;;  %v1577_v42 = vsel %vm1540_vm1, %v8369_v6, 0.0 }
 0x1b5   :  { %v9430_v14 = vpop.eup %8372  ;;  %v1546_v4 = vsel %vm1540_vm1, %v8371_v51, 0.0  ;;  %8398 = vtanh.f32 %v1294_v25  ;;  %v1286_v5 = vadd.f32 %v9395_v63, %v1285_v36  ;;  %v1552_v25 = vadd.f32 %v1551_v24, %v1550_v53 }
 0x1b6   :  { %v8375_v23 = vpop.eup %8374  ;;  %v1795_v54 = vmul.f32 0.25, %v1561_v12  ;;  %v1547_v29 = vadd.f32 %v1546_v4, %v9219_v39  ;;  %v7497_v32 = vpop.f32.mrf.mxu0  ;;  %v1049_v36 = vadd.f32 %v9395_v63, %v9100_v60 }
 0x1b7   :  { %v9438_v52 = vpop.eup %8376  ;;  %v1567_v47 = vsel %vm1540_vm1, %v8375_v23, 0.0  ;;  %8400 = vtanh.f32 %v1286_v5  ;;  %v1297_v28 = vadd.f32 %v9395_v63, %v7497_v32 }
 0x1b8   :  { %v8379_v30 = vpop.eup %8378  ;;  %8402 = vtanh.f32 %v1033_v22  ;;  %1835 = vst.msk [vmem:[#allocation2 + $0x14] sm:$0xff] %vm1540_vm1, %v1795_v54  ;;  %v1793_v61 = vmul.f32 0.25, %v1547_v29  ;;  %v1568_v16 = vadd.f32 %v1567_v47, %v9224_v40  ;;  %v1288_v11 = vpop.f32.mrf.mxu0  ;;  %v1578_v54 = vadd.f32 %v1577_v42, %v1576_v44 }
 0x1b9   :  { %v8381_v39 = vpop.eup %8380  ;;  %v1553_v51 = vsel %vm1540_vm1, %v8379_v30, 0.0  ;;  %8404 = vtanh.f32 %v1297_v28  ;;  %v1289_v6 = vadd.f32 %v9395_v63, %v1288_v11  ;;  %v1065_v44 = vadd.f32 %v9395_v63, %v9123_v55 }
 0x1ba   :  { %v8383_v12 = vpop.eup %8382  ;;  %8406 = vtanh.f32 %v1161_v45  ;;  %1829 = vst.msk [vmem:[#allocation2] sm:$0xff] %vm1540_vm1, %v1793_v61  ;;  %v1796_v22 = vmul.f32 0.25, %v1568_v16  ;;  %v1554_v24 = vadd.f32 %v1553_v51, %v1552_v25  ;;  %v7500_v4 = vpop.f32.mrf.mxu0  ;;  %v1579_v47 = vsel %vm1540_vm1, %v8381_v39, 0.0 }
 0x1bb   :  { %v8385_v5 = vpop.eup %8384  ;;  %v1588_v40 = vsel %vm1540_vm1, %v8383_v12, 0.0  ;;  %8408 = vtanh.f32 %v1289_v6  ;;  %v1310_v23 = vadd.f32 %v9395_v63, %v7500_v4  ;;  %v1580_v6 = vadd.f32 %v1579_v47, %v1578_v54 }
 0x1bc   :  { %v8387_v53 = vpop.eup %8386  ;;  %8410 = vtanh.f32 %v953_v0  ;;  %1837 = vst.msk [vmem:[#allocation2 + $0x20] sm:$0xff] %vm1540_vm1, %v1796_v22  ;;  %v1794_v29 = vmul.f32 0.25, %v1554_v24  ;;  %v1589_v60 = vadd.f32 %v1588_v40, %v9231_v37  ;;  %v1301_v45 = vpop.f32.mrf.mxu0  ;;  %v1605_v16 = vsel %vm1540_vm1, %v8385_v5, 0.0 }
 0x1bd   :  { %v9454_v32 = vpop.eup %8388  ;;  %v1574_v28 = vsel %vm1540_vm1, %v8387_v53, 0.0  ;;  %8412 = vtanh.f32 %v1310_v23  ;;  %v1302_v30 = vadd.f32 %v9395_v63, %v1301_v45  ;;  %v1177_v55 = vadd.f32 %v9395_v63, %v9267_v35 }
 0x1be   :  { %v8391_v25 = vpop.eup %8390  ;;  %8414 = vtanh.f32 %v1049_v36  ;;  %1831 = vst.msk [vmem:[#allocation2 + $0x8] sm:$0xf] %vm1830_vm3, %v1794_v29  ;;  %v1799_v37 = vmul.f32 0.25, %v1589_v60  ;;  %v1575_v0 = vadd.f32 %v1574_v28, %v9236_v31  ;;  %v7501_v42 = vpop.f32.mrf.mxu0  ;;  %v9473_v24 = vsel %vm1540_vm1, %v9430_v14, 0.0 }
 0x1bf   :  { %1834 = vst.msk [vmem:[#allocation2 + $0xc] sm:$0xf0] %vm1833_vm4, %v1794_v29  ;;  %v8393_v61 = vpop.eup %8392  ;;  %v1595_v11 = vsel %vm1540_vm1, %v8391_v25, 0.0  ;;  %8416 = vtanh.f32 %v1302_v30  ;;  %v1313_v39 = vadd.f32 %v9395_v63, %v7501_v42  ;;  %v1606_v23 = vadd.f32 %v1605_v16, %v9414_v26 }
 0x1c0   :  { %v8395_v51 = vpop.eup %8394  ;;  %1843 = vst.msk [vmem:[#allocation2 + $0x40] sm:$0xff] %vm1540_vm1, %v1799_v37  ;;  %v1797_v12 = vmul.f32 0.25, %v1575_v0  ;;  %v1596_v36 = vadd.f32 %v1595_v11, %v9241_v17  ;;  %v1304_v31 = vpop.f32.mrf.mxu0  ;;  %v1633_v54 = vsel %vm1540_vm1, %v8393_v61, 0.0  ;;  %v1081_v45 = vadd.f32 %v9395_v63, %v9154_v21 }
 0x1c1   :  { %v8397_v22 = vpop.eup %8396  ;;  %v1581_v4 = vsel %vm1540_vm1, %v8395_v51, 0.0  ;;  %8418 = vtanh.f32 %v1313_v39  ;;  %v1305_v5 = vadd.f32 %v9395_v63, %v1304_v31  ;;  %v1193_v61 = vadd.f32 %v9395_v63, %v9284_v48 }
 0x1c2   :  { %v8399_v40 = vpop.eup %8398  ;;  %8420 = vtanh.f32 %v1065_v44  ;;  %1838 = vst.msk [vmem:[#allocation2 + $0x28] sm:$0xf] %vm1830_vm3, %v1797_v12  ;;  %v1800_v17 = vmul.f32 0.25, %v1596_v36  ;;  %v1582_v35 = vadd.f32 %v1581_v4, %v1580_v6  ;;  %v7504_v53 = vpop.f32.mrf.mxu0  ;;  %v1607_v25 = vsel %vm1540_vm1, %v8397_v22, 0.0 }
 0x1c3   :  { %1840 = vst.msk [vmem:[#allocation2 + $0x2c] sm:$0xf0] %vm1833_vm4, %v1797_v12  ;;  %v1616_v14 = vsel %vm1540_vm1, %v8399_v40, 0.0  ;;  %8422 = vtanh.f32 %v1305_v5  ;;  %v1326_v29 = vadd.f32 %v9395_v63, %v7504_v53  ;;  %v1634_v6 = vadd.f32 %v1633_v54, %v9417_v34 }
 0x1c4   :  { %v8401_v60 = vpop.eup %8400  ;;  %8424 = vtanh.f32 %v1177_v55  ;;  %1844 = vst.msk [vmem:[#allocation2 + $0x48] sm:$0xf] %vm1830_vm3, %v1800_v17  ;;  %v1798_v26 = vmul.f32 0.25, %v1582_v35  ;;  %v1617_v47 = vadd.f32 %v1616_v14, %v9248_v50  ;;  %v1317_v28 = vpop.f32.mrf.mxu0  ;;  %v1608_v48 = vadd.f32 %v1607_v25, %v1606_v23 }
 0x1c5   :  { %1846 = vst.msk [vmem:[#allocation2 + $0x4c] sm:$0xf0] %vm1833_vm4, %v1800_v17  ;;  %v8403_v30 = vpop.eup %8402  ;;  %v1602_v44 = vsel %vm1540_vm1, %v8401_v60, 0.0  ;;  %8426 = vtanh.f32 %v1326_v29  ;;  %v1318_v37 = vadd.f32 %v9395_v63, %v1317_v28  ;;  %v1927_v0 = vld [vmem:[#allocation2 + $0x1] sm:$0xff] }
 0x1c6   :  { %v1928_v42 = vld [vmem:[#allocation2 + $0x11] sm:$0xff]  ;;  %v8405_v21 = vpop.eup %8404  ;;  %1841 = vst.msk [vmem:[#allocation2 + $0x34] sm:$0xff] %vm1540_vm1, %v1798_v26  ;;  %v1803_v16 = vmul.f32 0.25, %v1617_v47  ;;  %v1603_v50 = vadd.f32 %v1602_v44, %v9253_v59  ;;  %v7505_v11 = vpop.f32.mrf.mxu0  ;;  %v9507_v5 = vsel %vm1540_vm1, %v8403_v30, 0.0  ;;  %v9511_v17 = vld [vmem:[#allocation2 + $0x20] sm:$0xff] }
 0x1c7   :  { %v1943_v39 = vpack.c.bf16 %v1928_v42, %v1927_v0  ;;  %v8407_v51 = vpop.eup %8406  ;;  %v1623_v55 = vsel %vm1540_vm1, %v8405_v21, 0.0  ;;  %8428 = vtanh.f32 %v1318_v37  ;;  %v1329_v12 = vadd.f32 %v9395_v63, %v7505_v11  ;;  %v9498_v36 = vld [vmem:[#allocation2 + $0x10] sm:$0xff] }
 0x1c8   :  { %v8409_v31 = vpop.eup %8408  ;;  %8430 = vtanh.f32 %v1081_v45  ;;  %1850 = vst.msk [vmem:[#allocation2 + $0x68] sm:$0xf] %vm1830_vm3, %v1803_v16  ;;  %v1801_v59 = vmul.f32 0.25, %v1603_v50  ;;  %v1624_v22 = vadd.f32 %v1623_v55, %v9265_v33  ;;  %v1320_v4 = vpop.f32.mrf.mxu0  ;;  %v1635_v26 = vsel %vm1540_vm1, %v8407_v51, 0.0  ;;  %v9525_v30 = vld [vmem:[#allocation2 + $0x12] sm:$0xff] }
 0x1c9   :  { %1852 = vst.msk [vmem:[#allocation2 + $0x6c] sm:$0xf0] %vm1833_vm4, %v1803_v16  ;;  %7524 = vmatprep.mubr.msk.bf16.mxu1 %vm1540_vm1, %v1943_v39  ;;  %v9504_v34 = vpop.eup %8410  ;;  %v1609_v40 = vsel %vm1540_vm1, %v8409_v31, 0.0  ;;  %8432 = vtanh.f32 %v1329_v12  ;;  %v1321_v23 = vadd.f32 %v9395_v63, %v1320_v4  ;;  %v9513_v35 = vld [vmem:[#allocation2 + $0x22] sm:$0xff]  ;;  %11588 = vst [vmem:[#allocation11_spill] sm:$0xff] %v9525_v30  ;;  %v9527_v25 = vld [vmem:[#allocation2 + $0x13] sm:$0xff]  ;;  %v1241_v21 = vadd.f32 %v9395_v63, %v9356_v18 }
 0x1ca   :  { %v8413_v53 = vpop.eup %8412  ;;  %8434 = vtanh.f32 %v1193_v61  ;;  %1847 = vst.msk [vmem:[#allocation2 + $0x54] sm:$0xff] %vm1540_vm1, %v1801_v59  ;;  %v1804_v33 = vmul.f32 0.25, %v1624_v22  ;;  %v1610_v54 = vadd.f32 %v1609_v40, %v1608_v48  ;;  %v7508_v14 = vpop.f32.mrf.mxu0  ;;  %v9516_v29 = vld [vmem:[#allocation2 + $0x23] sm:$0xff]  ;;  %11589 = vst [vmem:[#allocation12_spill] sm:$0xff] %v9527_v25  ;;  %v1636_v40 = vadd.f32 %v1635_v26, %v1634_v6  ;;  %v11590_v6 = vld [vmem:[#allocation8_spill] sm:$0xff] }
 0x1cb   :  { %11587 = vst [vmem:[#allocation10_spill] sm:$0xff] %v9516_v29  ;;  %v9520_v45 = vpop.eup %8414  ;;  %v1644_v47 = vsel %vm1540_vm1, %v8413_v53, 0.0  ;;  %8436 = vtanh.f32 %v1321_v23  ;;  %v1342_v28 = vadd.f32 %v9395_v63, %v7508_v14  ;;  %v1929_v11 = vld [vmem:[#allocation2 + $0x21] sm:$0xff] }
 0x1cc   :  { %v8417_v44 = vpop.eup %8416  ;;  %1853 = vst.msk [vmem:[#allocation2 + $0x74] sm:$0xff] %vm1540_vm1, %v1804_v33  ;;  %v1802_v37 = vmul.f32 0.25, %v1610_v54  ;;  %v1645_v0 = vadd.f32 %v1644_v47, %v9272_v20  ;;  %v1333_v42 = vpop.f32.mrf.mxu0  ;;  %v2103_v20 = vsel %vm1977_vm2, %v9258_v15, 0  ;;  %v9554_v53 = vld [vmem:[#allocation2 + $0x41] sm:$0xff]  ;;  %v1209_v54 = vadd.f32 %v9395_v63, %v9308_v19 }
 0x1cd   :  { %v1630_v16 = vsel %vm1540_vm1, %v8417_v44, 0.0  ;;  %8438 = vtanh.f32 %v1342_v28  ;;  %v1334_v50 = vadd.f32 %v9395_v63, %v1333_v42  ;;  %v9537_v39 = vld [vmem:[#allocation2 + $0x31] sm:$0xff]  ;;  %v9574_v42 = vld [vmem:[#allocation2 + $0x40] sm:$0xff] }
 0x1ce   :  { %v9539_v51 = vld [vmem:[#allocation2 + $0x30] sm:$0xff]  ;;  %v8419_v55 = vpop.eup %8418  ;;  %1849 = vst.msk [vmem:[#allocation2 + $0x60] sm:$0xff] %vm1540_vm1, %v1802_v37  ;;  %v1807_v12 = vmul.f32 0.25, %v1645_v0  ;;  %v1631_v31 = vadd.f32 %v1630_v16, %v9277_v8  ;;  %v7509_v48 = vpop.f32.mrf.mxu0  ;;  %v1944_v59 = vpack.c.bf16 %v9537_v39, %v1929_v11  ;;  %v9559_v8 = vld [vmem:[%s11548_s3 + $0x8] sm:$0xf] }
 0x1cf   :  { %v9548_v22 = vpack.c.bf16 %v9539_v51, %v9511_v17  ;;  %v9550_v4 = vpop.eup %8420  ;;  %v1651_v23 = vsel %vm1540_vm1, %v8419_v55, 0.0  ;;  %8440 = vtanh.f32 %v1334_v50  ;;  %v1345_v15 = vadd.f32 %v9395_v63, %v7509_v48  ;;  %v11591_v50 = vld [vmem:[#allocation9_spill] sm:$0xff] }
 0x1d0   :  { %v8423_v33 = vpop.eup %8422  ;;  %1859 = vst.msk [vmem:[#allocation2 + $0x94] sm:$0xff] %vm1540_vm1, %v1807_v12  ;;  %v1805_v14 = vmul.f32 0.25, %v1631_v31  ;;  %v1652_v26 = vadd.f32 %v1651_v23, %v11590_v6  ;;  %v1336_v47 = vpop.f32.mrf.mxu0  ;;  %7525 = vmatmul.mubr.msk.bf16.vlgmr.msra.gmra.mxu1 %vm1540_vm1, %v1944_v59  ;;  %v3913_v11 = vsel %vm1977_vm2, %v11591_v50, 0 }
 0x1d1   :  { %7704 = vmatprep.mubr.msk.bf16.mxu0 %vm1540_vm1, %v9548_v22  ;;  %v8425_v44 = vpop.eup %8424  ;;  %v1637_v37 = vsel %vm1540_vm1, %v8423_v33, 0.0  ;;  %8442 = vtanh.f32 %v1345_v15  ;;  %v1337_v19 = vadd.f32 %v9395_v63, %v1336_v47  ;;  %v9572_v0 = vld [vmem:[#allocation2 + $0x51] sm:$0xff]  ;;  %7541 = vmatpush3.bf16.msra.mxu1 %v2103_v20  ;;  %v1662_v20 = vadd.f32 %v9507_v5, %v9420_v43 }
 0x1d2   :  { %v9576_v16 = vld [vmem:[#allocation2 + $0x50] sm:$0xff]  ;;  %v8427_v55 = vpop.eup %8426  ;;  %1855 = vst.msk [vmem:[#allocation2 + $0x80] sm:$0xff] %vm1540_vm1, %v1805_v14  ;;  %v1808_v12 = vmul.f32 0.25, %v1652_v26  ;;  %v1638_v31 = vadd.f32 %v1637_v37, %v1636_v40  ;;  %v7512_v48 = vpop.f32.mrf.mxu0  ;;  %v1945_v59 = vpack.c.bf16 %v9572_v0, %v9554_v53  ;;  %8082 = vmatprep.subr.msk.bf16.mxu1 %vm1977_vm2, %v9559_v8  ;;  %v9596_v40 = vld [vmem:[%s11548_s3 + $0x38] sm:$0xf]  ;;  %v1663_v6 = vsel %vm1540_vm1, %v8425_v44, 0.0 }
 0x1d3   :  { %v9585_v23 = vpack.c.bf16 %v9576_v16, %v9574_v42  ;;  %v1672_v15 = vsel %vm1540_vm1, %v8427_v55, 0.0  ;;  %8444 = vtanh.f32 %v1337_v19  ;;  %v1358_v33 = vadd.f32 %v9395_v63, %v7512_v48  ;;  %v9604_v5 = vld [vmem:[#allocation2 + $0x71] sm:$0xff] }
 0x1d4   :  { %v8429_v14 = vpop.eup %8428  ;;  %8446 = vtanh.f32 %v1209_v54  ;;  %1861 = vst.msk [vmem:[#allocation2 + $0xa0] sm:$0xff] %vm1540_vm1, %v1808_v12  ;;  %v1806_v26 = vmul.f32 0.25, %v1638_v31  ;;  %v1673_v47 = vadd.f32 %v1672_v15, %v9296_v7  ;;  %v1349_v43 = vpop.f32.mrf.mxu0  ;;  %7528 = vmatprep.mubr.msk.bf16.mxu1 %vm1540_vm1, %v1945_v59  ;;  %v1689_v19 = vsel %vm1540_vm1, %v9520_v45, 0.0  ;;  %v9616_v55 = vld [vmem:[#allocation2 + $0x70] sm:$0xff] }
 0x1d5   :  { %7705 = vmatmul.mubr.msk.bf16.vlgmr.msra.gmra.mxu0 %vm1540_vm1, %v9585_v23  ;;  %v9606_v37 = vpop.eup %8430  ;;  %v1658_v54 = vsel %vm1540_vm1, %v8429_v14, 0.0  ;;  %8448 = vtanh.f32 %v1358_v33  ;;  %v1350_v44 = vadd.f32 %v9395_v63, %v1349_v43  ;;  %v9612_v50 = vld [vmem:[#allocation2 + $0x61] sm:$0xff]  ;;  %v1664_v33 = vadd.f32 %v1663_v6, %v1662_v20 }
 0x1d6   :  { %v9614_v7 = vld [vmem:[#allocation2 + $0x60] sm:$0xff]  ;;  %7739 = vmatpush3.bf16.msra.mxu0 %v3913_v11  ;;  %v8433_v12 = vpop.eup %8432  ;;  %1856 = vst.msk [vmem:[#allocation2 + $0x88] sm:$0xf] %vm1830_vm3, %v1806_v26  ;;  %v1811_v31 = vmul.f32 0.25, %v1673_v47  ;;  %v1659_v45 = vadd.f32 %v1658_v54, %v9301_v10  ;;  %v7513_v48 = vpop.f32.mrf.mxu0  ;;  %v1946_v59 = vpack.c.bf16 %v9604_v5, %v9612_v50  ;;  %v1225_v10 = vadd.f32 %v9395_v63, %v9329_v46 }
 0x1d7   :  { %1858 = vst.msk [vmem:[#allocation2 + $0x8c] sm:$0xf0] %vm1833_vm4, %v1806_v26  ;;  %v9625_v15 = vpack.c.bf16 %v9616_v55, %v9614_v7  ;;  %8094 = vmatprep.subr.msk.bf16.mxu0 %vm1977_vm2, %v9596_v40  ;;  %v8435_v11 = vpop.eup %8434  ;;  %v1679_v14 = vsel %vm1540_vm1, %v8433_v12, 0.0  ;;  %8450 = vtanh.f32 %v1350_v44  ;;  %v1361_v26 = vadd.f32 %v9395_v63, %v7513_v48 }
 0x1d8   :  { %v8437_v47 = vpop.eup %8436  ;;  %1867 = vst.msk [vmem:[#allocation2 + $0xc0] sm:$0xff] %vm1540_vm1, %v1811_v31  ;;  %v1809_v43 = vmul.f32 0.25, %v1659_v45  ;;  %v1680_v54 = vadd.f32 %v1679_v14, %v9306_v1  ;;  %v1352_v61 = vpop.f32.mrf.mxu0  ;;  %7529 = vmatmul.mubr.msk.bf16.gmra.mxu1 %vm1540_vm1, %v1946_v59  ;;  %v1690_v6 = vadd.f32 %v1689_v19, %v9473_v24  ;;  %v11592_v1 = vld [vmem:[#allocation7_spill] sm:$0xff] }
 0x1d9   :  { %7708 = vmatprep.mubr.msk.bf16.mxu0 %vm1540_vm1, %v9625_v15  ;;  %v1665_v44 = vsel %vm1540_vm1, %v8437_v47, 0.0  ;;  %8452 = vtanh.f32 %v1361_v26  ;;  %v1353_v46 = vadd.f32 %v9395_v63, %v1352_v61  ;;  %v9643_v12 = vld [vmem:[#allocation2 + $0x80] sm:$0xff]  ;;  %v1097_v45 = vadd.f32 %v9395_v63, %v11592_v1 }
 0x1da   :  { %v8439_v31 = vpop.eup %8438  ;;  %1862 = vst.msk [vmem:[#allocation2 + $0xa8] sm:$0xf] %vm1830_vm3, %v1809_v43  ;;  %v1812_v48 = vmul.f32 0.25, %v1680_v54  ;;  %v1666_v59 = vadd.f32 %v1665_v44, %v1664_v33  ;;  %v7516_v14 = vpop.f32.mrf.mxu0 }
 0x1db   :  { %1864 = vst.msk [vmem:[#allocation2 + $0xac] sm:$0xf0] %vm1833_vm4, %v1809_v43  ;;  %v1700_v19 = vsel %vm1540_vm1, %v8439_v31, 0.0  ;;  %8454 = vtanh.f32 %v1353_v46  ;;  %v1374_v61 = vadd.f32 %v9395_v63, %v7516_v14  ;;  %v1691_v46 = vsel %vm1540_vm1, %v8435_v11, 0.0 }
 0x1dc   :  { %v8441_v47 = vpop.eup %8440  ;;  %8456 = vtanh.f32 %v1225_v10  ;;  %1868 = vst.msk [vmem:[#allocation2 + $0xc8] sm:$0xf] %vm1830_vm3, %v1812_v48  ;;  %v1810_v43 = vmul.f32 0.25, %v1666_v59  ;;  %v1701_v33 = vadd.f32 %v1700_v19, %v9313_v9  ;;  %v1365_v54 = vpop.f32.mrf.mxu0 }
 0x1dd   :  { %1870 = vst.msk [vmem:[#allocation2 + $0xcc] sm:$0xf0] %vm1833_vm4, %v1812_v48  ;;  %v1686_v31 = vsel %vm1540_vm1, %v8441_v47, 0.0  ;;  %8458 = vtanh.f32 %v1374_v61  ;;  %v1366_v1 = vadd.f32 %v9395_v63, %v1365_v54  ;;  %v1692_v54 = vadd.f32 %v1691_v46, %v1690_v6  ;;  %v9683_v46 = vld [vmem:[#allocation2 + $0x62] sm:$0xff] }
 0x1de   :  { %v3537_v14 = vld [vmem:[#allocation2 + $0x90] sm:$0xff]  ;;  %v8443_v10 = vpop.eup %8442  ;;  %1865 = vst.msk [vmem:[#allocation2 + $0xb4] sm:$0xff] %vm1540_vm1, %v1810_v43  ;;  %v1815_v48 = vmul.f32 0.25, %v1701_v33  ;;  %v1687_v9 = vadd.f32 %v1686_v31, %v9318_v49  ;;  %v7517_v59 = vpop.f32.mrf.mxu0  ;;  %11594 = vst [vmem:[#allocation9_spill] sm:$0xff] %v9683_v46 }
 0x1df   :  { %v9668_v19 = vpack.c.bf16 %v3537_v14, %v9643_v12  ;;  %v1707_v11 = vsel %vm1540_vm1, %v8443_v10, 0.0  ;;  %8460 = vtanh.f32 %v1366_v1  ;;  %v1377_v61 = vadd.f32 %v9395_v63, %v7517_v59  ;;  %v9677_v33 = vld [vmem:[#allocation2 + $0x32] sm:$0xff]  ;;  %v9685_v14 = vld [vmem:[#allocation2 + $0x82] sm:$0xff] }
 0x1e0   :  { %v8445_v47 = vpop.eup %8444  ;;  %8462 = vtanh.f32 %v1097_v45  ;;  %1874 = vst.msk [vmem:[#allocation2 + $0xe8] sm:$0xf] %vm1830_vm3, %v1815_v48  ;;  %v1813_v18 = vmul.f32 0.25, %v1687_v9  ;;  %v1708_v43 = vadd.f32 %v1707_v11, %v9327_v2  ;;  %v1368_v49 = vpop.f32.mrf.mxu0  ;;  %11593 = vst [vmem:[#allocation8_spill] sm:$0xff] %v9677_v33  ;;  %v1716_v1 = vsel %vm1540_vm1, %v9438_v52, 0.0  ;;  %v9690_v52 = vld [vmem:[#allocation2 + $0x42] sm:$0xff] }
 0x1e1   :  { %1876 = vst.msk [vmem:[#allocation2 + $0xec] sm:$0xf0] %vm1833_vm4, %v1815_v48  ;;  %7709 = vmatmul.mubr.msk.bf16.gmra.mxu0 %vm1540_vm1, %v9668_v19  ;;  %v8447_v31 = vpop.eup %8446  ;;  %v1693_v45 = vsel %vm1540_vm1, %v8445_v47, 0.0  ;;  %8464 = vtanh.f32 %v1377_v61  ;;  %v1369_v6 = vadd.f32 %v9395_v63, %v1368_v49  ;;  %11595 = vst [vmem:[#allocation7_spill] sm:$0xff] %v9685_v14  ;;  %v1717_v10 = vsel %vm1540_vm1, %v9550_v4, 0.0  ;;  %v9694_v47 = vld [vmem:[#allocation2 + $0x52] sm:$0xff] }
 0x1e2   :  { %v8449_v2 = vpop.eup %8448  ;;  %8466 = vtanh.f32 %v1241_v21  ;;  %1871 = vst.msk [vmem:[#allocation2 + $0xd4] sm:$0xff] %vm1540_vm1, %v1813_v18  ;;  %v1816_v48 = vmul.f32 0.25, %v1708_v43  ;;  %v1694_v9 = vadd.f32 %v1693_v45, %v1692_v54  ;;  %v7520_v59 = vpop.f32.mrf.mxu0  ;;  %11596 = vst [vmem:[#allocation13_spill] sm:$0xff] %v9690_v52  ;;  %v9696_v49 = vld [vmem:[#allocation2 + $0x72] sm:$0xff]  ;;  %v1718_v26 = vadd.f32 %v1717_v10, %v1716_v1 }
 0x1e3   :  { %v1728_v11 = vsel %vm1540_vm1, %v8449_v2, 0.0  ;;  %8468 = vtanh.f32 %v1369_v6  ;;  %v1390_v61 = vadd.f32 %v9395_v63, %v7520_v59  ;;  %11597 = vst [vmem:[#allocation14_spill] sm:$0xff] %v9694_v47  ;;  %11598 = vst [vmem:[#allocation15_spill] sm:$0xff] %v9696_v49  ;;  %v1719_v2 = vsel %vm1540_vm1, %v8447_v31, 0.0 }
 0x1e4   :  { %v8451_v21 = vpop.eup %8450  ;;  %1877 = vst.msk [vmem:[#allocation2 + $0xf4] sm:$0xff] %vm1540_vm1, %v1816_v48  ;;  %v1814_v18 = vmul.f32 0.25, %v1694_v9  ;;  %v1729_v54 = vadd.f32 %v1728_v11, %v9338_v13  ;;  %v1381_v43 = vpop.f32.mrf.mxu0  ;;  %v1720_v31 = vadd.f32 %v1719_v2, %v1718_v26 }
 0x1e5   :  { %v1714_v59 = vsel %vm1540_vm1, %v8451_v21, 0.0  ;;  %8470 = vtanh.f32 %v1390_v61  ;;  %v1382_v4 = vadd.f32 %v9395_v63, %v1381_v43 }
 0x1e6   :  { %v8453_v44 = vpop.eup %8452  ;;  %1873 = vst.msk [vmem:[#allocation2 + $0xe0] sm:$0xff] %vm1540_vm1, %v1814_v18  ;;  %v1819_v48 = vmul.f32 0.25, %v1729_v54  ;;  %v1715_v13 = vadd.f32 %v1714_v59, %v9345_v41  ;;  %v7521_v9 = vpop.f32.mrf.mxu0  ;;  %v1935_v18 = vld [vmem:[#allocation2 + $0xc1] sm:$0xff]  ;;  %v9723_v59 = vld [vmem:[#allocation2 + $0x31] sm:$0xff] }
 0x1e7   :  { %v1735_v11 = vsel %vm1540_vm1, %v8453_v44, 0.0  ;;  %8472 = vtanh.f32 %v1382_v4  ;;  %v1393_v6 = vadd.f32 %v9395_v63, %v7521_v9  ;;  %v1745_v4 = vsel %vm1540_vm1, %v9606_v37, 0.0 }
 0x1e8   :  { %v8455_v45 = vpop.eup %8454  ;;  %1883 = vst.msk [vmem:[#allocation2 + $0x114] sm:$0xff] %vm1540_vm1, %v1819_v48  ;;  %v1817_v61 = vmul.f32 0.25, %v1715_v13  ;;  %v1736_v21 = vadd.f32 %v1735_v11, %v9354_v56  ;;  %v1384_v43 = vpop.f32.mrf.mxu0  ;;  %v9725_v48 = vld [vmem:[#allocation2 + $0x51] sm:$0xff] }
 0x1e9   :  { %v8457_v1 = vpop.eup %8456  ;;  %v1721_v10 = vsel %vm1540_vm1, %v8455_v45, 0.0  ;;  %8474 = vtanh.f32 %v1393_v6  ;;  %v1385_v41 = vadd.f32 %v9395_v63, %v1384_v43  ;;  %v9717_v54 = vld [vmem:[#allocation2 + $0xd1] sm:$0xff]  ;;  %11600 = vst [vmem:[#allocation17_spill] sm:$0xff] %v9725_v48  ;;  %v1744_v6 = vsel %vm1540_vm1, %v9454_v32, 0.0 }
 0x1ea   :  { %11599 = vst [vmem:[#allocation16_spill] sm:$0xff] %v9717_v54  ;;  %v8459_v44 = vpop.eup %8458  ;;  %1879 = vst.msk [vmem:[#allocation2 + $0x100] sm:$0xff] %vm1540_vm1, %v1817_v61  ;;  %v1820_v26 = vmul.f32 0.25, %v1736_v21  ;;  %v1722_v2 = vadd.f32 %v1721_v10, %v1720_v31  ;;  %v1947_v56 = vpack.c.bf16 %v9717_v54, %v1935_v18  ;;  %v1747_v13 = vsel %vm1540_vm1, %v8457_v1, 0.0  ;;  %v9736_v31 = vld [vmem:[#allocation2 + $0x21] sm:$0xff]  ;;  %v9765_v24 = vld [vmem:[#allocation2 + $0xd0] sm:$0xff] }
 0x1eb   :  { %v1756_v45 = vsel %vm1540_vm1, %v8459_v44, 0.0  ;;  %8476 = vtanh.f32 %v1385_v41  ;;  %v9734_v11 = vld [vmem:[#allocation2 + $0xf1] sm:$0xff]  ;;  %v9738_v61 = vld [vmem:[#allocation2 + $0x41] sm:$0xff]  ;;  %v1746_v43 = vadd.f32 %v1745_v4, %v1744_v6 }
 0x1ec   :  { %v8461_v63 = vpop.eup %8460  ;;  %1885 = vst.msk [vmem:[#allocation2 + $0x120] sm:$0xff] %vm1540_vm1, %v1820_v26  ;;  %v1818_v37 = vmul.f32 0.25, %v1722_v2  ;;  %v1757_v9 = vadd.f32 %v1756_v45, %v9365_v27  ;;  %7532 = vmatprep.mubr.msk.bf16.mxu1 %vm1540_vm1, %v1947_v56  ;;  %v9745_v41 = vld [vmem:[#allocation2 + $0xf0] sm:$0xff] }
 0x1ed   :  { %v8463_v21 = vpop.eup %8462  ;;  %v1742_v10 = vsel %vm1540_vm1, %v8461_v63, 0.0  ;;  %v9741_v32 = vld [vmem:[#allocation2 + $0xe1] sm:$0xff]  ;;  %v1748_v18 = vadd.f32 %v1747_v13, %v1746_v43  ;;  %v9774_v60 = vld [vmem:[#allocation2 + $0xd3] sm:$0xff] }
 0x1ee   :  { %11601 = vst [vmem:[#allocation18_spill] sm:$0xff] %v9741_v32  ;;  %v9743_v1 = vld [vmem:[#allocation2 + $0xe0] sm:$0xff]  ;;  %v8465_v44 = vpop.eup %8464  ;;  %1880 = vst.msk [vmem:[#allocation2 + $0x108] sm:$0xf] %vm1830_vm3, %v1818_v37  ;;  %v1823_v4 = vmul.f32 0.25, %v1757_v9  ;;  %v1743_v26 = vadd.f32 %v1742_v10, %v9372_v62  ;;  %v1948_v2 = vpack.c.bf16 %v9734_v11, %v9741_v32  ;;  %v9772_v10 = vld [vmem:[#allocation2 + $0xd2] sm:$0xff] }
 0x1ef   :  { %1882 = vst.msk [vmem:[#allocation2 + $0x10c] sm:$0xf0] %vm1833_vm4, %v1818_v37  ;;  %v9758_v56 = vpack.c.bf16 %v9745_v41, %v9743_v1  ;;  %v9760_v45 = vld [vmem:[#allocation2 + $0xe2] sm:$0xff]  ;;  %v8467_v6 = vpop.eup %8466  ;;  %v1763_v27 = vsel %vm1540_vm1, %v8465_v44, 0.0  ;;  %11604 = vst [vmem:[#allocation21_spill] sm:$0xff] %v9772_v10 }
 0x1f0   :  { %11602 = vst [vmem:[#allocation19_spill] sm:$0xff] %v9760_v45  ;;  %v9762_v63 = vld [vmem:[#allocation2 + $0xe3] sm:$0xff]  ;;  %v8469_v37 = vpop.eup %8468  ;;  %1891 = vst.msk [vmem:[#allocation2 + $0x140] sm:$0xff] %vm1540_vm1, %v1823_v4  ;;  %v1821_v62 = vmul.f32 0.25, %v1743_v26  ;;  %v1764_v9 = vadd.f32 %v1763_v27, %v9379_v58  ;;  %7533 = vmatmul.mubr.msk.bf16.gmra.mxu1 %vm1540_vm1, %v1948_v2  ;;  %v1773_v2 = vsel %vm1540_vm1, %v8463_v21, 0.0  ;;  %v1772_v58 = vsel %vm1540_vm1, %v9504_v34, 0.0 }
 0x1f1   :  { %11603 = vst [vmem:[#allocation20_spill] sm:$0xff] %v9762_v63  ;;  %7712 = vmatprep.mubr.msk.bf16.mxu0 %vm1540_vm1, %v9758_v56  ;;  %11605 = vst [vmem:[#allocation22_spill] sm:$0xff] %v9774_v60  ;;  %v1749_v44 = vsel %vm1540_vm1, %v8469_v37, 0.0  ;;  %v9781_v4 = vld [vmem:[#allocation2 + $0x100] sm:$0xff]  ;;  %v1774_v54 = vadd.f32 %v1773_v2, %v1772_v58  ;;  %v9822_v2 = vld [vmem:[#allocation2 + $0xf2] sm:$0xff] }
 0x1f2   :  { %v8471_v26 = vpop.eup %8470  ;;  %1886 = vst.msk [vmem:[#allocation2 + $0x128] sm:$0xf] %vm1830_vm3, %v1821_v62  ;;  %v1824_v13 = vmul.f32 0.25, %v1764_v9  ;;  %v1750_v20 = vadd.f32 %v1749_v44, %v1748_v18  ;;  %11607 = vst [vmem:[#allocation24_spill] sm:$0xff] %v9822_v2 }
 0x1f3   :  { %1888 = vst.msk [vmem:[#allocation2 + $0x12c] sm:$0xf0] %vm1833_vm4, %v1821_v62  ;;  %v1784_v43 = vsel %vm1540_vm1, %v8471_v26, 0.0  ;;  %v1775_v62 = vsel %vm1540_vm1, %v8467_v6, 0.0 }
 0x1f4   :  { %v8473_v28 = vpop.eup %8472  ;;  %1892 = vst.msk [vmem:[#allocation2 + $0x148] sm:$0xf] %vm1830_vm3, %v1824_v13  ;;  %v1822_v21 = vmul.f32 0.25, %v1750_v20  ;;  %v1785_v27 = vadd.f32 %v1784_v43, %v9389_v3  ;;  %v1776_v43 = vadd.f32 %v1775_v62, %v1774_v54 }
 0x1f5   :  { %1894 = vst.msk [vmem:[#allocation2 + $0x14c] sm:$0xf0] %vm1833_vm4, %v1824_v13  ;;  %v1770_v18 = vsel %vm1540_vm1, %v8473_v28, 0.0  ;;  %v1939_v9 = vld [vmem:[#allocation2 + $0x101] sm:$0xff] }
 0x1f6   :  { %v1940_v44 = vld [vmem:[#allocation2 + $0x111] sm:$0xff]  ;;  %v8475_v26 = vpop.eup %8474  ;;  %1889 = vst.msk [vmem:[#allocation2 + $0x134] sm:$0xff] %vm1540_vm1, %v1822_v21  ;;  %v1827_v34 = vmul.f32 0.25, %v1785_v27  ;;  %v1771_v32 = vadd.f32 %v1770_v18, %v9401_v38  ;;  %v9808_v3 = vld [vmem:[#allocation2 + $0x102] sm:$0xff]  ;;  %v9812_v28 = vpack.c.bf16 %v1939_v9, %v9734_v11 }
 0x1f7   :  { %v9800_v37 = vld [vmem:[#allocation2 + $0x110] sm:$0xff]  ;;  %v1949_v48 = vpack.c.bf16 %v1940_v44, %v1939_v9  ;;  %11606 = vst [vmem:[#allocation23_spill] sm:$0xff] %v9808_v3  ;;  %v1791_v6 = vsel %vm1540_vm1, %v8475_v26, 0.0  ;;  %v9820_v27 = vld [vmem:[#allocation2 + $0x120] sm:$0xff] }
 0x1f8   :  { %v9806_v20 = vpack.c.bf16 %v9800_v37, %v9781_v4  ;;  %v8477_v13 = vpop.eup %8476  ;;  %1898 = vst.msk [vmem:[#allocation2 + $0x168] sm:$0xf] %vm1830_vm3, %v1827_v34  ;;  %v1825_v58 = vmul.f32 0.25, %v1771_v32  ;;  %v1792_v38 = vadd.f32 %v1791_v6, %v9408_v57  ;;  %v9825_v54 = vld [vmem:[#allocation2 + $0x112] sm:$0xff] }
 0x1f9   :  { %1900 = vst.msk [vmem:[#allocation2 + $0x16c] sm:$0xf0] %vm1833_vm4, %v1827_v34  ;;  %7536 = vmatprep.mubr.msk.bf16.mxu1 %vm1540_vm1, %v1949_v48  ;;  %v1777_v11 = vsel %vm1540_vm1, %v8477_v13, 0.0  ;;  %v1941_v21 = vld [vmem:[#allocation2 + $0x121] sm:$0xff]  ;;  %11608 = vst [vmem:[#allocation25_spill] sm:$0xff] %v9825_v54  ;;  %v3869_v57 = vld [vmem:[#allocation2 + $0x92] sm:$0xff] }
 0x1fa   :  { %7713 = vmatmul.mubr.msk.bf16.gmra.mxu0 %vm1540_vm1, %v9806_v20  ;;  %v9827_v62 = vld [vmem:[#allocation2 + $0x122] sm:$0xff]  ;;  %1895 = vst.msk [vmem:[#allocation2 + $0x154] sm:$0xff] %vm1540_vm1, %v1825_v58  ;;  %v1828_v48 = vmul.f32 0.25, %v1792_v38  ;;  %v1778_v18 = vadd.f32 %v1777_v11, %v1776_v43  ;;  %v9834_v9 = vpack.c.bf16 %v1941_v21, %v1940_v44 }
 0x1fb   :  { %11609 = vst [vmem:[#allocation26_spill] sm:$0xff] %v9827_v62  ;;  %v1902_v43 = vld [vmem:[#allocation2] sm:$0xff] }
 0x1fc   :  { %1901 = vst.msk [vmem:[#allocation2 + $0x174] sm:$0xff] %vm1540_vm1, %v1828_v48  ;;  %v1826_v34 = vmul.f32 0.25, %v1778_v18  ;;  %v9851_v38 = vld [vmem:[#allocation2 + $0x140] sm:$0xff]  ;;  %v1918_v11 = vpack.c.bf16 %v9498_v36, %v1902_v43  ;;  %v3878_v43 = vpack.c.bf16 %v9677_v33, %v9513_v35  ;;  %v9905_v18 = vpack.c.bf16 %v3869_v57, %v9685_v14  ;;  %v6918_v14 = vld [vmem:[%s11548_s3 + $0x48] sm:$0xf] }
 0x1fd   :  { %v9839_v6 = vld [vmem:[#allocation2 + $0x131] sm:$0xff]  ;;  %v9854_v48 = vld [vmem:[#allocation2 + $0x142] sm:$0xff] }
 0x1fe   :  { %v9841_v13 = vld [vmem:[#allocation2 + $0x130] sm:$0xff]  ;;  %1897 = vst.msk [vmem:[#allocation2 + $0x160] sm:$0xff] %vm1540_vm1, %v1826_v34  ;;  %v1950_v58 = vpack.c.bf16 %v9839_v6, %v1941_v21  ;;  %11611 = vst [vmem:[#allocation28_spill] sm:$0xff] %v9854_v48  ;;  %v6783_v21 = vld [vmem:[%s11548_s3 + $0xc] sm:$0xf] }
 0x1ff   :  { %v9843_v32 = vld [vmem:[#allocation2 + $0x132] sm:$0xff]  ;;  %v9849_v44 = vpack.c.bf16 %v9841_v13, %v9820_v27 }
 0x200   :  { %11610 = vst [vmem:[#allocation27_spill] sm:$0xff] %v9843_v32  ;;  %7537 = vmatmul.mubr.msk.bf16.gmra.mxu1 %vm1540_vm1, %v1950_v58  ;;  %v2253_v58 = vsel %vm1977_vm2, %v9559_v8, 0  ;;  %v4245_v8 = vsel %vm1977_vm2, %v9596_v40, 0  ;;  %v9922_v57 = vpack.c.bf16 %v9843_v32, %v9827_v62  ;;  %v4194_v32 = vld [vmem:[#allocation2 + $0x24] sm:$0xff] }
 0x201   :  { %7716 = vmatprep.mubr.msk.bf16.mxu0 %vm1540_vm1, %v9849_v44  ;;  %7542 = vmatprep.mubr.msk.bf16.mxu1 %vm1540_vm1, %v1918_v11  ;;  %v3545_v34 = vld [vmem:[#allocation2 + $0x150] sm:$0xff]  ;;  %v9883_v11 = vpack.c.bf16 %v9694_v47, %v9690_v52 }
 0x202   :  { %v9865_v26 = vpack.c.bf16 %v3545_v34, %v9851_v38  ;;  %v9890_v34 = vpack.c.bf16 %v9696_v49, %v9683_v46  ;;  %v3882_v49 = vpack.c.bf16 %v9822_v2, %v9760_v45  ;;  %v4195_v2 = vld [vmem:[#allocation2 + $0x34] sm:$0xff]  ;;  %v6792_v45 = vld [vmem:[%s11548_s3 + $0x10] sm:$0xf] }
 0x203   :  { %v9935_v62 = vpack.c.bf16 %v4195_v2, %v4194_v32  ;;  %v4196_v2 = vld [vmem:[#allocation2 + $0x44] sm:$0xff]  ;;  %v2585_v46 = vsel %vm1977_vm2, %v6792_v45, 0 }
 0x204   :  { %7717 = vmatmul.mubr.msk.bf16.gmra.mxu0 %vm1540_vm1, %v9865_v26 }
 0x205   :  { %7740 = vmatprep.mubr.msk.bf16.mxu0 %vm1540_vm1, %v3878_v43 }
 0x208   :  { %7543 = vmatmul.mubr.msk.bf16.vlgmr.msra.gmra.mxu1 %vm1540_vm1, %v9548_v22  ;;  %v6900_v22 = vld [vmem:[%s11548_s3 + $0x40] sm:$0xf] }
 0x209   :  { %7546 = vmatprep.mubr.msk.bf16.mxu1 %vm1540_vm1, %v9585_v23  ;;  %7559 = vmatpush3.bf16.msra.mxu1 %v2253_v58  ;;  %v1910_v58 = vld [vmem:[#allocation2 + $0xc0] sm:$0xff] }
 0x20a   :  { %8083 = vmatprep.subr.msk.bf16.mxu1 %vm1977_vm2, %v6783_v21  ;;  %v1922_v40 = vpack.c.bf16 %v9765_v24, %v1910_v58  ;;  %v2202_v58 = vld [vmem:[#allocation2 + $0x2] sm:$0xff] }
 0x20c   :  { %7741 = vmatmul.mubr.msk.bf16.vlgmr.msra.gmra.mxu0 %vm1540_vm1, %v9883_v11 }
 0x20d   :  { %7744 = vmatprep.mubr.msk.bf16.mxu0 %vm1540_vm1, %v9890_v34  ;;  %7775 = vmatpush3.bf16.msra.mxu0 %v4245_v8  ;;  %v9918_v8 = vpack.c.bf16 %v9825_v54, %v9808_v3  ;;  %v4197_v3 = vld [vmem:[#allocation2 + $0x54] sm:$0xff] }
 0x20e   :  { %8096 = vmatprep.subr.msk.bf16.mxu0 %vm1977_vm2, %v6900_v22  ;;  %v9948_v32 = vpack.c.bf16 %v4197_v3, %v4196_v2  ;;  %v2210_v3 = vld [vmem:[#allocation2 + $0xc2] sm:$0xff] }
 0x210   :  { %7547 = vmatmul.mubr.msk.bf16.gmra.mxu1 %vm1540_vm1, %v9625_v15 }
 0x211   :  { %7550 = vmatprep.mubr.msk.bf16.mxu1 %vm1540_vm1, %v1922_v40  ;;  %v3877_v40 = vld [vmem:[#allocation2 + $0x152] sm:$0xff] }
 0x212   :  { %v9933_v54 = vpack.c.bf16 %v3877_v40, %v9854_v48  ;;  %v4199_v40 = vld [vmem:[#allocation2 + $0x74] sm:$0xff] }
 0x214   :  { %7745 = vmatmul.mubr.msk.bf16.gmra.mxu0 %vm1540_vm1, %v9905_v18 }
 0x215   :  { %7748 = vmatprep.mubr.msk.bf16.mxu0 %vm1540_vm1, %v3882_v49 }
 0x218   :  { %7551 = vmatmul.mubr.msk.bf16.gmra.mxu1 %vm1540_vm1, %v9758_v56  ;;  %v2218_v56 = vpack.c.bf16 %v9525_v30, %v2202_v58  ;;  %v2419_v58 = vsel %vm1977_vm2, %v6783_v21, 0  ;;  %v4577_v21 = vsel %vm1977_vm2, %v6900_v22, 0  ;;  %v4202_v22 = vld [vmem:[#allocation2 + $0xe4] sm:$0xff] }
 0x219   :  { %7554 = vmatprep.mubr.msk.bf16.mxu1 %vm1540_vm1, %v9806_v20 }
 0x21c   :  { %7749 = vmatmul.mubr.msk.bf16.gmra.mxu0 %vm1540_vm1, %v9918_v8 }
 0x21d   :  { %7752 = vmatprep.mubr.msk.bf16.mxu0 %vm1540_vm1, %v9922_v57 }
 0x220   :  { %7555 = vmatmul.mubr.msk.bf16.gmra.mxu1 %vm1540_vm1, %v9849_v44 }
 0x221   :  { %7560 = vmatprep.mubr.msk.bf16.mxu1 %vm1540_vm1, %v2218_v56  ;;  %v4198_v56 = vld [vmem:[#allocation2 + $0x64] sm:$0xff] }
 0x222   :  { %v9952_v48 = vpack.c.bf16 %v4199_v40, %v4198_v56  ;;  %v4201_v56 = vld [vmem:[#allocation2 + $0x94] sm:$0xff] }
 0x223   :  { %v4203_v40 = vld [vmem:[#allocation2 + $0xf4] sm:$0xff] }
 0x224   :  { %7753 = vmatmul.mubr.msk.bf16.gmra.mxu0 %vm1540_vm1, %v9933_v54  ;;  %v9968_v47 = vpack.c.bf16 %v4203_v40, %v4202_v22  ;;  %v2368_v22 = vld [vmem:[#allocation2 + $0x3] sm:$0xff] }
 0x225   :  { %7776 = vmatprep.mubr.msk.bf16.mxu0 %vm1540_vm1, %v9935_v62  ;;  %v2384_v40 = vpack.c.bf16 %v9527_v25, %v2368_v22  ;;  %v2372_v25 = vld [vmem:[#allocation2 + $0x43] sm:$0xff] }
 0x228   :  { %7561 = vmatmul.mubr.msk.bf16.vlgmr.msra.gmra.mxu1 %vm1540_vm1, %v3878_v43  ;;  %v2222_v43 = vpack.c.bf16 %v9772_v10, %v2210_v3  ;;  %v4207_v3 = vld [vmem:[#allocation2 + $0x134] sm:$0xff] }
 0x229   :  { %7564 = vmatprep.mubr.msk.bf16.mxu1 %vm1540_vm1, %v9883_v11  ;;  %7577 = vmatpush3.bf16.msra.mxu1 %v2419_v58  ;;  %v4200_v58 = vld [vmem:[#allocation2 + $0x84] sm:$0xff] }
 0x22a   :  { %8084 = vmatprep.subr.msk.bf16.mxu1 %vm1977_vm2, %v6792_v45  ;;  %v9966_v2 = vpack.c.bf16 %v4201_v56, %v4200_v58  ;;  %v4206_v58 = vld [vmem:[#allocation2 + $0x124] sm:$0xff] }
 0x22b   :  { %v9979_v56 = vpack.c.bf16 %v4207_v3, %v4206_v58  ;;  %v2371_v3 = vld [vmem:[#allocation2 + $0x33] sm:$0xff]  ;;  %v2374_v45 = vld [vmem:[#allocation2 + $0x63] sm:$0xff] }
 0x22c   :  { %7777 = vmatmul.mubr.msk.bf16.vlgmr.msra.gmra.mxu0 %vm1540_vm1, %v9948_v32  ;;  %11612 = vst [vmem:[#allocation29_spill] sm:$0xff] %v9966_v2  ;;  %v2373_v58 = vld [vmem:[#allocation2 + $0x53] sm:$0xff]  ;;  %v2385_v22 = vpack.c.bf16 %v2371_v3, %v9516_v29 }
 0x22d   :  { %7780 = vmatprep.mubr.msk.bf16.mxu0 %vm1540_vm1, %v9952_v48  ;;  %7811 = vmatpush3.bf16.msra.mxu0 %v4577_v21  ;;  %v4204_v21 = vld [vmem:[#allocation2 + $0x104] sm:$0xff]  ;;  %v2386_v33 = vpack.c.bf16 %v2373_v58, %v2372_v25  ;;  %v4532_v29 = vld [vmem:[#allocation2 + $0x91] sm:$0xff] }
 0x22e   :  { %8098 = vmatprep.subr.msk.bf16.mxu0 %vm1977_vm2, %v6918_v14 }
 0x230   :  { %7565 = vmatmul.mubr.msk.bf16.gmra.mxu1 %vm1540_vm1, %v9890_v34 }
 0x231   :  { %7568 = vmatprep.mubr.msk.bf16.mxu1 %vm1540_vm1, %v2222_v43  ;;  %v4205_v43 = vld [vmem:[#allocation2 + $0x114] sm:$0xff] }
 0x232   :  { %v9977_v10 = vpack.c.bf16 %v4205_v43, %v4204_v21  ;;  %v4208_v21 = vld [vmem:[#allocation2 + $0x144] sm:$0xff] }
 0x234   :  { %7781 = vmatmul.mubr.msk.bf16.gmra.mxu0 %vm1540_vm1, %v9966_v2  ;;  %v11614_v2 = vpack.c.bf16 %v9554_v53, %v9537_v39  ;;  %v4909_v39 = vsel %vm1977_vm2, %v6918_v14, 0  ;;  %v4533_v14 = vld [vmem:[#allocation2 + $0xa1] sm:$0xff] }
 0x235   :  { %7784 = vmatprep.mubr.msk.bf16.mxu0 %vm1540_vm1, %v9968_v47 }
 0x238   :  { %7569 = vmatmul.mubr.msk.bf16.gmra.mxu1 %vm1540_vm1, %v3882_v49  ;;  %v4209_v49 = vld [vmem:[#allocation2 + $0x154] sm:$0xff] }
 0x239   :  { %7572 = vmatprep.mubr.msk.bf16.mxu1 %vm1540_vm1, %v9918_v8  ;;  %v9989_v43 = vpack.c.bf16 %v4209_v49, %v4208_v21  ;;  %v10003_v49 = vld [vmem:[#allocation2 + $0x81] sm:$0xff]  ;;  %v11615_v21 = vpack.c.bf16 %v9612_v50, %v9572_v0 }
 0x23a   :  { %v4544_v53 = vpack.c.bf16 %v10003_v49, %v9604_v5  ;;  %v2380_v0 = vld [vmem:[#allocation2 + $0x103] sm:$0xff] }
 0x23b   :  { %11613 = vst [vmem:[#allocation30_spill] sm:$0xff] %v9989_v43 }
 0x23c   :  { %7785 = vmatmul.mubr.msk.bf16.gmra.mxu0 %vm1540_vm1, %v9977_v10 }
 0x23d   :  { %7788 = vmatprep.mubr.msk.bf16.mxu0 %vm1540_vm1, %v9979_v56 }
 0x240   :  { %7573 = vmatmul.mubr.msk.bf16.gmra.mxu1 %vm1540_vm1, %v9922_v57 }
 0x241   :  { %7578 = vmatprep.mubr.msk.bf16.mxu1 %vm1540_vm1, %v2384_v40  ;;  %v6801_v40 = vld [vmem:[%s11548_s3 + $0x14] sm:$0xf] }
 0x242   :  { %v2751_v30 = vsel %vm1977_vm2, %v6801_v40, 0 }
 0x244   :  { %7789 = vmatmul.mubr.msk.bf16.gmra.mxu0 %vm1540_vm1, %v9989_v43  ;;  %v4545_v43 = vpack.c.bf16 %v4533_v14, %v4532_v29  ;;  %v2383_v29 = vld [vmem:[#allocation2 + $0x133] sm:$0xff] }
 0x245   :  { %7812 = vmatprep.mubr.msk.bf16.mxu0 %vm1540_vm1, %v11614_v2  ;;  %v6936_v2 = vld [vmem:[%s11548_s3 + $0x50] sm:$0xf] }
 0x248   :  { %7579 = vmatmul.mubr.msk.bf16.vlgmr.msra.gmra.mxu1 %vm1540_vm1, %v2385_v22  ;;  %v2376_v22 = vld [vmem:[#allocation2 + $0xc3] sm:$0xff] }
 0x249   :  { %7582 = vmatprep.mubr.msk.bf16.mxu1 %vm1540_vm1, %v2386_v33  ;;  %7595 = vmatpush3.bf16.msra.mxu1 %v2585_v46  ;;  %v2375_v33 = vld [vmem:[#allocation2 + $0x73] sm:$0xff]  ;;  %v2388_v5 = vpack.c.bf16 %v9774_v60, %v2376_v22 }
 0x24a   :  { %8085 = vmatprep.subr.msk.bf16.mxu1 %vm1977_vm2, %v6801_v40  ;;  %v2387_v46 = vpack.c.bf16 %v2375_v33, %v2374_v45  ;;  %v10035_v60 = vld [vmem:[#allocation2 + $0x14] sm:$0xff] }
 0x24b   :  { %v6954_v40 = vld [vmem:[%s11548_s3 + $0x58] sm:$0xf] }
 0x24c   :  { %7813 = vmatmul.mubr.msk.bf16.vlgmr.msra.gmra.mxu0 %vm1540_vm1, %v11615_v21  ;;  %v2381_v21 = vld [vmem:[#allocation2 + $0x113] sm:$0xff] }
 0x24d   :  { %7816 = vmatprep.mubr.msk.bf16.mxu0 %vm1540_vm1, %v4544_v53  ;;  %7847 = vmatpush3.bf16.msra.mxu0 %v4909_v39  ;;  %v2379_v39 = vld [vmem:[#allocation2 + $0xf3] sm:$0xff]  ;;  %v2390_v52 = vpack.c.bf16 %v2381_v21, %v2380_v0 }
 0x24e   :  { %8100 = vmatprep.subr.msk.bf16.mxu0 %vm1977_vm2, %v6936_v2  ;;  %v2389_v53 = vpack.c.bf16 %v2379_v39, %v9762_v63  ;;  %v4541_v63 = vld [vmem:[#allocation2 + $0x161] sm:$0xff] }
 0x250   :  { %7583 = vmatmul.mubr.msk.bf16.gmra.mxu1 %vm1540_vm1, %v2387_v46  ;;  %v4539_v46 = vld [vmem:[#allocation2 + $0x141] sm:$0xff] }
 0x251   :  { %7586 = vmatprep.mubr.msk.bf16.mxu1 %vm1540_vm1, %v2388_v5  ;;  %v10029_v22 = vpack.c.bf16 %v4539_v46, %v9839_v6  ;;  %v2382_v5 = vld [vmem:[#allocation2 + $0x123] sm:$0xff]  ;;  %v10040_v46 = vpack.c.bf16 %v2372_v25, %v2371_v3  ;;  %v10053_v25 = vpack.c.bf16 %v2374_v45, %v2373_v58 }
 0x252   :  { %v2391_v14 = vpack.c.bf16 %v2383_v29, %v2382_v5  ;;  %v4865_v45 = vld [vmem:[#allocation2 + $0xa3] sm:$0xff] }
 0x254   :  { %7817 = vmatmul.mubr.msk.bf16.gmra.mxu0 %vm1540_vm1, %v4545_v43  ;;  %v2534_v43 = vld [vmem:[#allocation2 + $0x4] sm:$0xff] }
 0x255   :  { %7820 = vmatprep.mubr.msk.bf16.mxu0 %vm1540_vm1, %v9812_v28 }
 0x258   :  { %7587 = vmatmul.mubr.msk.bf16.gmra.mxu1 %vm1540_vm1, %v2389_v53  ;;  %v2550_v53 = vpack.c.bf16 %v10035_v60, %v2534_v43  ;;  %v6810_v43 = vld [vmem:[%s11548_s3 + $0x18] sm:$0xf] }
 0x259   :  { %7590 = vmatprep.mubr.msk.bf16.mxu1 %vm1540_vm1, %v2390_v52  ;;  %v4540_v52 = vld [vmem:[#allocation2 + $0x151] sm:$0xff] }
 0x25a   :  { %v4549_v6 = vpack.c.bf16 %v4541_v63, %v4540_v52  ;;  %v5241_v63 = vsel %vm1977_vm2, %v6936_v2, 0  ;;  %v4864_v2 = vld [vmem:[#allocation2 + $0x93] sm:$0xff]  ;;  %v10082_v52 = vpack.c.bf16 %v2382_v5, %v2381_v21  ;;  %v6819_v5 = vld [vmem:[%s11548_s3 + $0x1c] sm:$0xf] }
 0x25b   :  { %v4872_v21 = vld [vmem:[#allocation2 + $0x153] sm:$0xff] }
 0x25c   :  { %7821 = vmatmul.mubr.msk.bf16.gmra.mxu0 %vm1540_vm1, %v9834_v9 }
 0x25d   :  { %7824 = vmatprep.mubr.msk.bf16.mxu0 %vm1540_vm1, %v10029_v22 }
 0x260   :  { %7591 = vmatmul.mubr.msk.bf16.gmra.mxu1 %vm1540_vm1, %v2391_v14  ;;  %v4863_v14 = vld [vmem:[#allocation2 + $0x83] sm:$0xff] }
 0x261   :  { %7596 = vmatprep.mubr.msk.bf16.mxu1 %vm1540_vm1, %v2550_v53  ;;  %v10057_v3 = vpack.c.bf16 %v4863_v14, %v2375_v33  ;;  %v4877_v33 = vpack.c.bf16 %v4865_v45, %v4864_v2  ;;  %v10073_v53 = vpack.c.bf16 %v2380_v0, %v2379_v39  ;;  %v4873_v0 = vld [vmem:[#allocation2 + $0x163] sm:$0xff] }
 0x262   :  { %v4881_v39 = vpack.c.bf16 %v4873_v0, %v4872_v21  ;;  %v5529_v0 = vld [vmem:[#allocation2 + $0xb2] sm:$0xff]  ;;  %v11625_v21 = vld [vmem:[#allocation18_spill] sm:$0xff] }
 0x264   :  { %7825 = vmatmul.mubr.msk.bf16.gmra.mxu0 %vm1540_vm1, %v4549_v6  ;;  %v4871_v6 = vld [vmem:[#allocation2 + $0x143] sm:$0xff] }
 0x265   :  { %7848 = vmatprep.mubr.msk.bf16.mxu0 %vm1540_vm1, %v10040_v46  ;;  %v10084_v14 = vpack.c.bf16 %v4871_v6, %v2383_v29  ;;  %v2917_v29 = vsel %vm1977_vm2, %v6810_v43, 0 }
 0x268   :  { %7597 = vmatmul.mubr.msk.bf16.vlgmr.msra.gmra.mxu1 %vm1540_vm1, %v9935_v62  ;;  %v10064_v62 = vld [vmem:[#allocation2 + $0xd4] sm:$0xff] }
 0x269   :  { %7600 = vmatprep.mubr.msk.bf16.mxu1 %vm1540_vm1, %v9948_v32  ;;  %7613 = vmatpush3.bf16.msra.mxu1 %v2751_v30  ;;  %v2542_v30 = vld [vmem:[#allocation2 + $0xc4] sm:$0xff] }
 0x26a   :  { %8086 = vmatprep.subr.msk.bf16.mxu1 %vm1977_vm2, %v6810_v43  ;;  %v2554_v58 = vpack.c.bf16 %v10064_v62, %v2542_v30 }
 0x26c   :  { %7849 = vmatmul.mubr.msk.bf16.vlgmr.msra.gmra.mxu0 %vm1540_vm1, %v10053_v25 }
 0x26d   :  { %7852 = vmatprep.mubr.msk.bf16.mxu0 %vm1540_vm1, %v10057_v3  ;;  %7883 = vmatpush3.bf16.msra.mxu0 %v5241_v63  ;;  %v11617_v63 = vpack.c.bf16 %v9574_v42, %v9539_v51  ;;  %v5197_v51 = vld [vmem:[#allocation2 + $0xb0] sm:$0xff]  ;;  %v11619_v42 = vpack.c.bf16 %v9643_v12, %v9616_v55  ;;  %v11621_v55 = vpack.c.bf16 %v9781_v4, %v9745_v41 }
 0x26e   :  { %8102 = vmatprep.subr.msk.bf16.mxu0 %vm1977_vm2, %v6954_v40  ;;  %v11622_v12 = vpack.c.bf16 %v9820_v27, %v9800_v37  ;;  %v11623_v4 = vpack.c.bf16 %v9851_v38, %v9841_v13  ;;  %v5205_v37 = vld [vmem:[#allocation2 + $0x170] sm:$0xff]  ;;  %v6828_v38 = vld [vmem:[%s11548_s3 + $0x20] sm:$0xf] }
 0x270   :  { %7601 = vmatmul.mubr.msk.bf16.gmra.mxu1 %vm1540_vm1, %v9952_v48 }
 0x271   :  { %7604 = vmatprep.mubr.msk.bf16.mxu1 %vm1540_vm1, %v2554_v58  ;;  %v11624_v58 = vld [vmem:[#allocation17_spill] sm:$0xff] }
 0x272   :  { %v2884_v13 = vpack.c.bf16 %v9612_v50, %v11624_v58  ;;  %v10183_v50 = vld [vmem:[#allocation2 + $0x71] sm:$0xff] }
 0x273   :  { %v2885_v6 = vpack.c.bf16 %v10003_v49, %v10183_v50 }
 0x274   :  { %7853 = vmatmul.mubr.msk.bf16.gmra.mxu0 %vm1540_vm1, %v4877_v33 }
 0x275   :  { %7856 = vmatprep.mubr.msk.bf16.mxu0 %vm1540_vm1, %v10073_v53 }
 0x278   :  { %7605 = vmatmul.mubr.msk.bf16.gmra.mxu1 %vm1540_vm1, %v9968_v47  ;;  %v11616_v47 = vpack.c.bf16 %v9511_v17, %v9498_v36  ;;  %v11618_v36 = vpack.c.bf16 %v9614_v7, %v9576_v16  ;;  %v5573_v17 = vsel %vm1977_vm2, %v6954_v40, 0  ;;  %v11620_v16 = vpack.c.bf16 %v9743_v1, %v9765_v24  ;;  %v5196_v7 = vld [vmem:[#allocation2 + $0xa0] sm:$0xff]  ;;  %v2866_v1 = vld [vmem:[#allocation2 + $0x11] sm:$0xff] }
 0x279   :  { %7608 = vmatprep.mubr.msk.bf16.mxu1 %vm1540_vm1, %v9977_v10  ;;  %v5209_v43 = vpack.c.bf16 %v5197_v51, %v5196_v7  ;;  %v5204_v40 = vld [vmem:[#allocation2 + $0x160] sm:$0xff] }
 0x27a   :  { %v5213_v27 = vpack.c.bf16 %v5205_v37, %v5204_v40  ;;  %v11632_v37 = vld [vmem:[#allocation8_spill] sm:$0xff] }
 0x27c   :  { %7857 = vmatmul.mubr.msk.bf16.gmra.mxu0 %vm1540_vm1, %v10082_v52 }
 0x27d   :  { %7860 = vmatprep.mubr.msk.bf16.mxu0 %vm1540_vm1, %v10084_v14 }
 0x280   :  { %7609 = vmatmul.mubr.msk.bf16.gmra.mxu1 %vm1540_vm1, %v9979_v56 }
 0x281   :  { %7614 = vmatprep.mubr.msk.bf16.mxu1 %vm1540_vm1, %v11616_v47 }
 0x284   :  { %7861 = vmatmul.mubr.msk.bf16.gmra.mxu0 %vm1540_vm1, %v4881_v39  ;;  %v11626_v39 = vld [vmem:[#allocation16_spill] sm:$0xff] }
 0x285   :  { %7884 = vmatprep.mubr.msk.bf16.mxu0 %vm1540_vm1, %v9585_v23  ;;  %v6972_v23 = vld [vmem:[%s11548_s3 + $0x60] sm:$0xf] }
 0x288   :  { %7615 = vmatmul.mubr.msk.bf16.vlgmr.msra.gmra.mxu1 %vm1540_vm1, %v11617_v63 }
 0x289   :  { %7618 = vmatprep.mubr.msk.bf16.mxu1 %vm1540_vm1, %v11618_v36  ;;  %7631 = vmatpush3.bf16.msra.mxu1 %v2917_v29  ;;  %v11627_v29 = vpack.c.bf16 %v11625_v21, %v11626_v39  ;;  %v11637_v21 = vld [vmem:[#allocation29_spill] sm:$0xff] }
 0x28a   :  { %8087 = vmatprep.subr.msk.bf16.mxu1 %vm1977_vm2, %v6819_v5 }
 0x28c   :  { %7885 = vmatmul.mubr.msk.bf16.vlgmr.msra.gmra.mxu0 %vm1540_vm1, %v9625_v15 }
 0x28d   :  { %7888 = vmatprep.mubr.msk.bf16.mxu0 %vm1540_vm1, %v9668_v19  ;;  %7919 = vmatpush3.bf16.msra.mxu0 %v5573_v17 }
 0x28e   :  { %8104 = vmatprep.subr.msk.bf16.mxu0 %vm1977_vm2, %v6972_v23 }
 0x290   :  { %7619 = vmatmul.mubr.msk.bf16.gmra.mxu1 %vm1540_vm1, %v11619_v42  ;;  %v10129_v15 = vpop.f32.mrf.mxu1  ;;  %v5536_v42 = vld [vmem:[#allocation2 + $0x162] sm:$0xff] }
 0x291   :  { %7622 = vmatprep.mubr.msk.bf16.mxu1 %vm1540_vm1, %v11620_v16 }
 0x292   :  { %v10134_v19 = vpop.f32.mrf.mxu1 }
 0x294   :  { %7889 = vmatmul.mubr.msk.bf16.gmra.mxu0 %vm1540_vm1, %v5209_v43  ;;  %v10144_v24 = vpop.f32.mrf.mxu1  ;;  %v5537_v43 = vld [vmem:[#allocation2 + $0x172] sm:$0xff] }
 0x295   :  { %7892 = vmatprep.mubr.msk.bf16.mxu0 %vm1540_vm1, %v9806_v20  ;;  %v2882_v20 = vpack.c.bf16 %v9736_v31, %v2866_v1  ;;  %v10185_v33 = vpop.f32.mrf.mxu0 }
 0x296   :  { %v10151_v41 = vpop.f32.mrf.mxu1 }
 0x298   :  { %7623 = vmatmul.mubr.msk.bf16.gmra.mxu1 %vm1540_vm1, %v11621_v55  ;;  %v10158_v30 = vpop.f32.mrf.mxu1  ;;  %v5545_v55 = vpack.c.bf16 %v5537_v43, %v5536_v42  ;;  %v11641_v43 = vld [vmem:[#allocation19_spill] sm:$0xff] }
 0x299   :  { %7626 = vmatprep.mubr.msk.bf16.mxu1 %vm1540_vm1, %v11622_v12 }
 0x29a   :  { %v10171_v45 = vpop.f32.mrf.mxu1 }
 0x29c   :  { %7893 = vmatmul.mubr.msk.bf16.gmra.mxu0 %vm1540_vm1, %v9849_v44  ;;  %v3083_v44 = vsel %vm1977_vm2, %v6819_v5, 0  ;;  %v10177_v2 = vpop.f32.mrf.mxu1 }
 0x29d   :  { %7896 = vmatprep.mubr.msk.bf16.mxu0 %vm1540_vm1, %v9865_v26  ;;  %v2883_v26 = vpack.c.bf16 %v9738_v61, %v9723_v59 }
 0x29e   :  { %v10189_v47 = vpop.f32.mrf.mxu1 }
 0x2a0   :  { %7627 = vmatmul.mubr.msk.bf16.gmra.mxu1 %vm1540_vm1, %v11623_v4  ;;  %v11631_v4 = vld [vmem:[#allocation13_spill] sm:$0xff] }
 0x2a1   :  { %7632 = vmatprep.mubr.msk.bf16.mxu1 %vm1540_vm1, %v2882_v20 }
 0x2a4   :  { %7897 = vmatmul.mubr.msk.bf16.gmra.mxu0 %vm1540_vm1, %v5213_v27  ;;  %v11633_v27 = vpack.c.bf16 %v11631_v4, %v11632_v37 }
 0x2a5   :  { %7920 = vmatprep.mubr.msk.bf16.mxu0 %vm1540_vm1, %v9883_v11  ;;  %v5905_v11 = vsel %vm1977_vm2, %v6972_v23, 0 }
 0x2a8   :  { %7633 = vmatmul.mubr.msk.bf16.vlgmr.msra.gmra.mxu1 %vm1540_vm1, %v2883_v26 }
 0x2a9   :  { %7636 = vmatprep.mubr.msk.bf16.mxu1 %vm1540_vm1, %v2884_v13  ;;  %7649 = vmatpush3.bf16.msra.mxu1 %v3083_v44  ;;  %v11635_v44 = vld [vmem:[#allocation14_spill] sm:$0xff] }
 0x2aa   :  { %8088 = vmatprep.subr.msk.bf16.mxu1 %vm1977_vm2, %v6828_v38 }
 0x2ac   :  { %7921 = vmatmul.mubr.msk.bf16.vlgmr.msra.gmra.mxu0 %vm1540_vm1, %v9890_v34  ;;  %v5528_v34 = vld [vmem:[#allocation2 + $0xa2] sm:$0xff] }
 0x2ad   :  { %7924 = vmatprep.mubr.msk.bf16.mxu0 %vm1540_vm1, %v9905_v18  ;;  %7955 = vmatpush3.bf16.msra.mxu0 %v5905_v11  ;;  %v10196_v18 = vpop.f32.mrf.mxu0  ;;  %v5541_v63 = vpack.c.bf16 %v5529_v0, %v5528_v34 }
 0x2af   :  { %v10203_v49 = vpop.f32.mrf.mxu0 }
 0x2b0   :  { %7637 = vmatmul.mubr.msk.bf16.gmra.mxu1 %vm1540_vm1, %v2885_v6  ;;  %v10198_v5 = vpop.f32.mrf.mxu1 }
 0x2b1   :  { %7640 = vmatprep.mubr.msk.bf16.mxu1 %vm1540_vm1, %v11627_v29  ;;  %v10211_v17 = vpop.f32.mrf.mxu0 }
 0x2b2   :  { %v10205_v36 = vpop.f32.mrf.mxu1 }
 0x2b3   :  { %v10215_v51 = vpop.f32.mrf.mxu0 }
 0x2b4   :  { %7925 = vmatmul.mubr.msk.bf16.gmra.mxu0 %vm1540_vm1, %v5541_v63  ;;  %v10213_v23 = vpop.f32.mrf.mxu1  ;;  %v5861_v63 = vld [vmem:[#allocation2 + $0xb4] sm:$0xff] }
 0x2b5   :  { %7928 = vmatprep.mubr.msk.bf16.mxu0 %vm1540_vm1, %v9918_v8  ;;  %v10223_v16 = vpop.f32.mrf.mxu0 }
 0x2b6   :  { %v10221_v8 = vpop.f32.mrf.mxu1  ;;  %11628 = vst [vmem:[#allocation17_spill] sm:$0xff] %v10223_v16 }
 0x2b8   :  { %7641 = vmatmul.mubr.msk.bf16.gmra.mxu1 %vm1540_vm1, %v9812_v28 }
 0x2b9   :  { %7644 = vmatprep.mubr.msk.bf16.mxu1 %vm1540_vm1, %v9834_v9  ;;  %v11629_v9 = vld [vmem:[#allocation11_spill] sm:$0xff] }
 0x2ba   :  { %v11630_v7 = vpack.c.bf16 %v9513_v35, %v11629_v9  ;;  %v10248_v35 = vld [vmem:[%s11548_s3 + $0x24] sm:$0xf] }
 0x2bb   :  { %v11638_v9 = vld [vmem:[#allocation7_spill] sm:$0xff] }
 0x2bc   :  { %7929 = vmatmul.mubr.msk.bf16.gmra.mxu0 %vm1540_vm1, %v9922_v57 }
 0x2bd   :  { %7932 = vmatprep.mubr.msk.bf16.mxu0 %vm1540_vm1, %v9933_v54  ;;  %v10235_v54 = vpop.f32.mrf.mxu0 }
 0x2bf   :  { %v10250_v20 = vpop.f32.mrf.mxu0 }
 0x2c0   :  { %v10225_v28 = vpop.f32.mrf.mxu1  ;;  %7645 = vmatmul.mubr.msk.bf16.gmra.mxu1 %vm1540_vm1, %v10029_v22  ;;  %v3249_v22 = vsel %vm1977_vm2, %v6828_v38, 0 }
 0x2c1   :  { %7650 = vmatprep.mubr.msk.bf16.mxu1 %vm1540_vm1, %v11630_v7  ;;  %v10263_v38 = vpop.f32.mrf.mxu0 }
 0x2c2   :  { %v10233_v57 = vpop.f32.mrf.mxu1 }
 0x2c3   :  { %v10277_v39 = vpop.f32.mrf.mxu0 }
 0x2c4   :  { %v10237_v12 = vpop.f32.mrf.mxu1  ;;  %7933 = vmatmul.mubr.msk.bf16.gmra.mxu0 %vm1540_vm1, %v5545_v55 }
 0x2c5   :  { %7956 = vmatprep.mubr.msk.bf16.mxu0 %vm1540_vm1, %v9948_v32  ;;  %v11634_v32 = vld [vmem:[#allocation9_spill] sm:$0xff] }
 0x2c6   :  { %v10242_v1 = vpop.f32.mrf.mxu1  ;;  %v11636_v13 = vpack.c.bf16 %v11634_v32, %v11635_v44 }
 0x2c8   :  { %v7544_v40 = vpop.f32.mrf.mxu1  ;;  %7651 = vmatmul.mubr.msk.bf16.vlgmr.msra.gmra.mxu1 %vm1540_vm1, %v11633_v27 }
 0x2c9   :  { %v10257_v26 = vadd.f32 %v7544_v40, %v10129_v15  ;;  %7654 = vmatprep.mubr.msk.bf16.mxu1 %vm1540_vm1, %v11636_v13  ;;  %7667 = vmatpush3.bf16.msra.mxu1 %v3249_v22  ;;  %v5860_v22 = vld [vmem:[#allocation2 + $0xa4] sm:$0xff]  ;;  %v10289_v40 = vpop.f32.mrf.mxu0 }
 0x2ca   :  { %v2139_v11 = vpop.f32.mrf.mxu1  ;;  %8089 = vmatprep.subr.msk.bf16.mxu1 %vm1977_vm2, %v10248_v35  ;;  %v5873_v37 = vpack.c.bf16 %v5861_v63, %v5860_v22  ;;  %v5868_v22 = vld [vmem:[#allocation2 + $0x164] sm:$0xff] }
 0x2cb   :  { %v10268_v6 = vadd.f32 %v2139_v11, %v10134_v19  ;;  %v11639_v19 = vld [vmem:[#allocation15_spill] sm:$0xff] }
 0x2cc   :  { %v7545_v0 = vpop.f32.mrf.mxu1  ;;  %7957 = vmatmul.mubr.msk.bf16.vlgmr.msra.gmra.mxu0 %vm1540_vm1, %v9952_v48  ;;  %v11640_v7 = vpack.c.bf16 %v11638_v9, %v11639_v19 }
 0x2cd   :  { %v10273_v15 = vadd.f32 %v7545_v0, %v10144_v24  ;;  %7960 = vmatprep.mubr.msk.bf16.mxu0 %vm1540_vm1, %v11637_v21  ;;  %v11642_v24 = vld [vmem:[#allocation21_spill] sm:$0xff]  ;;  %v11644_v21 = vld [vmem:[#allocation23_spill] sm:$0xff] }
 0x2ce   :  { %v2142_v29 = vpop.f32.mrf.mxu1  ;;  %v11643_v55 = vpack.c.bf16 %v11641_v43, %v11642_v24  ;;  %v11650_v24 = vld [vmem:[#allocation30_spill] sm:$0xff] }
 0x2cf   :  { %v2143_v34 = vadd.f32 %v2142_v29, %v10151_v41  ;;  %v11645_v29 = vld [vmem:[#allocation24_spill] sm:$0xff] }
 0x2d0   :  { %v7548_v42 = vpop.f32.mrf.mxu1  ;;  %7655 = vmatmul.mubr.msk.bf16.gmra.mxu1 %vm1540_vm1, %v11640_v7  ;;  %v11646_v63 = vpack.c.bf16 %v11644_v21, %v11645_v29  ;;  %v11655_v21 = vld [vmem:[#allocation12_spill] sm:$0xff] }
 0x2d1   :  { %v2164_v48 = vadd.f32 %v7548_v42, %v10158_v30  ;;  %7658 = vmatprep.mubr.msk.bf16.mxu1 %vm1540_vm1, %v11643_v55  ;;  %v10296_v30 = vpop.f32.mrf.mxu0  ;;  %v11647_v42 = vld [vmem:[#allocation26_spill] sm:$0xff]  ;;  %v5869_v29 = vld [vmem:[#allocation2 + $0x174] sm:$0xff] }
 0x2d2   :  { %v2155_v4 = vpop.f32.mrf.mxu1 }
 0x2d3   :  { %v2156_v41 = vadd.f32 %v2155_v4, %v10171_v45  ;;  %v10299_v11 = vpop.f32.mrf.mxu0 }
 0x2d4   :  { %v7549_v27 = vpop.f32.mrf.mxu1  ;;  %7961 = vmatmul.mubr.msk.bf16.gmra.mxu0 %vm1540_vm1, %v5873_v37 }
 0x2d5   :  { %v2167_v32 = vadd.f32 %v7549_v27, %v10177_v2  ;;  %7964 = vmatprep.mubr.msk.bf16.mxu0 %vm1540_vm1, %v9977_v10  ;;  %v11648_v2 = vld [vmem:[#allocation25_spill] sm:$0xff]  ;;  %v10311_v7 = vpop.f32.mrf.mxu0  ;;  %v11651_v27 = vld [vmem:[#allocation28_spill] sm:$0xff] }
 0x2d6   :  { %v2158_v44 = vpop.f32.mrf.mxu1  ;;  %v11649_v9 = vpack.c.bf16 %v11647_v42, %v11648_v2  ;;  %v5877_v42 = vpack.c.bf16 %v5869_v29, %v5868_v22 }
 0x2d7   :  { %v2159_v13 = vadd.f32 %v2158_v44, %v10189_v47  ;;  %v10319_v4 = vpop.f32.mrf.mxu0 }
 0x2d8   :  { %v7552_v0 = vpop.f32.mrf.mxu1  ;;  %7659 = vmatmul.mubr.msk.bf16.gmra.mxu1 %vm1540_vm1, %v11646_v63 }
 0x2d9   :  { %v2180_v45 = vadd.f32 %v7552_v0, %v10198_v5  ;;  %7662 = vmatprep.mubr.msk.bf16.mxu1 %vm1540_vm1, %v11649_v9  ;;  %v10331_v2 = vpop.f32.mrf.mxu0 }
 0x2da   :  { %v2171_v10 = vpop.f32.mrf.mxu1 }
 0x2db   :  { %v2172_v19 = vadd.f32 %v2171_v10, %v10205_v36  ;;  %v11652_v36 = vld [vmem:[#allocation27_spill] sm:$0xff] }
 0x2dc   :  { %v7553_v47 = vpop.f32.mrf.mxu1  ;;  %7965 = vmatmul.mubr.msk.bf16.gmra.mxu0 %vm1540_vm1, %v9979_v56  ;;  %v11653_v44 = vpack.c.bf16 %v11651_v27, %v11652_v36  ;;  %v11654_v56 = vld [vmem:[#allocation10_spill] sm:$0xff] }
 0x2dd   :  { %v2183_v43 = vadd.f32 %v7553_v47, %v10213_v23  ;;  %7968 = vmatprep.mubr.msk.bf16.mxu0 %vm1540_vm1, %v11650_v24  ;;  %v11656_v23 = vpack.c.bf16 %v11654_v56, %v11655_v21  ;;  %v11658_v56 = vld [vmem:[#allocation22_spill] sm:$0xff] }
 0x2de   :  { %v2174_v5 = vpop.f32.mrf.mxu1 }
 0x2df   :  { %v2175_v55 = vadd.f32 %v2174_v5, %v10221_v8  ;;  %v6855_v5 = vld [vmem:[%s11548_s3 + $0x2c] sm:$0xf] }
 0x2e0   :  { %v7556_v37 = vpop.f32.mrf.mxu1  ;;  %7663 = vmatmul.mubr.msk.bf16.gmra.mxu1 %vm1540_vm1, %v11653_v44 }
 0x2e1   :  { %v2196_v0 = vadd.f32 %v7556_v37, %v10225_v28  ;;  %7668 = vmatprep.mubr.msk.bf16.mxu1 %vm1540_vm1, %v11656_v23  ;;  %v3415_v28 = vsel %vm1977_vm2, %v10248_v35, 0 }
 0x2e2   :  { %v2187_v63 = vpop.f32.mrf.mxu1 }
 0x2e3   :  { %v2188_v8 = vadd.f32 %v2187_v63, %v10233_v57 }
 0x2e4   :  { %v7557_v9 = vpop.f32.mrf.mxu1  ;;  %7969 = vmatmul.mubr.msk.bf16.gmra.mxu0 %vm1540_vm1, %v5877_v42 }
 0x2e5   :  { %v2199_v10 = vadd.f32 %v7557_v9, %v10237_v12 }
 0x2e6   :  { %v2190_v47 = vpop.f32.mrf.mxu1 }
 0x2e7   :  { %v2191_v24 = vadd.f32 %v2190_v47, %v10242_v1  ;;  %v3365_v47 = vld [vmem:[#allocation2 + $0x24] sm:$0xff] }
 0x2e8   :  { %v7562_v22 = vpop.f32.mrf.mxu1  ;;  %7669 = vmatmul.mubr.msk.bf16.vlgmr.msra.gmra.mxu1 %vm1540_vm1, %v10040_v46 }
 0x2e9   :  { %v2354_v57 = vadd.f32 %v7562_v22, %v10257_v26  ;;  %7672 = vmatprep.mubr.msk.bf16.mxu1 %vm1540_vm1, %v10053_v25  ;;  %7685 = vmatpush3.bf16.msra.mxu1 %v3415_v28  ;;  %v11657_v26 = vld [vmem:[#allocation20_spill] sm:$0xff] }
 0x2ea   :  { %v2289_v12 = vpop.f32.mrf.mxu1  ;;  %8091 = vmatprep.subr.msk.bf16.mxu1 %vm1977_vm2, %v6855_v5  ;;  %v11659_v21 = vpack.c.bf16 %v11657_v26, %v11658_v56  ;;  %v3747_v26 = vsel %vm1977_vm2, %v6855_v5, 0 }
 0x2eb   :  { %v2352_v35 = vadd.f32 %v2289_v12, %v10268_v6 }
 0x2ec   :  { %v7563_v1 = vpop.f32.mrf.mxu1 }
 0x2ed   :  { %v2355_v37 = vadd.f32 %v7563_v1, %v10273_v15 }
 0x2ee   :  { %v2292_v27 = vpop.f32.mrf.mxu1 }
 0x2ef   :  { %v2353_v36 = vadd.f32 %v2292_v27, %v2143_v34 }
 0x2f0   :  { %v7566_v44 = vpop.f32.mrf.mxu1  ;;  %7673 = vmatmul.mubr.msk.bf16.gmra.mxu1 %vm1540_vm1, %v10057_v3 }
 0x2f1   :  { %v2358_v46 = vadd.f32 %v7566_v44, %v2164_v48  ;;  %7676 = vmatprep.mubr.msk.bf16.mxu1 %vm1540_vm1, %v11659_v21  ;;  %v3371_v21 = vld [vmem:[#allocation2 + $0x84] sm:$0xff] }
 0x2f2   :  { %v2305_v25 = vpop.f32.mrf.mxu1 }
 0x2f3   :  { %v2356_v23 = vadd.f32 %v2305_v25, %v2156_v41  ;;  %v10401_v25 = vpop.f32.mrf.mxu0 }
 0x2f4   :  { %v7567_v29 = vpop.f32.mrf.mxu1  ;;  %11660 = vst [vmem:[#allocation18_spill] sm:$0xff] %v10401_v25 }
 0x2f5   :  { %v2359_v63 = vadd.f32 %v7567_v29, %v2167_v32 }
 0x2f6   :  { %v2308_v6 = vpop.f32.mrf.mxu1 }
 0x2f7   :  { %v10355_v42 = vadd.f32 %v2308_v6, %v2159_v13  ;;  %v3380_v13 = vpack.c.bf16 %v3365_v47, %v10035_v60  ;;  %v3368_v60 = vld [vmem:[#allocation2 + $0x54] sm:$0xff]  ;;  %v3373_v6 = vld [vmem:[#allocation2 + $0xe4] sm:$0xff] }
 0x2f8   :  { %v7570_v15 = vpop.f32.mrf.mxu1  ;;  %7677 = vmatmul.mubr.msk.bf16.gmra.mxu1 %vm1540_vm1, %v10073_v53 }
 0x2f9   :  { %v10359_v34 = vadd.f32 %v7570_v15, %v2180_v45  ;;  %7680 = vmatprep.mubr.msk.bf16.mxu1 %vm1540_vm1, %v10082_v52 }
 0x2fa   :  { %v2321_v3 = vpop.f32.mrf.mxu1 }
 0x2fb   :  { %v10363_v48 = vadd.f32 %v2321_v3, %v2172_v19  ;;  %v3366_v19 = vld [vmem:[#allocation2 + $0x34] sm:$0xff] }
 0x2fc   :  { %v7571_v9 = vpop.f32.mrf.mxu1  ;;  %v3370_v3 = vld [vmem:[#allocation2 + $0x74] sm:$0xff] }
 0x2fd   :  { %v10365_v41 = vadd.f32 %v7571_v9, %v2183_v43  ;;  %v3369_v43 = vld [vmem:[#allocation2 + $0x64] sm:$0xff]  ;;  %v10405_v9 = vpack.c.bf16 %v3371_v21, %v3370_v3 }
 0x2fe   :  { %v2324_v32 = vpop.f32.mrf.mxu1 }
 0x2ff   :  { %v10367_v28 = vadd.f32 %v2324_v32, %v2175_v55  ;;  %v3367_v55 = vld [vmem:[#allocation2 + $0x44] sm:$0xff]  ;;  %v3384_v32 = vpack.c.bf16 %v3373_v6, %v10064_v62  ;;  %v3374_v62 = vld [vmem:[#allocation2 + $0xf4] sm:$0xff] }
 0x300   :  { %v7574_v22 = vpop.f32.mrf.mxu1  ;;  %7681 = vmatmul.mubr.msk.bf16.gmra.mxu1 %vm1540_vm1, %v10084_v14  ;;  %v10379_v44 = vpack.c.bf16 %v3367_v55, %v3366_v19  ;;  %v3375_v19 = vld [vmem:[#allocation2 + $0x104] sm:$0xff] }
 0x301   :  { %v10372_v53 = vadd.f32 %v7574_v22, %v2196_v0  ;;  %7686 = vmatprep.mubr.msk.bf16.mxu1 %vm1540_vm1, %v3380_v13  ;;  %v10384_v0 = vpack.c.bf16 %v3369_v43, %v3368_v60  ;;  %v10410_v13 = vpop.f32.mrf.mxu0  ;;  %v3377_v43 = vld [vmem:[#allocation2 + $0x124] sm:$0xff]  ;;  %v10423_v60 = vpack.c.bf16 %v3375_v19, %v3374_v62 }
 0x302   :  { %v2337_v52 = vpop.f32.mrf.mxu1  ;;  %11661 = vst [vmem:[#allocation16_spill] sm:$0xff] %v10410_v13  ;;  %v4364_v13 = vld [vmem:[#allocation2 + $0x70] sm:$0xff] }
 0x303   :  { %v10375_v45 = vadd.f32 %v2337_v52, %v2188_v8  ;;  %v10389_v8 = vld [vmem:[%s11548_s3 + $0x34] sm:$0xf] }
 0x304   :  { %v7575_v12 = vpop.f32.mrf.mxu1 }
 0x305   :  { %v10377_v1 = vadd.f32 %v7575_v12, %v2199_v10  ;;  %v10419_v12 = vpop.f32.mrf.mxu0 }
 0x306   :  { %v2340_v27 = vpop.f32.mrf.mxu1  ;;  %11662 = vst [vmem:[#allocation11_spill] sm:$0xff] %v10419_v12 }
 0x307   :  { %v10382_v14 = vadd.f32 %v2340_v27, %v2191_v24 }
 0x308   :  { %v7580_v56 = vpop.f32.mrf.mxu1  ;;  %7687 = vmatmul.mubr.msk.bf16.vlgmr.msra.gmra.mxu1 %vm1540_vm1, %v10379_v44 }
 0x309   :  { %v10393_v10 = vadd.f32 %v7580_v56, %v2354_v57  ;;  %7690 = vmatprep.mubr.msk.bf16.mxu1 %vm1540_vm1, %v10384_v0  ;;  %7721 = vmatpush3.bf16.msra.mxu1 %v3747_v26  ;;  %v3376_v26 = vld [vmem:[#allocation2 + $0x114] sm:$0xff] }
 0x30a   :  { %v2455_v5 = vpop.f32.mrf.mxu1  ;;  %8093 = vmatprep.subr.msk.bf16.mxu1 %vm1977_vm2, %v10389_v8  ;;  %v10428_v56 = vpack.c.bf16 %v3377_v43, %v3376_v26  ;;  %v10468_v26 = vld [vmem:[#allocation2 + $0x61] sm:$0xff] }
 0x30b   :  { %v10399_v24 = vadd.f32 %v2455_v5, %v2352_v35  ;;  %v10430_v5 = vpop.f32.mrf.mxu0 }
 0x30c   :  { %v7581_v29 = vpop.f32.mrf.mxu1  ;;  %11663 = vst [vmem:[#allocation13_spill] sm:$0xff] %v10430_v5 }
 0x30d   :  { %v10403_v15 = vadd.f32 %v7581_v29, %v2355_v37  ;;  %v10442_v6 = vpop.f32.mrf.mxu0 }
 0x30e   :  { %v2458_v57 = vpop.f32.mrf.mxu1  ;;  %11664 = vst [vmem:[#allocation8_spill] sm:$0xff] %v10442_v6 }
 0x30f   :  { %v10407_v47 = vadd.f32 %v2458_v57, %v2353_v36  ;;  %v10452_v19 = vpop.f32.mrf.mxu0 }
 0x310   :  { %v7584_v22 = vpop.f32.mrf.mxu1  ;;  %7691 = vmatmul.mubr.msk.bf16.gmra.mxu1 %vm1540_vm1, %v10405_v9  ;;  %11665 = vst [vmem:[#allocation9_spill] sm:$0xff] %v10452_v19 }
 0x311   :  { %v10414_v35 = vadd.f32 %v7584_v22, %v2358_v46  ;;  %7694 = vmatprep.mubr.msk.bf16.mxu1 %vm1540_vm1, %v3384_v32  ;;  %v3379_v32 = vld [vmem:[#allocation2 + $0x144] sm:$0xff] }
 0x312   :  { %v2471_v37 = vpop.f32.mrf.mxu1 }
 0x313   :  { %v10417_v52 = vadd.f32 %v2471_v37, %v2356_v23 }
 0x314   :  { %v7585_v36 = vpop.f32.mrf.mxu1 }
 0x315   :  { %v10421_v55 = vadd.f32 %v7585_v36, %v2359_v63 }
 0x316   :  { %v2474_v27 = vpop.f32.mrf.mxu1 }
 0x317   :  { %v10426_v46 = vadd.f32 %v2474_v27, %v10355_v42  ;;  %v3378_v42 = vld [vmem:[#allocation2 + $0x134] sm:$0xff] }
 0x318   :  { %v7588_v23 = vpop.f32.mrf.mxu1  ;;  %7695 = vmatmul.mubr.msk.bf16.gmra.mxu1 %vm1540_vm1, %v10423_v60  ;;  %v10447_v37 = vpack.c.bf16 %v3379_v32, %v3378_v42  ;;  %v3702_v32 = vld [vmem:[#allocation2 + $0x81] sm:$0xff] }
 0x319   :  { %v10435_v21 = vadd.f32 %v7588_v23, %v10359_v34  ;;  %7698 = vmatprep.mubr.msk.bf16.mxu1 %vm1540_vm1, %v10428_v56 }
 0x31a   :  { %v2487_v63 = vpop.f32.mrf.mxu1 }
 0x31b   :  { %v10440_v29 = vadd.f32 %v2487_v63, %v10363_v48 }
 0x31c   :  { %v7589_v3 = vpop.f32.mrf.mxu1 }
 0x31d   :  { %v10445_v57 = vadd.f32 %v7589_v3, %v10365_v41  ;;  %v11666_v41 = vpack.c.bf16 %v9723_v59, %v9736_v31  ;;  %v3714_v31 = vpack.c.bf16 %v10183_v50, %v10468_v26 }
 0x31e   :  { %v2490_v22 = vpop.f32.mrf.mxu1 }
 0x31f   :  { %v10450_v34 = vadd.f32 %v2490_v22, %v10367_v28  ;;  %v10466_v28 = vpop.f32.mrf.mxu0  ;;  %v3703_v22 = vld [vmem:[#allocation2 + $0x91] sm:$0xff] }
 0x320   :  { %v7592_v36 = vpop.f32.mrf.mxu1  ;;  %7699 = vmatmul.mubr.msk.bf16.gmra.mxu1 %vm1540_vm1, %v10447_v37  ;;  %11667 = vst [vmem:[#allocation14_spill] sm:$0xff] %v10466_v28 }
 0x321   :  { %v10457_v48 = vadd.f32 %v7592_v36, %v10372_v53  ;;  %7722 = vmatprep.mubr.msk.bf16.mxu1 %vm1540_vm1, %v11666_v41  ;;  %v4079_v53 = vsel %vm1977_vm2, %v10389_v8, 0  ;;  %v10485_v42 = vpop.f32.mrf.mxu0 }
 0x322   :  { %v2503_v43 = vpop.f32.mrf.mxu1  ;;  %11668 = vst [vmem:[#allocation29_spill] sm:$0xff] %v10485_v42 }
 0x323   :  { %v10464_v62 = vadd.f32 %v2503_v43, %v10375_v45  ;;  %v10483_v45 = vld [vmem:[%s11548_s3 + $0x3c] sm:$0xf]  ;;  %v10500_v36 = vpop.f32.mrf.mxu0  ;;  %v10505_v43 = vpack.c.bf16 %v3703_v22, %v3702_v32  ;;  %v3707_v32 = vld [vmem:[#allocation2 + $0x111] sm:$0xff] }
 0x324   :  { %v7593_v27 = vpop.f32.mrf.mxu1  ;;  %11670 = vst [vmem:[#allocation7_spill] sm:$0xff] %v10500_v36 }
 0x325   :  { %v10471_v23 = vadd.f32 %v7593_v27, %v10377_v1  ;;  %v11669_v1 = vpack.c.bf16 %v11624_v58, %v9738_v61  ;;  %v3704_v58 = vld [vmem:[#allocation2 + $0xe1] sm:$0xff]  ;;  %v3705_v27 = vld [vmem:[#allocation2 + $0xf1] sm:$0xff] }
 0x326   :  { %v2506_v63 = vpop.f32.mrf.mxu1 }
 0x327   :  { %v10476_v59 = vadd.f32 %v2506_v63, %v10382_v14 }
 0x328   :  { %v7598_v3 = vpop.f32.mrf.mxu1  ;;  %7723 = vmatmul.mubr.msk.bf16.vlgmr.msra.gmra.mxu1 %vm1540_vm1, %v11669_v1 }
 0x329   :  { %v10492_v8 = vadd.f32 %v7598_v3, %v10393_v10  ;;  %7726 = vmatprep.mubr.msk.bf16.mxu1 %vm1540_vm1, %v3714_v31  ;;  %7757 = vmatpush3.bf16.msra.mxu1 %v4079_v53  ;;  %v3716_v53 = vpack.c.bf16 %v3705_v27, %v3704_v58  ;;  %v10510_v31 = vpop.f32.mrf.mxu0 }
 0x32a   :  { %v2621_v50 = vpop.f32.mrf.mxu1  ;;  %8095 = vmatprep.subr.msk.bf16.mxu1 %vm1977_vm2, %v10483_v45  ;;  %11671 = vst [vmem:[#allocation15_spill] sm:$0xff] %v10510_v31 }
 0x32b   :  { %v10498_v14 = vadd.f32 %v2621_v50, %v10399_v24  ;;  %v3706_v50 = vld [vmem:[#allocation2 + $0x101] sm:$0xff] }
 0x32c   :  { %v7599_v61 = vpop.f32.mrf.mxu1  ;;  %v10526_v27 = vpack.c.bf16 %v3707_v32, %v3706_v50 }
 0x32d   :  { %v10503_v41 = vadd.f32 %v7599_v61, %v10403_v15  ;;  %v3709_v61 = vld [vmem:[#allocation2 + $0x131] sm:$0xff] }
 0x32e   :  { %v2624_v10 = vpop.f32.mrf.mxu1 }
 0x32f   :  { %v10508_v63 = vadd.f32 %v2624_v10, %v10407_v47  ;;  %v10521_v47 = vpop.f32.mrf.mxu0 }
 0x330   :  { %v7602_v24 = vpop.f32.mrf.mxu1  ;;  %7727 = vmatmul.mubr.msk.bf16.gmra.mxu1 %vm1540_vm1, %v10505_v43  ;;  %11672 = vst [vmem:[#allocation19_spill] sm:$0xff] %v10521_v47 }
 0x331   :  { %v10515_v3 = vadd.f32 %v7602_v24, %v10414_v35  ;;  %7730 = vmatprep.mubr.msk.bf16.mxu1 %vm1540_vm1, %v3716_v53  ;;  %v3708_v35 = vld [vmem:[#allocation2 + $0x121] sm:$0xff] }
 0x332   :  { %v2637_v15 = vpop.f32.mrf.mxu1  ;;  %v10531_v53 = vpack.c.bf16 %v3709_v61, %v3708_v35  ;;  %v4029_v61 = vld [vmem:[#allocation2 + $0x33] sm:$0xff]  ;;  %v3710_v35 = vld [vmem:[#allocation2 + $0x141] sm:$0xff] }
 0x333   :  { %v10519_v1 = vadd.f32 %v2637_v15, %v10417_v52  ;;  %v10533_v52 = vpop.f32.mrf.mxu0 }
 0x334   :  { %v7603_v22 = vpop.f32.mrf.mxu1  ;;  %11673 = vst [vmem:[#allocation21_spill] sm:$0xff] %v10533_v52 }
 0x335   :  { %v10524_v58 = vadd.f32 %v7603_v22, %v10421_v55  ;;  %v10545_v32 = vpop.f32.mrf.mxu0 }
 0x336   :  { %v2640_v10 = vpop.f32.mrf.mxu1  ;;  %11674 = vst [vmem:[#allocation23_spill] sm:$0xff] %v10545_v32 }
 0x337   :  { %v10529_v24 = vadd.f32 %v2640_v10, %v10426_v46  ;;  %v3711_v46 = vld [vmem:[#allocation2 + $0x151] sm:$0xff]  ;;  %v10555_v42 = vpop.f32.mrf.mxu0 }
 0x338   :  { %v7606_v15 = vpop.f32.mrf.mxu1  ;;  %7731 = vmatmul.mubr.msk.bf16.gmra.mxu1 %vm1540_vm1, %v10526_v27  ;;  %v10550_v31 = vpack.c.bf16 %v3711_v46, %v3710_v35  ;;  %11675 = vst [vmem:[#allocation24_spill] sm:$0xff] %v10555_v42 }
 0x339   :  { %v10538_v47 = vadd.f32 %v7606_v15, %v10435_v21  ;;  %7734 = vmatprep.mubr.msk.bf16.mxu1 %vm1540_vm1, %v10531_v53  ;;  %v4028_v21 = vld [vmem:[#allocation2 + $0x23] sm:$0xff]  ;;  %v10566_v35 = vpop.f32.mrf.mxu0 }
 0x33a   :  { %v2653_v55 = vpop.f32.mrf.mxu1  ;;  %v4044_v36 = vpack.c.bf16 %v4029_v61, %v4028_v21  ;;  %11676 = vst [vmem:[#allocation26_spill] sm:$0xff] %v10566_v35  ;;  %v4030_v21 = vld [vmem:[#allocation2 + $0x43] sm:$0xff] }
 0x33b   :  { %v10543_v50 = vadd.f32 %v2653_v55, %v10440_v29 }
 0x33c   :  { %v7607_v22 = vpop.f32.mrf.mxu1 }
 0x33d   :  { %v10548_v10 = vadd.f32 %v7607_v22, %v10445_v57  ;;  %v4031_v22 = vld [vmem:[#allocation2 + $0x53] sm:$0xff] }
 0x33e   :  { %v2656_v52 = vpop.f32.mrf.mxu1  ;;  %v10571_v32 = vpack.c.bf16 %v4031_v22, %v4030_v21 }
 0x33f   :  { %v10553_v15 = vadd.f32 %v2656_v52, %v10450_v34  ;;  %v4032_v52 = vld [vmem:[#allocation2 + $0x63] sm:$0xff] }
 0x340   :  { %v7610_v29 = vpop.f32.mrf.mxu1  ;;  %7735 = vmatmul.mubr.msk.bf16.gmra.mxu1 %vm1540_vm1, %v10550_v31 }
 0x341   :  { %v10560_v55 = vadd.f32 %v7610_v29, %v10457_v48  ;;  %7758 = vmatprep.mubr.msk.bf16.mxu1 %vm1540_vm1, %v4044_v36  ;;  %v4033_v48 = vld [vmem:[#allocation2 + $0x73] sm:$0xff]  ;;  %v4411_v36 = vsel %vm1977_vm2, %v10483_v45, 0 }
 0x342   :  { %v2669_v57 = vpop.f32.mrf.mxu1 }
 0x343   :  { %v10564_v46 = vadd.f32 %v2669_v57, %v10464_v62  ;;  %v10578_v62 = vpack.c.bf16 %v4033_v48, %v4032_v52  ;;  %v10583_v57 = vld [vmem:[%s11548_s3 + $0x44] sm:$0xf]  ;;  %v4035_v52 = vld [vmem:[#allocation2 + $0x93] sm:$0xff] }
 0x344   :  { %v7611_v34 = vpop.f32.mrf.mxu1 }
 0x345   :  { %v10569_v61 = vadd.f32 %v7611_v34, %v10471_v23  ;;  %v10585_v23 = vpop.f32.mrf.mxu0 }
 0x346   :  { %v2672_v42 = vpop.f32.mrf.mxu1  ;;  %11677 = vst [vmem:[#allocation25_spill] sm:$0xff] %v10585_v23  ;;  %v4036_v23 = vld [vmem:[#allocation2 + $0xe3] sm:$0xff] }
 0x347   :  { %v10576_v29 = vadd.f32 %v2672_v42, %v10476_v59  ;;  %v4034_v42 = vld [vmem:[#allocation2 + $0x83] sm:$0xff]  ;;  %v10599_v21 = vpop.f32.mrf.mxu0 }
 0x348   :  { %v7616_v34 = vpop.f32.mrf.mxu1  ;;  %7759 = vmatmul.mubr.msk.bf16.vlgmr.msra.gmra.mxu1 %vm1540_vm1, %v10571_v32  ;;  %11678 = vst [vmem:[#allocation30_spill] sm:$0xff] %v10599_v21  ;;  %v10604_v35 = vpack.c.bf16 %v4035_v52, %v4034_v42  ;;  %v4038_v52 = vld [vmem:[#allocation2 + $0x103] sm:$0xff] }
 0x349   :  { %v10590_v22 = vadd.f32 %v7616_v34, %v10492_v8  ;;  %7762 = vmatprep.mubr.msk.bf16.mxu1 %vm1540_vm1, %v10578_v62  ;;  %7793 = vmatpush3.bf16.msra.mxu1 %v4411_v36  ;;  %v4037_v36 = vld [vmem:[#allocation2 + $0xf3] sm:$0xff]  ;;  %v10609_v6 = vpop.f32.mrf.mxu0 }
 0x34a   :  { %v2787_v59 = vpop.f32.mrf.mxu1  ;;  %8097 = vmatprep.subr.msk.bf16.mxu1 %vm1977_vm2, %v10583_v57  ;;  %v4048_v19 = vpack.c.bf16 %v4037_v36, %v4036_v23  ;;  %11679 = vst [vmem:[#allocation28_spill] sm:$0xff] %v10609_v6 }
 0x34b   :  { %v10597_v45 = vadd.f32 %v2787_v59, %v10498_v14 }
 0x34c   :  { %v7617_v48 = vpop.f32.mrf.mxu1 }
 0x34d   :  { %v10602_v8 = vadd.f32 %v7617_v48, %v10503_v41  ;;  %v4039_v48 = vld [vmem:[#allocation2 + $0x113] sm:$0xff] }
 0x34e   :  { %v2790_v34 = vpop.f32.mrf.mxu1  ;;  %v10625_v21 = vpack.c.bf16 %v4039_v48, %v4038_v52 }
 0x34f   :  { %v10607_v28 = vadd.f32 %v2790_v34, %v10508_v63  ;;  %v10620_v63 = vpop.f32.mrf.mxu0  ;;  %v4041_v34 = vld [vmem:[#allocation2 + $0x133] sm:$0xff] }
 0x350   :  { %v7620_v14 = vpop.f32.mrf.mxu1  ;;  %7763 = vmatmul.mubr.msk.bf16.gmra.mxu1 %vm1540_vm1, %v10604_v35  ;;  %11680 = vst [vmem:[#allocation27_spill] sm:$0xff] %v10620_v63 }
 0x351   :  { %v10614_v59 = vadd.f32 %v7620_v14, %v10515_v3  ;;  %7766 = vmatprep.mubr.msk.bf16.mxu1 %vm1540_vm1, %v4048_v19  ;;  %v4040_v3 = vld [vmem:[#allocation2 + $0x123] sm:$0xff] }
 0x352   :  { %v2803_v41 = vpop.f32.mrf.mxu1  ;;  %v10630_v19 = vpack.c.bf16 %v4041_v34, %v4040_v3  ;;  %v4042_v3 = vld [vmem:[#allocation2 + $0x143] sm:$0xff] }
 0x353   :  { %v10618_v42 = vadd.f32 %v2803_v41, %v10519_v1  ;;  %v10632_v1 = vpop.f32.mrf.mxu0 }
 0x354   :  { %v7621_v23 = vpop.f32.mrf.mxu1  ;;  %11681 = vst [vmem:[#allocation10_spill] sm:$0xff] %v10632_v1 }
 0x355   :  { %v10623_v36 = vadd.f32 %v7621_v23, %v10524_v58  ;;  %v4360_v23 = vld [vmem:[#allocation2 + $0x30] sm:$0xff] }
 0x356   :  { %v2806_v6 = vpop.f32.mrf.mxu1 }
 0x357   :  { %v10628_v14 = vadd.f32 %v2806_v6, %v10529_v24  ;;  %v4043_v6 = vld [vmem:[#allocation2 + $0x153] sm:$0xff]  ;;  %v10644_v24 = vpop.f32.mrf.mxu0 }
 0x358   :  { %v7624_v41 = vpop.f32.mrf.mxu1  ;;  %7767 = vmatmul.mubr.msk.bf16.gmra.mxu1 %vm1540_vm1, %v10625_v21  ;;  %11682 = vst [vmem:[#allocation12_spill] sm:$0xff] %v10644_v24  ;;  %v10649_v5 = vpack.c.bf16 %v4043_v6, %v4042_v3 }
 0x359   :  { %v10637_v63 = vadd.f32 %v7624_v41, %v10538_v47  ;;  %7770 = vmatprep.mubr.msk.bf16.mxu1 %vm1540_vm1, %v10630_v19  ;;  %v4361_v47 = vld [vmem:[#allocation2 + $0x40] sm:$0xff]  ;;  %v10654_v16 = vpop.f32.mrf.mxu0 }
 0x35a   :  { %v2819_v58 = vpop.f32.mrf.mxu1  ;;  %v4376_v12 = vpack.c.bf16 %v4361_v47, %v4360_v23  ;;  %11683 = vst [vmem:[#allocation20_spill] sm:$0xff] %v10654_v16  ;;  %v4362_v47 = vld [vmem:[#allocation2 + $0x50] sm:$0xff] }
 0x35b   :  { %v10642_v52 = vadd.f32 %v2819_v58, %v10543_v50  ;;  %v10665_v3 = vpop.f32.mrf.mxu0 }
 0x35c   :  { %v7625_v48 = vpop.f32.mrf.mxu1  ;;  %11684 = vst [vmem:[#allocation22_spill] sm:$0xff] %v10665_v3 }
 0x35d   :  { %v10647_v34 = vadd.f32 %v7625_v48, %v10548_v10  ;;  %v4363_v48 = vld [vmem:[#allocation2 + $0x60] sm:$0xff] }
 0x35e   :  { %v2822_v1 = vpop.f32.mrf.mxu1  ;;  %v4377_v24 = vpack.c.bf16 %v4363_v48, %v4362_v47 }
 0x35f   :  { %v10652_v41 = vadd.f32 %v2822_v1, %v10553_v15  ;;  %v4365_v1 = vld [vmem:[#allocation2 + $0x80] sm:$0xff] }
 0x360   :  { %v7628_v50 = vpop.f32.mrf.mxu1  ;;  %7771 = vmatmul.mubr.msk.bf16.gmra.mxu1 %vm1540_vm1, %v10649_v5 }
 0x361   :  { %v10659_v58 = vadd.f32 %v7628_v50, %v10560_v55  ;;  %7794 = vmatprep.mubr.msk.bf16.mxu1 %vm1540_vm1, %v4376_v12  ;;  %v4743_v55 = vsel %vm1977_vm2, %v10583_v57, 0  ;;  %v10678_v50 = vld [vmem:[%s11548_s3 + $0x4c] sm:$0xf] }
 0x362   :  { %v2835_v10 = vpop.f32.mrf.mxu1 }
 0x363   :  { %v10663_v6 = vadd.f32 %v2835_v10, %v10564_v46  ;;  %v4378_v46 = vpack.c.bf16 %v4365_v1, %v4364_v13  ;;  %v10680_v10 = vpop.f32.mrf.mxu0  ;;  %v4366_v13 = vld [vmem:[#allocation2 + $0x90] sm:$0xff]  ;;  %v4369_v1 = vld [vmem:[#allocation2 + $0x100] sm:$0xff] }
 0x364   :  { %v7629_v15 = vpop.f32.mrf.mxu1  ;;  %11685 = vst [vmem:[#allocation31_spill] sm:$0xff] %v10680_v10 }
 0x365   :  { %v10668_v23 = vadd.f32 %v7629_v15, %v10569_v61 }
 0x366   :  { %v2838_v16 = vpop.f32.mrf.mxu1 }
 0x367   :  { %v10673_v12 = vadd.f32 %v2838_v16, %v10576_v29  ;;  %v10692_v29 = vpop.f32.mrf.mxu0 }
 0x368   :  { %v7634_v61 = vpop.f32.mrf.mxu1  ;;  %7795 = vmatmul.mubr.msk.bf16.vlgmr.msra.gmra.mxu1 %vm1540_vm1, %v4377_v24  ;;  %11686 = vst [vmem:[#allocation32_spill] sm:$0xff] %v10692_v29  ;;  %v4373_v29 = vld [vmem:[#allocation2 + $0x140] sm:$0xff] }
 0x369   :  { %v10684_v48 = vadd.f32 %v7634_v61, %v10590_v22  ;;  %7798 = vmatprep.mubr.msk.bf16.mxu1 %vm1540_vm1, %v4378_v46  ;;  %7829 = vmatpush3.bf16.msra.mxu1 %v4743_v55  ;;  %v4367_v22 = vld [vmem:[#allocation2 + $0xa0] sm:$0xff]  ;;  %v4368_v46 = vld [vmem:[#allocation2 + $0xf0] sm:$0xff]  ;;  %v10700_v3 = vpop.f32.mrf.mxu0 }
 0x36a   :  { %v2953_v57 = vpop.f32.mrf.mxu1  ;;  %8099 = vmatprep.subr.msk.bf16.mxu1 %vm1977_vm2, %v10678_v50  ;;  %v4379_v61 = vpack.c.bf16 %v4367_v22, %v4366_v13  ;;  %v4380_v10 = vpack.c.bf16 %v4369_v1, %v4368_v46  ;;  %11687 = vst [vmem:[#allocation33_spill] sm:$0xff] %v10700_v3  ;;  %v4370_v13 = vld [vmem:[#allocation2 + $0x110] sm:$0xff]  ;;  %v4371_v46 = vld [vmem:[#allocation2 + $0x120] sm:$0xff] }
 0x36b   :  { %v10690_v16 = vadd.f32 %v2953_v57, %v10597_v45  ;;  %v10710_v22 = vpop.f32.mrf.mxu0 }
 0x36c   :  { %v7635_v15 = vpop.f32.mrf.mxu1  ;;  %11688 = vst [vmem:[#allocation34_spill] sm:$0xff] %v10710_v22  ;;  %v4693_v22 = vld [vmem:[#allocation2 + $0x42] sm:$0xff] }
 0x36d   :  { %v10695_v24 = vadd.f32 %v7635_v15, %v10602_v8 }
 0x36e   :  { %v2956_v47 = vpop.f32.mrf.mxu1 }
 0x36f   :  { %v10698_v55 = vadd.f32 %v2956_v47, %v10607_v28  ;;  %v4372_v47 = vld [vmem:[#allocation2 + $0x130] sm:$0xff] }
 0x370   :  { %v7638_v45 = vpop.f32.mrf.mxu1  ;;  %7799 = vmatmul.mubr.msk.bf16.gmra.mxu1 %vm1540_vm1, %v4379_v61  ;;  %v4381_v61 = vpack.c.bf16 %v4371_v46, %v4370_v13  ;;  %v4375_v13 = vld [vmem:[#allocation2 + $0x160] sm:$0xff] }
 0x371   :  { %v10704_v57 = vadd.f32 %v7638_v45, %v10614_v59  ;;  %7802 = vmatprep.mubr.msk.bf16.mxu1 %vm1540_vm1, %v4380_v10  ;;  %v4382_v10 = vpack.c.bf16 %v4373_v29, %v4372_v47  ;;  %v10718_v45 = vpop.f32.mrf.mxu0  ;;  %v4374_v47 = vld [vmem:[#allocation2 + $0x150] sm:$0xff] }
 0x372   :  { %v2969_v8 = vpop.f32.mrf.mxu1  ;;  %11689 = vst [vmem:[#allocation35_spill] sm:$0xff] %v10718_v45 }
 0x373   :  { %v10708_v15 = vadd.f32 %v2969_v8, %v10618_v42  ;;  %v10728_v46 = vpop.f32.mrf.mxu0 }
 0x374   :  { %v7639_v28 = vpop.f32.mrf.mxu1  ;;  %11690 = vst [vmem:[#allocation36_spill] sm:$0xff] %v10728_v46  ;;  %v4696_v46 = vld [vmem:[#allocation2 + $0x72] sm:$0xff] }
 0x375   :  { %v10713_v1 = vadd.f32 %v7639_v28, %v10623_v36 }
 0x376   :  { %v2972_v3 = vpop.f32.mrf.mxu1 }
 0x377   :  { %v10716_v59 = vadd.f32 %v2972_v3, %v10628_v14  ;;  %v4692_v3 = vld [vmem:[#allocation2 + $0x32] sm:$0xff] }
 0x378   :  { %v7642_v42 = vpop.f32.mrf.mxu1  ;;  %7803 = vmatmul.mubr.msk.bf16.gmra.mxu1 %vm1540_vm1, %v4381_v61  ;;  %v4383_v61 = vpack.c.bf16 %v4375_v13, %v4374_v47  ;;  %v4695_v13 = vld [vmem:[#allocation2 + $0x62] sm:$0xff] }
 0x379   :  { %v10722_v8 = vadd.f32 %v7642_v42, %v10637_v63  ;;  %7806 = vmatprep.mubr.msk.bf16.mxu1 %vm1540_vm1, %v4382_v10  ;;  %v4708_v10 = vpack.c.bf16 %v4693_v22, %v4692_v3  ;;  %v10736_v42 = vpop.f32.mrf.mxu0  ;;  %v4694_v3 = vld [vmem:[#allocation2 + $0x52] sm:$0xff] }
 0x37a   :  { %v2985_v36 = vpop.f32.mrf.mxu1  ;;  %11691 = vst [vmem:[#allocation37_spill] sm:$0xff] %v10736_v42 }
 0x37b   :  { %v10726_v28 = vadd.f32 %v2985_v36, %v10642_v52  ;;  %v10746_v47 = vpop.f32.mrf.mxu0 }
 0x37c   :  { %v7643_v14 = vpop.f32.mrf.mxu1  ;;  %11692 = vst [vmem:[#allocation38_spill] sm:$0xff] %v10746_v47 }
 0x37d   :  { %v10731_v29 = vadd.f32 %v7643_v14, %v10647_v34 }
 0x37e   :  { %v2988_v45 = vpop.f32.mrf.mxu1 }
 0x37f   :  { %v10734_v63 = vadd.f32 %v2988_v45, %v10652_v41  ;;  %v4697_v45 = vld [vmem:[#allocation2 + $0x82] sm:$0xff] }
 0x380   :  { %v7646_v52 = vpop.f32.mrf.mxu1  ;;  %7807 = vmatmul.mubr.msk.bf16.gmra.mxu1 %vm1540_vm1, %v4383_v61  ;;  %v4709_v61 = vpack.c.bf16 %v4695_v13, %v4694_v3 }
 0x381   :  { %v10740_v36 = vadd.f32 %v7646_v52, %v10659_v58  ;;  %7830 = vmatprep.mubr.msk.bf16.mxu1 %vm1540_vm1, %v4708_v10  ;;  %v5075_v58 = vsel %vm1977_vm2, %v10678_v50, 0  ;;  %v10759_v52 = vld [vmem:[%s11548_s3 + $0x54] sm:$0xf] }
 0x382   :  { %v3001_v34 = vpop.f32.mrf.mxu1 }
 0x383   :  { %v10744_v14 = vadd.f32 %v3001_v34, %v10663_v6  ;;  %v4710_v6 = vpack.c.bf16 %v4697_v45, %v4696_v46  ;;  %v10761_v34 = vpop.f32.mrf.mxu0  ;;  %v4699_v46 = vld [vmem:[#allocation2 + $0xa2] sm:$0xff] }
 0x384   :  { %v7647_v41 = vpop.f32.mrf.mxu1  ;;  %11693 = vst [vmem:[#allocation39_spill] sm:$0xff] %v10761_v34  ;;  %v4701_v45 = vld [vmem:[#allocation2 + $0x102] sm:$0xff] }
 0x385   :  { %v10749_v22 = vadd.f32 %v7647_v41, %v10668_v23 }
 0x386   :  { %v3004_v42 = vpop.f32.mrf.mxu1 }
 0x387   :  { %v10754_v10 = vadd.f32 %v3004_v42, %v10673_v12  ;;  %v10773_v42 = vpop.f32.mrf.mxu0 }
 0x388   :  { %v7652_v23 = vpop.f32.mrf.mxu1  ;;  %7831 = vmatmul.mubr.msk.bf16.vlgmr.msra.gmra.mxu1 %vm1540_vm1, %v4709_v61  ;;  %11694 = vst [vmem:[#allocation40_spill] sm:$0xff] %v10773_v42 }
 0x389   :  { %v10765_v13 = vadd.f32 %v7652_v23, %v10684_v48  ;;  %7834 = vmatprep.mubr.msk.bf16.mxu1 %vm1540_vm1, %v4710_v6  ;;  %7865 = vmatpush3.bf16.msra.mxu1 %v5075_v58  ;;  %v4698_v48 = vld [vmem:[#allocation2 + $0x92] sm:$0xff]  ;;  %v10781_v47 = vpop.f32.mrf.mxu0 }
 0x38a   :  { %v3119_v50 = vpop.f32.mrf.mxu1  ;;  %8101 = vmatprep.subr.msk.bf16.mxu1 %vm1977_vm2, %v10759_v52  ;;  %v4711_v23 = vpack.c.bf16 %v4699_v46, %v4698_v48  ;;  %v4700_v6 = vld [vmem:[#allocation2 + $0xf2] sm:$0xff]  ;;  %11695 = vst [vmem:[#allocation41_spill] sm:$0xff] %v10781_v47  ;;  %v4703_v46 = vld [vmem:[#allocation2 + $0x122] sm:$0xff] }
 0x38b   :  { %v10771_v12 = vadd.f32 %v3119_v50, %v10690_v16  ;;  %v4712_v34 = vpack.c.bf16 %v4701_v45, %v4700_v6  ;;  %v10791_v48 = vpop.f32.mrf.mxu0  ;;  %v4702_v6 = vld [vmem:[#allocation2 + $0x112] sm:$0xff] }
 0x38c   :  { %v7653_v41 = vpop.f32.mrf.mxu1  ;;  %11696 = vst [vmem:[#allocation42_spill] sm:$0xff] %v10791_v48  ;;  %v4713_v42 = vpack.c.bf16 %v4703_v46, %v4702_v6 }
 0x38d   :  { %v10776_v3 = vadd.f32 %v7653_v41, %v10695_v24  ;;  %v10795_v25 = vpop.f32.mrf.mxu0 }
 0x38e   :  { %v3122_v61 = vpop.f32.mrf.mxu1  ;;  %11697 = vst [vmem:[#allocation43_spill] sm:$0xff] %v10795_v25 }
 0x38f   :  { %v10779_v58 = vadd.f32 %v3122_v61, %v10698_v55  ;;  %v4704_v61 = vld [vmem:[#allocation2 + $0x132] sm:$0xff] }
 0x390   :  { %v7656_v16 = vpop.f32.mrf.mxu1  ;;  %7835 = vmatmul.mubr.msk.bf16.gmra.mxu1 %vm1540_vm1, %v4711_v23  ;;  %v4705_v23 = vld [vmem:[#allocation2 + $0x142] sm:$0xff] }
 0x391   :  { %v10785_v50 = vadd.f32 %v7656_v16, %v10704_v57  ;;  %7838 = vmatprep.mubr.msk.bf16.mxu1 %vm1540_vm1, %v4712_v34  ;;  %v4714_v16 = vpack.c.bf16 %v4705_v23, %v4704_v61 }
 0x392   :  { %v3135_v24 = vpop.f32.mrf.mxu1 }
 0x393   :  { %v10789_v41 = vadd.f32 %v3135_v24, %v10708_v15 }
 0x394   :  { %v7657_v55 = vpop.f32.mrf.mxu1 }
 0x395   :  { %v3189_v45 = vadd.f32 %v7657_v55, %v10713_v1  ;;  %v4707_v1 = vld [vmem:[#allocation2 + $0x162] sm:$0xff]  ;;  %v10801_v55 = vpop.f32.mrf.mxu0 }
 0x396   :  { %v3138_v47 = vpop.f32.mrf.mxu1 }
 0x397   :  { %v3187_v57 = vadd.f32 %v3138_v47, %v10716_v59  ;;  %v4706_v59 = vld [vmem:[#allocation2 + $0x152] sm:$0xff]  ;;  %v10805_v25 = vpop.f32.mrf.mxu0 }
 0x398   :  { %v7660_v34 = vpop.f32.mrf.mxu1  ;;  %7839 = vmatmul.mubr.msk.bf16.gmra.mxu1 %vm1540_vm1, %v4713_v42  ;;  %v4715_v61 = vpack.c.bf16 %v4707_v1, %v4706_v59 }
 0x399   :  { %v3192_v15 = vadd.f32 %v7660_v34, %v10722_v8  ;;  %7842 = vmatprep.mubr.msk.bf16.mxu1 %vm1540_vm1, %v4714_v16  ;;  %v10812_v34 = vpop.f32.mrf.mxu0 }
 0x39a   :  { %v3151_v24 = vpop.f32.mrf.mxu1 }
 0x39b   :  { %v3190_v48 = vadd.f32 %v3151_v24, %v10726_v28 }
 0x39c   :  { %v7661_v46 = vpop.f32.mrf.mxu1 }
 0x39d   :  { %v3193_v6 = vadd.f32 %v7661_v46, %v10731_v29 }
 0x39e   :  { %v3154_v47 = vpop.f32.mrf.mxu1 }
 0x39f   :  { %v3191_v23 = vadd.f32 %v3154_v47, %v10734_v63  ;;  %v5407_v63 = vsel %vm1977_vm2, %v10759_v52, 0  ;;  %v5031_v52 = vld [vmem:[#allocation2 + $0xa4] sm:$0xff] }
 0x3a0   :  { %v7664_v42 = vpop.f32.mrf.mxu1  ;;  %7843 = vmatmul.mubr.msk.bf16.gmra.mxu1 %vm1540_vm1, %v4715_v61 }
 0x3a1   :  { %v3196_v8 = vadd.f32 %v7664_v42, %v10740_v36  ;;  %7866 = vmatprep.mubr.msk.bf16.mxu1 %vm1540_vm1, %v10379_v44  ;;  %v6963_v36 = vld [vmem:[%s11548_s3 + $0x5c] sm:$0xf]  ;;  %v10823_v44 = vpop.f32.mrf.mxu0 }
 0x3a2   :  { %v3167_v28 = vpop.f32.mrf.mxu1  ;;  %11698 = vst [vmem:[#allocation44_spill] sm:$0xff] %v10823_v44 }
 0x3a3   :  { %v3194_v16 = vadd.f32 %v3167_v28, %v10744_v14  ;;  %v10832_v47 = vpop.f32.mrf.mxu0  ;;  %v5030_v28 = vld [vmem:[#allocation2 + $0x94] sm:$0xff] }
 0x3a4   :  { %v7665_v29 = vpop.f32.mrf.mxu1  ;;  %11699 = vst [vmem:[#allocation45_spill] sm:$0xff] %v10832_v47 }
 0x3a5   :  { %v3197_v24 = vadd.f32 %v7665_v29, %v10749_v22 }
 0x3a6   :  { %v3170_v1 = vpop.f32.mrf.mxu1 }
 0x3a7   :  { %v10818_v46 = vadd.f32 %v3170_v1, %v10754_v10  ;;  %v10836_v1 = vpop.f32.mrf.mxu0 }
 0x3a8   :  { %v7670_v59 = vpop.f32.mrf.mxu1  ;;  %7867 = vmatmul.mubr.msk.bf16.vlgmr.msra.gmra.mxu1 %vm1540_vm1, %v10384_v0  ;;  %v5043_v0 = vpack.c.bf16 %v5031_v52, %v5030_v28  ;;  %11700 = vst [vmem:[#allocation46_spill] sm:$0xff] %v10836_v1 }
 0x3a9   :  { %v3350_v14 = vadd.f32 %v7670_v59, %v10765_v13  ;;  %7870 = vmatprep.mubr.msk.bf16.mxu1 %vm1540_vm1, %v10405_v9  ;;  %7901 = vmatpush3.bf16.msra.mxu1 %v5407_v63 }
 0x3aa   :  { %v3285_v22 = vpop.f32.mrf.mxu1  ;;  %8103 = vmatprep.subr.msk.bf16.mxu1 %vm1977_vm2, %v6963_v36 }
 0x3ab   :  { %v3348_v10 = vadd.f32 %v3285_v22, %v10771_v12  ;;  %v10843_v22 = vpop.f32.mrf.mxu0 }
 0x3ac   :  { %v7671_v61 = vpop.f32.mrf.mxu1  ;;  %11701 = vst [vmem:[#allocation47_spill] sm:$0xff] %v10843_v22  ;;  %v5357_v22 = vld [vmem:[#allocation2 + $0x51] sm:$0xff] }
 0x3ad   :  { %v3351_v42 = vadd.f32 %v7671_v61, %v10776_v3 }
 0x3ae   :  { %v3288_v29 = vpop.f32.mrf.mxu1 }
 0x3af   :  { %v3349_v13 = vadd.f32 %v3288_v29, %v10779_v58  ;;  %v10845_v58 = vpop.f32.mrf.mxu0 }
 0x3b0   :  { %v7674_v9 = vpop.f32.mrf.mxu1  ;;  %7871 = vmatmul.mubr.msk.bf16.gmra.mxu1 %vm1540_vm1, %v5043_v0  ;;  %11702 = vst [vmem:[#allocation48_spill] sm:$0xff] %v10845_v58  ;;  %v5356_v58 = vld [vmem:[#allocation2 + $0x41] sm:$0xff] }
 0x3b1   :  { %v3354_v63 = vadd.f32 %v7674_v9, %v10785_v50  ;;  %7874 = vmatprep.mubr.msk.bf16.mxu1 %vm1540_vm1, %v10423_v60  ;;  %v5039_v9 = vld [vmem:[#allocation2 + $0x164] sm:$0xff]  ;;  %v5372_v47 = vpack.c.bf16 %v5357_v22, %v5356_v58 }
 0x3b2   :  { %v3301_v12 = vpop.f32.mrf.mxu1 }
 0x3b3   :  { %v3352_v59 = vadd.f32 %v3301_v12, %v10789_v41  ;;  %v10851_v41 = vpop.f32.mrf.mxu0 }
 0x3b4   :  { %v7675_v3 = vpop.f32.mrf.mxu1  ;;  %11703 = vst [vmem:[#allocation49_spill] sm:$0xff] %v10851_v41 }
 0x3b5   :  { %v3355_v61 = vadd.f32 %v7675_v3, %v3189_v45  ;;  %v5038_v3 = vld [vmem:[#allocation2 + $0x154] sm:$0xff]  ;;  %v10853_v44 = vpop.f32.mrf.mxu0 }
 0x3b6   :  { %v3304_v52 = vpop.f32.mrf.mxu1 }
 0x3b7   :  { %v3353_v28 = vadd.f32 %v3304_v52, %v3187_v57  ;;  %v5047_v52 = vpack.c.bf16 %v5039_v9, %v5038_v3 }
 0x3b8   :  { %v7678_v29 = vpop.f32.mrf.mxu1  ;;  %7875 = vmatmul.mubr.msk.bf16.gmra.mxu1 %vm1540_vm1, %v10428_v56 }
 0x3b9   :  { %v3358_v0 = vadd.f32 %v7678_v29, %v3192_v15  ;;  %7878 = vmatprep.mubr.msk.bf16.mxu1 %vm1540_vm1, %v10447_v37  ;;  %v10857_v29 = vpop.f32.mrf.mxu0 }
 0x3ba   :  { %v3317_v60 = vpop.f32.mrf.mxu1 }
 0x3bb   :  { %v3356_v50 = vadd.f32 %v3317_v60, %v3190_v48  ;;  %v10862_v58 = vpop.f32.mrf.mxu0 }
 0x3bc   :  { %v7679_v12 = vpop.f32.mrf.mxu1 }
 0x3bd   :  { %v3359_v45 = vadd.f32 %v7679_v12, %v3193_v6  ;;  %v5359_v12 = vld [vmem:[#allocation2 + $0x71] sm:$0xff] }
 0x3be   :  { %v3320_v57 = vpop.f32.mrf.mxu1  ;;  %v5373_v9 = vpack.c.bf16 %v5359_v12, %v10468_v26 }
 0x3bf   :  { %v3357_v1 = vadd.f32 %v3320_v57, %v3191_v23  ;;  %v5739_v23 = vsel %vm1977_vm2, %v6963_v36, 0  ;;  %v10869_v57 = vpop.f32.mrf.mxu0 }
 0x3c0   :  { %v7682_v56 = vpop.f32.mrf.mxu1  ;;  %7879 = vmatmul.mubr.msk.bf16.gmra.mxu1 %vm1540_vm1, %v5047_v52  ;;  %v5362_v52 = vld [vmem:[#allocation2 + $0xa1] sm:$0xff] }
 0x3c1   :  { %v3362_v37 = vadd.f32 %v7682_v56, %v3196_v8  ;;  %7902 = vmatprep.mubr.msk.bf16.mxu1 %vm1540_vm1, %v5372_v47  ;;  %v5363_v47 = vld [vmem:[#allocation2 + $0xb1] sm:$0xff] }
 0x3c2   :  { %v3333_v48 = vpop.f32.mrf.mxu1 }
 0x3c3   :  { %v3360_v15 = vadd.f32 %v3333_v48, %v3194_v16  ;;  %v10873_v48 = vpop.f32.mrf.mxu0 }
 0x3c4   :  { %v7683_v60 = vpop.f32.mrf.mxu1 }
 0x3c5   :  { %v3363_v6 = vadd.f32 %v7683_v60, %v3197_v24  ;;  %v10880_v12 = vpop.f32.mrf.mxu0 }
 0x3c6   :  { %v3336_v41 = vpop.f32.mrf.mxu1 }
 0x3c7   :  { %v3361_v22 = vadd.f32 %v3336_v41, %v10818_v46  ;;  %v5375_v41 = vpack.c.bf16 %v5363_v47, %v5362_v52 }
 0x3c8   :  { %v7688_v3 = vpop.f32.mrf.mxu1  ;;  %7903 = vmatmul.mubr.msk.bf16.vlgmr.msra.gmra.mxu1 %vm1540_vm1, %v5373_v9 }
 0x3c9   :  { %v3516_v8 = vadd.f32 %v7688_v3, %v3350_v14  ;;  %7906 = vmatprep.mubr.msk.bf16.mxu1 %vm1540_vm1, %v10505_v43  ;;  %7937 = vmatpush3.bf16.msra.mxu1 %v5739_v23 }
 0x3ca   :  { %v3451_v16 = vpop.f32.mrf.mxu1 }
 0x3cb   :  { %v10867_v24 = vadd.f32 %v3451_v16, %v3348_v10 }
 0x3cc   :  { %v7689_v26 = vpop.f32.mrf.mxu1 }
 0x3cd   :  { %v3517_v36 = vadd.f32 %v7689_v26, %v3351_v42 }
 0x3ce   :  { %v3454_v46 = vpop.f32.mrf.mxu1 }
 0x3cf   :  { %v10871_v56 = vadd.f32 %v3454_v46, %v3349_v13  ;;  %v10882_v13 = vpop.f32.mrf.mxu0 }
 0x3d0   :  { %v7692_v14 = vpop.f32.mrf.mxu1  ;;  %7907 = vmatmul.mubr.msk.bf16.gmra.mxu1 %vm1540_vm1, %v5375_v41 }
 0x3d1   :  { %v3520_v43 = vadd.f32 %v7692_v14, %v3354_v63  ;;  %7910 = vmatprep.mubr.msk.bf16.mxu1 %vm1540_vm1, %v10526_v27  ;;  %v10888_v26 = vpop.f32.mrf.mxu0 }
 0x3d2   :  { %v3467_v10 = vpop.f32.mrf.mxu1 }
 0x3d3   :  { %v10878_v60 = vadd.f32 %v3467_v10, %v3352_v59  ;;  %v5370_v59 = vld [vmem:[#allocation2 + $0x161] sm:$0xff]  ;;  %v10890_v10 = vpop.f32.mrf.mxu0 }
 0x3d4   :  { %v7693_v42 = vpop.f32.mrf.mxu1 }
 0x3d5   :  { %v3521_v9 = vadd.f32 %v7693_v42, %v3355_v61  ;;  %v5371_v61 = vld [vmem:[#allocation2 + $0x171] sm:$0xff] }
 0x3d6   :  { %v3470_v23 = vpop.f32.mrf.mxu1 }
 0x3d7   :  { %v3519_v3 = vadd.f32 %v3470_v23, %v3353_v28  ;;  %v5379_v28 = vpack.c.bf16 %v5371_v61, %v5370_v59  ;;  %v5695_v61 = vld [vmem:[#allocation2 + $0xb3] sm:$0xff] }
 0x3d8   :  { %v7696_v16 = vpop.f32.mrf.mxu1  ;;  %7911 = vmatmul.mubr.msk.bf16.gmra.mxu1 %vm1540_vm1, %v10531_v53 }
 0x3d9   :  { %v3524_v47 = vadd.f32 %v7696_v16, %v3358_v0  ;;  %7914 = vmatprep.mubr.msk.bf16.mxu1 %vm1540_vm1, %v10550_v31 }
 0x3da   :  { %v3483_v27 = vpop.f32.mrf.mxu1 }
 0x3db   :  { %v3522_v63 = vadd.f32 %v3483_v27, %v3356_v50  ;;  %v10895_v50 = vpop.f32.mrf.mxu0 }
 0x3dc   :  { %v7697_v52 = vpop.f32.mrf.mxu1 }
 0x3dd   :  { %v3525_v46 = vadd.f32 %v7697_v52, %v3359_v45  ;;  %v10900_v59 = vpop.f32.mrf.mxu0 }
 0x3de   :  { %v3486_v41 = vpop.f32.mrf.mxu1 }
 0x3df   :  { %v3523_v14 = vadd.f32 %v3486_v41, %v3357_v1  ;;  %v3682_v1 = vadd.f32 %v10185_v33, %v3516_v8  ;;  %v5694_v33 = vld [vmem:[#allocation2 + $0xa3] sm:$0xff] }
 0x3e0   :  { %v7700_v42 = vpop.f32.mrf.mxu1  ;;  %7915 = vmatmul.mubr.msk.bf16.gmra.mxu1 %vm1540_vm1, %v5379_v28  ;;  %v5707_v28 = vpack.c.bf16 %v5695_v61, %v5694_v33  ;;  %v5702_v33 = vld [vmem:[#allocation2 + $0x163] sm:$0xff] }
 0x3e1   :  { %v3528_v53 = vadd.f32 %v7700_v42, %v3362_v37  ;;  %7938 = vmatprep.mubr.msk.bf16.mxu1 %vm1540_vm1, %v10571_v32  ;;  %v3686_v42 = vadd.f32 %v10215_v51, %v3520_v43  ;;  %v3685_v51 = vadd.f32 %v10250_v20, %v3519_v3  ;;  %v3691_v3 = vadd.f32 %v10289_v40, %v3525_v46 }
 0x3e2   :  { %v3499_v31 = vpop.f32.mrf.mxu1 }
 0x3e3   :  { %v3526_v0 = vadd.f32 %v3499_v31, %v3360_v15  ;;  %v3683_v15 = vadd.f32 %v10203_v49, %v3517_v36  ;;  %v3687_v36 = vadd.f32 %v10235_v54, %v3521_v9  ;;  %v3688_v54 = vadd.f32 %v10277_v39, %v3522_v63 }
 0x3e4   :  { %v7701_v23 = vpop.f32.mrf.mxu1 }
 0x3e5   :  { %v3529_v16 = vadd.f32 %v7701_v23, %v3363_v6  ;;  %v10907_v6 = vpop.f32.mrf.mxu0  ;;  %v3692_v40 = vadd.f32 %v10311_v7, %v3526_v0  ;;  %v11704_v0 = vld [vmem:[#allocation18_spill] sm:$0xff] }
 0x3e6   :  { %v3502_v45 = vpop.f32.mrf.mxu1 }
 0x3e7   :  { %v10897_v27 = vadd.f32 %v3502_v45, %v3361_v22  ;;  %v10912_v31 = vpop.f32.mrf.mxu0 }
 0x3e8   :  { %v7724_v52 = vpop.f32.mrf.mxu1  ;;  %7939 = vmatmul.mubr.msk.bf16.vlgmr.msra.gmra.mxu1 %vm1540_vm1, %v10578_v62 }
 0x3e9   :  { %v3848_v37 = vadd.f32 %v7724_v52, %v3682_v1  ;;  %7942 = vmatprep.mubr.msk.bf16.mxu1 %vm1540_vm1, %v10604_v35  ;;  %v10920_v23 = vpop.f32.mrf.mxu0 }
 0x3ea   :  { %v3783_v32 = vpop.f32.mrf.mxu1 }
 0x3eb   :  { %v10928_v61 = vpop.f32.mrf.mxu0 }
 0x3ec   :  { %v7725_v22 = vpop.f32.mrf.mxu1 }
 0x3ed   :  { %v10909_v41 = vadd.f32 %v7725_v22, %v3683_v15  ;;  %v3690_v15 = vadd.f32 %v10263_v38, %v3524_v47  ;;  %v10940_v38 = vpop.f32.mrf.mxu0 }
 0x3ee   :  { %v3786_v8 = vpop.f32.mrf.mxu1 }
 0x3f0   :  { %v7728_v62 = vpop.f32.mrf.mxu1  ;;  %7943 = vmatmul.mubr.msk.bf16.gmra.mxu1 %vm1540_vm1, %v5707_v28 }
 0x3f1   :  { %v10915_v35 = vadd.f32 %v7728_v62, %v3686_v42  ;;  %7946 = vmatprep.mubr.msk.bf16.mxu1 %vm1540_vm1, %v10625_v21  ;;  %v3689_v42 = vadd.f32 %v10296_v30, %v3523_v14  ;;  %v3695_v30 = vadd.f32 %v10319_v4, %v3529_v16  ;;  %v11705_v16 = vld [vmem:[#allocation16_spill] sm:$0xff] }
 0x3f2   :  { %v3799_v49 = vpop.f32.mrf.mxu1 }
 0x3f4   :  { %v7729_v45 = vpop.f32.mrf.mxu1 }
 0x3f5   :  { %v10922_v1 = vadd.f32 %v7729_v45, %v3687_v36 }
 0x3f6   :  { %v3802_v43 = vpop.f32.mrf.mxu1 }
 0x3f7   :  { %v10925_v52 = vadd.f32 %v3802_v43, %v3685_v51  ;;  %v10944_v51 = vpop.f32.mrf.mxu0  ;;  %v3680_v43 = vadd.f32 %v10196_v18, %v10867_v24 }
 0x3f8   :  { %v7732_v22 = vpop.f32.mrf.mxu1  ;;  %7947 = vmatmul.mubr.msk.bf16.gmra.mxu1 %vm1540_vm1, %v10630_v19  ;;  %v5703_v19 = vld [vmem:[#allocation2 + $0x173] sm:$0xff] }
 0x3f9   :  { %v10932_v21 = vadd.f32 %v7732_v22, %v3690_v15  ;;  %7950 = vmatprep.mubr.msk.bf16.mxu1 %vm1540_vm1, %v10649_v5  ;;  %v5711_v36 = vpack.c.bf16 %v5703_v19, %v5702_v33  ;;  %v3694_v5 = vadd.f32 %v10299_v11, %v3528_v53  ;;  %v10951_v14 = vpop.f32.mrf.mxu0  ;;  %v3693_v53 = vadd.f32 %v10331_v2, %v10897_v27  ;;  %v11707_v2 = vld [vmem:[#allocation11_spill] sm:$0xff] }
 0x3fa   :  { %v3815_v9 = vpop.f32.mrf.mxu1  ;;  %v4014_v33 = vadd.f32 %v11704_v0, %v3848_v37  ;;  %v4015_v27 = vadd.f32 %v11707_v2, %v10909_v41  ;;  %v11711_v0 = vld [vmem:[#allocation14_spill] sm:$0xff] }
 0x3fb   :  { %v10937_v20 = vadd.f32 %v3815_v9, %v3688_v54  ;;  %v3846_v54 = vadd.f32 %v3783_v32, %v3680_v43  ;;  %v11706_v32 = vld [vmem:[#allocation17_spill] sm:$0xff]  ;;  %v11709_v43 = vld [vmem:[#allocation8_spill] sm:$0xff] }
 0x3fc   :  { %v7733_v47 = vpop.f32.mrf.mxu1 }
 0x3fd   :  { %v3857_v28 = vadd.f32 %v7733_v47, %v3691_v3  ;;  %v3681_v3 = vadd.f32 %v10211_v17, %v10871_v56  ;;  %v10958_v47 = vpop.f32.mrf.mxu0 }
 0x3fe   :  { %v3818_v62 = vpop.f32.mrf.mxu1 }
 0x3ff   :  { %v3855_v45 = vadd.f32 %v3818_v62, %v3689_v42  ;;  %v3847_v24 = vadd.f32 %v3786_v8, %v3681_v3  ;;  %v4012_v42 = vadd.f32 %v11705_v16, %v3846_v54  ;;  %v3684_v62 = vadd.f32 %v11706_v32, %v10878_v60  ;;  %v11712_v16 = vld [vmem:[#allocation29_spill] sm:$0xff]  ;;  %v11713_v32 = vld [vmem:[#allocation7_spill] sm:$0xff] }
 0x400   :  { %v7736_v39 = vpop.f32.mrf.mxu1  ;;  %7951 = vmatmul.mubr.msk.bf16.gmra.mxu1 %vm1540_vm1, %v5711_v36 }
 0x401   :  { %v3860_v63 = vadd.f32 %v7736_v39, %v3694_v5  ;;  %v10965_v5 = vpop.f32.mrf.mxu0  ;;  %v3850_v56 = vadd.f32 %v3799_v49, %v3684_v62  ;;  %v11708_v39 = vld [vmem:[#allocation13_spill] sm:$0xff]  ;;  %v4022_v62 = vadd.f32 %v11713_v32, %v10932_v21  ;;  %v11717_v21 = vld [vmem:[#allocation23_spill] sm:$0xff] }
 0x402   :  { %v3831_v46 = vpop.f32.mrf.mxu1 }
 0x403   :  { %v3858_v15 = vadd.f32 %v3831_v46, %v3692_v40  ;;  %v4013_v40 = vadd.f32 %v11708_v39, %v3847_v24 }
 0x404   :  { %v7737_v22 = vpop.f32.mrf.mxu1 }
 0x405   :  { %v3861_v11 = vadd.f32 %v7737_v22, %v3695_v30  ;;  %v4018_v30 = vadd.f32 %v11709_v43, %v10915_v35  ;;  %v10970_v22 = vpop.f32.mrf.mxu0 }
 0x406   :  { %v3834_v9 = vpop.f32.mrf.mxu1 }
 0x407   :  { %v3859_v7 = vadd.f32 %v3834_v9, %v3693_v53  ;;  %v11710_v53 = vld [vmem:[#allocation9_spill] sm:$0xff]  ;;  %v10975_v49 = vpop.f32.mrf.mxu0 }
 0x408   :  { %v7760_v18 = vpop.f32.mrf.mxu1  ;;  %v4016_v9 = vadd.f32 %v11710_v53, %v3850_v56  ;;  %v11714_v56 = vld [vmem:[#allocation15_spill] sm:$0xff]  ;;  %v11716_v53 = vld [vmem:[#allocation21_spill] sm:$0xff] }
 0x409   :  { %v4180_v4 = vadd.f32 %v7760_v18, %v4014_v33  ;;  %v4019_v33 = vadd.f32 %v11711_v0, %v10922_v1  ;;  %v10981_v2 = vpop.f32.mrf.mxu0  ;;  %v4020_v39 = vadd.f32 %v11714_v56, %v10937_v20 }
 0x40a   :  { %v4115_v19 = vpop.f32.mrf.mxu1 }
 0x40b   :  { %v4178_v36 = vadd.f32 %v4115_v19, %v4012_v42  ;;  %v4017_v42 = vadd.f32 %v11712_v16, %v10925_v52 }
 0x40c   :  { %v7761_v17 = vpop.f32.mrf.mxu1 }
 0x40d   :  { %v4181_v37 = vadd.f32 %v7761_v17, %v4015_v27 }
 0x40e   :  { %v4118_v46 = vpop.f32.mrf.mxu1 }
 0x40f   :  { %v4179_v8 = vadd.f32 %v4118_v46, %v4013_v40  ;;  %v11715_v46 = vld [vmem:[#allocation19_spill] sm:$0xff] }
 0x410   :  { %v7764_v54 = vpop.f32.mrf.mxu1  ;;  %v4023_v43 = vadd.f32 %v11715_v46, %v3857_v28  ;;  %v11721_v46 = vld [vmem:[#allocation25_spill] sm:$0xff] }
 0x411   :  { %v4184_v60 = vadd.f32 %v7764_v54, %v4018_v30  ;;  %v10986_v30 = vpop.f32.mrf.mxu0 }
 0x412   :  { %v4131_v3 = vpop.f32.mrf.mxu1 }
 0x413   :  { %v4182_v41 = vadd.f32 %v4131_v3, %v4016_v9  ;;  %v4021_v9 = vadd.f32 %v11716_v53, %v3855_v45  ;;  %v4025_v45 = vadd.f32 %v11721_v46, %v3859_v7  ;;  %v11722_v53 = vld [vmem:[#allocation30_spill] sm:$0xff] }
 0x414   :  { %v7765_v18 = vpop.f32.mrf.mxu1 }
 0x415   :  { %v4185_v24 = vadd.f32 %v7765_v18, %v4019_v33  ;;  %v4026_v33 = vadd.f32 %v11717_v21, %v3860_v63  ;;  %v10990_v18 = vpop.f32.mrf.mxu0  ;;  %v4346_v63 = vadd.f32 %v11722_v53, %v4180_v4 }
 0x416   :  { %v4134_v19 = vpop.f32.mrf.mxu1 }
 0x417   :  { %v4183_v35 = vadd.f32 %v4134_v19, %v4017_v42  ;;  %v11718_v19 = vld [vmem:[#allocation24_spill] sm:$0xff]  ;;  %v10994_v56 = vpop.f32.mrf.mxu0 }
 0x418   :  { %v7768_v27 = vpop.f32.mrf.mxu1  ;;  %v4024_v20 = vadd.f32 %v11718_v19, %v3858_v15  ;;  %11720 = vst [vmem:[#allocation18_spill] sm:$0xff] %v10994_v56 }
 0x419   :  { %v4188_v17 = vadd.f32 %v7768_v27, %v4022_v62  ;;  %v11719_v27 = vld [vmem:[#allocation26_spill] sm:$0xff] }
 0x41a   :  { %v4147_v1 = vpop.f32.mrf.mxu1  ;;  %v4027_v28 = vadd.f32 %v11719_v27, %v3861_v11 }
 0x41b   :  { %v4186_v40 = vadd.f32 %v4147_v1, %v4020_v39 }
 0x41c   :  { %v7769_v54 = vpop.f32.mrf.mxu1 }
 0x41d   :  { %v4189_v52 = vadd.f32 %v7769_v54, %v4023_v43 }
 0x41e   :  { %v4150_v3 = vpop.f32.mrf.mxu1 }
 0x41f   :  { %v4187_v0 = vadd.f32 %v4150_v3, %v4021_v9  ;;  %v10998_v9 = vpop.f32.mrf.mxu0 }
 0x420   :  { %v7772_v16 = vpop.f32.mrf.mxu1  ;;  %11723 = vst [vmem:[#allocation16_spill] sm:$0xff] %v10998_v9 }
 0x421   :  { %v4192_v42 = vadd.f32 %v7772_v16, %v4026_v33  ;;  %v11724_v33 = vld [vmem:[#allocation28_spill] sm:$0xff] }
 0x422   :  { %v4163_v32 = vpop.f32.mrf.mxu1  ;;  %v4344_v15 = vadd.f32 %v11724_v33, %v4178_v36 }
 0x423   :  { %v4190_v62 = vadd.f32 %v4163_v32, %v4024_v20  ;;  %v11725_v20 = vld [vmem:[#allocation27_spill] sm:$0xff]  ;;  %v11002_v32 = vpop.f32.mrf.mxu0 }
 0x424   :  { %v7773_v39 = vpop.f32.mrf.mxu1  ;;  %v4347_v11 = vadd.f32 %v11725_v20, %v4181_v37  ;;  %11726 = vst [vmem:[#allocation17_spill] sm:$0xff] %v11002_v32 }
 0x425   :  { %v4193_v1 = vadd.f32 %v7773_v39, %v4027_v28  ;;  %v11727_v39 = vld [vmem:[#allocation10_spill] sm:$0xff]  ;;  %v11006_v53 = vpop.f32.mrf.mxu0 }
 0x426   :  { %v4166_v43 = vpop.f32.mrf.mxu1  ;;  %v4345_v7 = vadd.f32 %v11727_v39, %v4179_v8  ;;  %11729 = vst [vmem:[#allocation11_spill] sm:$0xff] %v11006_v53 }
 0x427   :  { %v4191_v54 = vadd.f32 %v4166_v43, %v4025_v45  ;;  %v11728_v43 = vld [vmem:[#allocation12_spill] sm:$0xff]  ;;  %v11010_v20 = vpop.f32.mrf.mxu0 }
 0x428   :  { %v7796_v3 = vpop.f32.mrf.mxu1  ;;  %v4350_v4 = vadd.f32 %v11728_v43, %v4184_v60  ;;  %11732 = vst [vmem:[#allocation13_spill] sm:$0xff] %v11010_v20 }
 0x429   :  { %v4512_v21 = vadd.f32 %v7796_v3, %v4346_v63  ;;  %v11730_v3 = vld [vmem:[#allocation20_spill] sm:$0xff]  ;;  %v11014_v43 = vpop.f32.mrf.mxu0 }
 0x42a   :  { %v4447_v16 = vpop.f32.mrf.mxu1  ;;  %v4348_v36 = vadd.f32 %v11730_v3, %v4182_v41  ;;  %11735 = vst [vmem:[#allocation8_spill] sm:$0xff] %v11014_v43 }
 0x42b   :  { %v4510_v19 = vadd.f32 %v4447_v16, %v4344_v15  ;;  %v11731_v16 = vld [vmem:[#allocation22_spill] sm:$0xff] }
 0x42c   :  { %v7797_v27 = vpop.f32.mrf.mxu1  ;;  %v4351_v37 = vadd.f32 %v11731_v16, %v4185_v24  ;;  %v11018_v16 = vpop.f32.mrf.mxu0 }
 0x42d   :  { %v4513_v28 = vadd.f32 %v7797_v27, %v4347_v11  ;;  %v11733_v27 = vld [vmem:[#allocation31_spill] sm:$0xff]  ;;  %11738 = vst [vmem:[#allocation9_spill] sm:$0xff] %v11018_v16 }
 0x42e   :  { %v4450_v46 = vpop.f32.mrf.mxu1  ;;  %v4349_v8 = vadd.f32 %v11733_v27, %v4183_v35 }
 0x42f   :  { %v4511_v45 = vadd.f32 %v4450_v46, %v4345_v7  ;;  %v11734_v46 = vld [vmem:[#allocation32_spill] sm:$0xff] }
 0x430   :  { %v7800_v9 = vpop.f32.mrf.mxu1  ;;  %v4354_v60 = vadd.f32 %v11734_v46, %v4188_v17  ;;  %v11022_v46 = vpop.f32.mrf.mxu0 }
 0x431   :  { %v4516_v63 = vadd.f32 %v7800_v9, %v4350_v4  ;;  %v11736_v4 = vld [vmem:[#allocation33_spill] sm:$0xff] }
 0x432   :  { %v4463_v33 = vpop.f32.mrf.mxu1  ;;  %v4352_v41 = vadd.f32 %v11736_v4, %v4186_v40 }
 0x433   :  { %v4514_v15 = vadd.f32 %v4463_v33, %v4348_v36  ;;  %v11737_v33 = vld [vmem:[#allocation34_spill] sm:$0xff] }
 0x434   :  { %v7801_v56 = vpop.f32.mrf.mxu1  ;;  %v4355_v24 = vadd.f32 %v11737_v33, %v4189_v52  ;;  %v11026_v33 = vpop.f32.mrf.mxu0 }
 0x435   :  { %v4517_v11 = vadd.f32 %v7801_v56, %v4351_v37  ;;  %v11739_v37 = vld [vmem:[#allocation35_spill] sm:$0xff]  ;;  %11743 = vst [vmem:[#allocation14_spill] sm:$0xff] %v11026_v33 }
 0x436   :  { %v4466_v39 = vpop.f32.mrf.mxu1  ;;  %v4353_v35 = vadd.f32 %v11739_v37, %v4187_v0 }
 0x437   :  { %v4515_v7 = vadd.f32 %v4466_v39, %v4349_v8  ;;  %v11740_v39 = vld [vmem:[#allocation36_spill] sm:$0xff] }
 0x438   :  { %v7804_v53 = vpop.f32.mrf.mxu1  ;;  %v4358_v17 = vadd.f32 %v11740_v39, %v4192_v42  ;;  %v11030_v39 = vpop.f32.mrf.mxu0 }
 0x439   :  { %v4520_v9 = vadd.f32 %v7804_v53, %v4354_v60  ;;  %v11741_v60 = vld [vmem:[#allocation37_spill] sm:$0xff] }
 0x43a   :  { %v4479_v3 = vpop.f32.mrf.mxu1  ;;  %v4356_v40 = vadd.f32 %v11741_v60, %v4190_v62 }
 0x43b   :  { %v4518_v36 = vadd.f32 %v4479_v3, %v4352_v41  ;;  %v11742_v3 = vld [vmem:[#allocation38_spill] sm:$0xff] }
 0x43c   :  { %v7805_v32 = vpop.f32.mrf.mxu1  ;;  %v4359_v52 = vadd.f32 %v11742_v3, %v4193_v1  ;;  %v11034_v3 = vpop.f32.mrf.mxu0 }
 0x43d   :  { %v4521_v56 = vadd.f32 %v7805_v32, %v4355_v24  ;;  %v11744_v24 = vld [vmem:[#allocation39_spill] sm:$0xff]  ;;  %11748 = vst [vmem:[#allocation29_spill] sm:$0xff] %v11034_v3 }
 0x43e   :  { %v4482_v27 = vpop.f32.mrf.mxu1  ;;  %v4357_v0 = vadd.f32 %v11744_v24, %v4191_v54 }
 0x43f   :  { %v4519_v8 = vadd.f32 %v4482_v27, %v4353_v35  ;;  %v11745_v27 = vld [vmem:[#allocation40_spill] sm:$0xff] }
 0x440   :  { %v7808_v43 = vpop.f32.mrf.mxu1  ;;  %v4678_v42 = vadd.f32 %v11745_v27, %v4512_v21  ;;  %v4682_v21 = vadd.f32 %v10801_v55, %v4516_v63 }
 0x441   :  { %v4524_v53 = vadd.f32 %v7808_v43, %v4358_v17  ;;  %v11746_v17 = vld [vmem:[#allocation41_spill] sm:$0xff] }
 0x442   :  { %v4495_v4 = vpop.f32.mrf.mxu1  ;;  %v4676_v62 = vadd.f32 %v11746_v17, %v4510_v19  ;;  %v4680_v19 = vadd.f32 %v10805_v25, %v4514_v15 }
 0x443   :  { %v4522_v41 = vadd.f32 %v4495_v4, %v4356_v40  ;;  %v11747_v4 = vld [vmem:[#allocation42_spill] sm:$0xff] }
 0x444   :  { %v7809_v20 = vpop.f32.mrf.mxu1  ;;  %v4679_v1 = vadd.f32 %v11747_v4, %v4513_v28  ;;  %v4683_v28 = vadd.f32 %v10812_v34, %v4517_v11  ;;  %v11752_v4 = vld [vmem:[#allocation44_spill] sm:$0xff] }
 0x445   :  { %v4525_v32 = vadd.f32 %v7809_v20, %v4359_v52  ;;  %v11749_v52 = vld [vmem:[#allocation43_spill] sm:$0xff] }
 0x446   :  { %v4498_v37 = vpop.f32.mrf.mxu1  ;;  %v4677_v54 = vadd.f32 %v11749_v52, %v4511_v45  ;;  %v4681_v45 = vadd.f32 %v11752_v4, %v4515_v7 }
 0x447   :  { %v4523_v35 = vadd.f32 %v4498_v37, %v4357_v0  ;;  %v11038_v37 = vpop.f32.mrf.mxu0 }
 0x448   :  { %v7832_v16 = vpop.f32.mrf.mxu1  ;;  %11750 = vst [vmem:[#allocation7_spill] sm:$0xff] %v11038_v37 }
 0x449   :  { %v4844_v43 = vadd.f32 %v7832_v16, %v4678_v42 }
 0x44a   :  { %v4779_v60 = vpop.f32.mrf.mxu1 }
 0x44b   :  { %v4842_v40 = vadd.f32 %v4779_v60, %v4676_v62  ;;  %v11042_v62 = vpop.f32.mrf.mxu0 }
 0x44c   :  { %v7833_v33 = vpop.f32.mrf.mxu1  ;;  %11751 = vst [vmem:[#allocation15_spill] sm:$0xff] %v11042_v62 }
 0x44d   :  { %v4845_v20 = vadd.f32 %v7833_v33, %v4679_v1  ;;  %v11046_v63 = vpop.f32.mrf.mxu0 }
 0x44e   :  { %v4782_v24 = vpop.f32.mrf.mxu1  ;;  %11754 = vst [vmem:[#allocation19_spill] sm:$0xff] %v11046_v63 }
 0x44f   :  { %v4843_v0 = vadd.f32 %v4782_v24, %v4677_v54  ;;  %v11753_v54 = vld [vmem:[#allocation45_spill] sm:$0xff]  ;;  %v11050_v11 = vpop.f32.mrf.mxu0 }
 0x450   :  { %v7836_v27 = vpop.f32.mrf.mxu1  ;;  %v4686_v55 = vadd.f32 %v11753_v54, %v4520_v9 }
 0x451   :  { %v4848_v16 = vadd.f32 %v7836_v27, %v4682_v21  ;;  %v11755_v27 = vld [vmem:[#allocation46_spill] sm:$0xff]  ;;  %v11054_v54 = vpop.f32.mrf.mxu0 }
 0x452   :  { %v4795_v42 = vpop.f32.mrf.mxu1  ;;  %v4684_v25 = vadd.f32 %v11755_v27, %v4518_v36  ;;  %v4688_v36 = vadd.f32 %v10853_v44, %v4522_v41  ;;  %v5008_v41 = vadd.f32 %v10873_v48, %v4842_v40 }
 0x453   :  { %v4846_v17 = vadd.f32 %v4795_v42, %v4680_v19  ;;  %v11756_v42 = vld [vmem:[#allocation47_spill] sm:$0xff] }
 0x454   :  { %v7837_v60 = vpop.f32.mrf.mxu1  ;;  %v4687_v34 = vadd.f32 %v11756_v42, %v4521_v56  ;;  %v4691_v56 = vadd.f32 %v10857_v29, %v4525_v32  ;;  %v5011_v32 = vadd.f32 %v10880_v12, %v4845_v20 }
 0x455   :  { %v4849_v33 = vadd.f32 %v7837_v60, %v4683_v28  ;;  %v11757_v60 = vld [vmem:[#allocation48_spill] sm:$0xff]  ;;  %v5012_v48 = vadd.f32 %v10890_v10, %v4846_v17  ;;  %v6059_v10 = vld [vmem:[%s11550_s5] sm:$0xff] }
 0x456   :  { %v4798_v1 = vpop.f32.mrf.mxu1  ;;  %v4685_v7 = vadd.f32 %v11757_v60, %v4519_v8  ;;  %v4689_v8 = vadd.f32 %v10862_v58, %v4523_v35  ;;  %v5009_v58 = vadd.f32 %v10882_v13, %v4843_v0  ;;  %8004 = vmatprep.mubr.f32.mxu1 %v6059_v10 }
 0x457   :  { %v4847_v52 = vadd.f32 %v4798_v1, %v4681_v45  ;;  %v11758_v1 = vld [vmem:[#allocation49_spill] sm:$0xff]  ;;  %v5015_v12 = vadd.f32 %v10895_v50, %v4849_v33 }
 0x458   :  { %v7840_v24 = vpop.f32.mrf.mxu1  ;;  %v4690_v9 = vadd.f32 %v11758_v1, %v4524_v53 }
 0x459   :  { %v4852_v21 = vadd.f32 %v7840_v24, %v4686_v55  ;;  %v5013_v13 = vadd.f32 %v10900_v59, %v4847_v52 }
 0x45a   :  { %v4811_v15 = vpop.f32.mrf.mxu1 }
 0x45b   :  { %v4850_v19 = vadd.f32 %v4811_v15, %v4684_v25  ;;  %v11060_v25 = vpop.f32.mrf.mxu0 }
 0x45c   :  { %v7841_v37 = vpop.f32.mrf.mxu1 }
 0x45d   :  { %v4853_v28 = vadd.f32 %v7841_v37, %v4687_v34  ;;  %v5010_v34 = vadd.f32 %v10869_v57, %v4844_v43  ;;  %v5014_v57 = vadd.f32 %v10888_v26, %v4848_v16  ;;  %v5018_v26 = vadd.f32 %v10907_v6, %v4852_v21 }
 0x45e   :  { %v4814_v4 = vpop.f32.mrf.mxu1  ;;  %v5016_v17 = vadd.f32 %v10912_v31, %v4850_v19 }
 0x45f   :  { %v4851_v45 = vadd.f32 %v4814_v4, %v4685_v7  ;;  %v5019_v59 = vadd.f32 %v10920_v23, %v4853_v28 }
 0x460   :  { %v7844_v63 = vpop.f32.mrf.mxu1 }
 0x461   :  { %v11056_v55 = vadd.f32 %v7844_v63, %v4690_v9  ;;  %v11068_v63 = vpop.f32.mrf.mxu0 }
 0x462   :  { %v4827_v24 = vpop.f32.mrf.mxu1 }
 0x463   :  { %v4854_v27 = vadd.f32 %v4827_v24, %v4688_v36  ;;  %v11072_v4 = vpop.f32.mrf.mxu0 }
 0x464   :  { %v7845_v37 = vpop.f32.mrf.mxu1 }
 0x465   :  { %v11062_v15 = vadd.f32 %v7845_v37, %v4691_v56  ;;  %v11076_v43 = vpop.f32.mrf.mxu0  ;;  %v5020_v31 = vadd.f32 %v10944_v51, %v4854_v27 }
 0x466   :  { %v4830_v42 = vpop.f32.mrf.mxu1 }
 0x467   :  { %v11065_v53 = vadd.f32 %v4830_v42, %v4689_v8  ;;  %v11080_v20 = vpop.f32.mrf.mxu0 }
 0x468   :  { %v7868_v60 = vpop.f32.mrf.mxu1 }
 0x469   :  { %v5176_v44 = vadd.f32 %v7868_v60, %v5010_v34  ;;  %v11088_v16 = vpop.f32.mrf.mxu0 }
 0x46a   :  { %v5111_v7 = vpop.f32.mrf.mxu1 }
 0x46b   :  { %v5174_v29 = vadd.f32 %v5111_v7, %v5008_v41  ;;  %v11099_v52 = vpop.f32.mrf.mxu0  ;;  %v5017_v7 = vadd.f32 %v10928_v61, %v4851_v45 }
 0x46c   :  { %v7869_v1 = vpop.f32.mrf.mxu1 }
 0x46d   :  { %v5177_v9 = vadd.f32 %v7869_v1, %v5011_v32 }
 0x46e   :  { %v5114_v35 = vpop.f32.mrf.mxu1 }
 0x46f   :  { %v5175_v36 = vadd.f32 %v5114_v35, %v5009_v58  ;;  %v11106_v58 = vpop.f32.mrf.mxu0  ;;  %v5343_v27 = vadd.f32 %v10975_v49, %v5177_v9 }
 0x470   :  { %v7872_v24 = vpop.f32.mrf.mxu1 }
 0x471   :  { %v5180_v56 = vadd.f32 %v7872_v24, %v5014_v57  ;;  %v11109_v24 = vpop.f32.mrf.mxu0 }
 0x472   :  { %v5127_v40 = vpop.f32.mrf.mxu1 }
 0x473   :  { %v5178_v37 = vadd.f32 %v5127_v40, %v5012_v48  ;;  %v5342_v40 = vadd.f32 %v10965_v5, %v5176_v44  ;;  %v11115_v61 = vpop.f32.mrf.mxu0  ;;  %v5346_v10 = vadd.f32 %v10986_v30, %v5180_v56 }
 0x474   :  { %v7873_v8 = vpop.f32.mrf.mxu1 }
 0x475   :  { %v11082_v42 = vadd.f32 %v7873_v8, %v5015_v12  ;;  %v5340_v8 = vadd.f32 %v10970_v22, %v5174_v29 }
 0x476   :  { %v5130_v0 = vpop.f32.mrf.mxu1 }
 0x477   :  { %v11085_v34 = vadd.f32 %v5130_v0, %v5013_v13  ;;  %v11123_v0 = vpop.f32.mrf.mxu0 }
 0x478   :  { %v7876_v60 = vpop.f32.mrf.mxu1  ;;  %11761 = vst [vmem:[#allocation24_spill] sm:$0xff] %v11123_v0 }
 0x479   :  { %v11093_v50 = vadd.f32 %v7876_v60, %v5018_v26  ;;  %v5341_v60 = vadd.f32 %v10981_v2, %v5175_v36 }
 0x47a   :  { %v5143_v33 = vpop.f32.mrf.mxu1 }
 0x47b   :  { %v11096_v41 = vadd.f32 %v5143_v33, %v5016_v17  ;;  %v11131_v17 = vpop.f32.mrf.mxu0  ;;  %v5344_v33 = vadd.f32 %v10990_v18, %v5178_v37 }
 0x47c   :  { %v7877_v6 = vpop.f32.mrf.mxu1  ;;  %11763 = vst [vmem:[#allocation25_spill] sm:$0xff] %v11131_v17 }
 0x47d   :  { %v11101_v21 = vadd.f32 %v7877_v6, %v5019_v59  ;;  %v11138_v59 = vpop.f32.mrf.mxu0 }
 0x47e   :  { %v5146_v32 = vpop.f32.mrf.mxu1  ;;  %11764 = vst [vmem:[#allocation30_spill] sm:$0xff] %v11138_v59  ;;  %v5023_v59 = vadd.f32 %v10951_v14, %v11062_v15 }
 0x47f   :  { %v11104_v1 = vadd.f32 %v5146_v32, %v5017_v7  ;;  %v11144_v36 = vpop.f32.mrf.mxu0 }
 0x480   :  { %v7880_v35 = vpop.f32.mrf.mxu1  ;;  %11765 = vst [vmem:[#allocation28_spill] sm:$0xff] %v11144_v36 }
 0x481   :  { %v11148_v56 = vpop.f32.mrf.mxu0 }
 0x482   :  { %v5159_v19 = vpop.f32.mrf.mxu1  ;;  %11766 = vst [vmem:[#allocation27_spill] sm:$0xff] %v11148_v56 }
 0x483   :  { %v5186_v57 = vadd.f32 %v5159_v19, %v5020_v31  ;;  %v11150_v19 = vpop.f32.mrf.mxu0 }
 0x484   :  { %v7881_v23 = vpop.f32.mrf.mxu1  ;;  %11767 = vst [vmem:[#allocation10_spill] sm:$0xff] %v11150_v19 }
 0x485   :  { %v11112_v28 = vadd.f32 %v11022_v46, %v5186_v57  ;;  %v11152_v57 = vpop.f32.mrf.mxu0  ;;  %v5189_v19 = vadd.f32 %v7881_v23, %v5023_v59 }
 0x486   :  { %v5162_v48 = vpop.f32.mrf.mxu1 }
 0x488   :  { %v7904_v45 = vpop.f32.mrf.mxu1 }
 0x489   :  { %v11117_v12 = vadd.f32 %v7904_v45, %v5342_v40 }
 0x48a   :  { %v5443_v13 = vpop.f32.mrf.mxu1 }
 0x48b   :  { %11759 = vst [vmem:[#allocation21_spill] sm:$0xff] %v11117_v12  ;;  %v11120_v51 = vadd.f32 %v5443_v13, %v5340_v8  ;;  %v11154_v8 = vpop.f32.mrf.mxu0 }
 0x48c   :  { %v7905_v26 = vpop.f32.mrf.mxu1  ;;  %11768 = vst [vmem:[#allocation12_spill] sm:$0xff] %v11154_v8 }
 0x48d   :  { %11760 = vst [vmem:[#allocation23_spill] sm:$0xff] %v11120_v51  ;;  %v11125_v46 = vadd.f32 %v7905_v26, %v5343_v27  ;;  %v11160_v26 = vpop.f32.mrf.mxu0 }
 0x48e   :  { %v5446_v5 = vpop.f32.mrf.mxu1 }
 0x48f   :  { %v11128_v44 = vadd.f32 %v5446_v5, %v5341_v60 }
 0x490   :  { %v7908_v22 = vpop.f32.mrf.mxu1 }
 0x491   :  { %11762 = vst [vmem:[#allocation26_spill] sm:$0xff] %v11128_v44  ;;  %v11133_v29 = vadd.f32 %v7908_v22, %v5346_v10  ;;  %v11166_v10 = vpop.f32.mrf.mxu0  ;;  %v11774_v44 = vld [vmem:[#allocation9_spill] sm:$0xff] }
 0x492   :  { %v5459_v49 = vpop.f32.mrf.mxu1 }
 0x493   :  { %v11136_v9 = vadd.f32 %v5459_v49, %v5344_v33  ;;  %v5022_v49 = vadd.f32 %v10940_v38, %v11056_v55  ;;  %v7967_v17 = vpop.f32.mrf.mxu0 }
 0x494   :  { %v11140_v6 = vpop.f32.mrf.mxu1 }
 0x495   :  { %v5188_v0 = vadd.f32 %v7880_v35, %v5022_v49  ;;  %v11180_v51 = vpop.f32.mrf.mxu0  ;;  %v11775_v35 = vld [vmem:[#allocation14_spill] sm:$0xff] }
 0x496   :  { %v11142_v2 = vpop.f32.mrf.mxu1  ;;  %v5355_v49 = vadd.f32 %v11775_v35, %v5189_v19 }
 0x497   :  { %v5354_v8 = vadd.f32 %v11774_v44, %v5188_v0  ;;  %v7970_v3 = vpop.f32.mrf.mxu0  ;;  %v11777_v0 = vld [vmem:[#allocation17_spill] sm:$0xff] }
 0x498   :  { %v7912_v7 = vpop.f32.mrf.mxu1 }
 0x49a   :  { %v11146_v30 = vpop.f32.mrf.mxu1 }
 0x49c   :  { %v7913_v32 = vpop.f32.mrf.mxu1 }
 0x49e   :  { %v5478_v31 = vpop.f32.mrf.mxu1 }
 0x4a0   :  { %v7916_v18 = vpop.f32.mrf.mxu1 }
 0x4a1   :  { %v5520_v55 = vadd.f32 %v7916_v18, %v5354_v8 }
 0x4a2   :  { %v5491_v37 = vpop.f32.mrf.mxu1 }
 0x4a3   :  { %v5518_v15 = vadd.f32 %v5491_v37, %v11112_v28 }
 0x4a4   :  { %v7917_v40 = vpop.f32.mrf.mxu1 }
 0x4a5   :  { %v5521_v62 = vadd.f32 %v7917_v40, %v5355_v49  ;;  %v5684_v28 = vadd.f32 %v11106_v58, %v5518_v15 }
 0x4a6   :  { %v5494_v45 = vpop.f32.mrf.mxu1 }
 0x4a7   :  { %v5687_v37 = vadd.f32 %v11109_v24, %v5521_v62 }
 0x4a8   :  { %v11156_v13 = vpop.f32.mrf.mxu1 }
 0x4a9   :  { %11769 = vst [vmem:[#allocation20_spill] sm:$0xff] %v11156_v13  ;;  %v5021_v13 = vadd.f32 %v10958_v47, %v11065_v53  ;;  %v5686_v47 = vadd.f32 %v11099_v52, %v5520_v55  ;;  %v5989_v53 = vpop.f32.mrf.mxu0  ;;  %v11779_v52 = vld [vmem:[#allocation11_spill] sm:$0xff] }
 0x4aa   :  { %v11158_v27 = vpop.f32.mrf.mxu1  ;;  %v5348_v40 = vadd.f32 %v11779_v52, %v11096_v41 }
 0x4ab   :  { %11770 = vst [vmem:[#allocation22_spill] sm:$0xff] %v11158_v27  ;;  %v5187_v38 = vadd.f32 %v5162_v48, %v5021_v13  ;;  %v5350_v48 = vadd.f32 %v11777_v0, %v11093_v50  ;;  %v11778_v13 = vld [vmem:[#allocation8_spill] sm:$0xff] }
 0x4ac   :  { %v11162_v60 = vpop.f32.mrf.mxu1  ;;  %v5514_v58 = vadd.f32 %v11146_v30, %v5348_v40 }
 0x4ad   :  { %11771 = vst [vmem:[#allocation31_spill] sm:$0xff] %v11162_v60  ;;  %v5353_v23 = vadd.f32 %v11030_v39, %v5187_v38  ;;  %v5516_v19 = vadd.f32 %v7912_v7, %v5350_v48  ;;  %v7971_v39 = vpop.f32.mrf.mxu0 }
 0x4ae   :  { %v11164_v5 = vpop.f32.mrf.mxu1  ;;  %v5680_v48 = vadd.f32 %v11076_v43, %v5514_v58  ;;  %v11794_v58 = vld [vmem:[#allocation7_spill] sm:$0xff] }
 0x4af   :  { %11772 = vst [vmem:[#allocation32_spill] sm:$0xff] %v11164_v5  ;;  %v5519_v18 = vadd.f32 %v5494_v45, %v5353_v23  ;;  %v5682_v62 = vadd.f32 %v11072_v4, %v5516_v19  ;;  %v5676_v19 = vadd.f32 %v11054_v54, %v11136_v9 }
 0x4b0   :  { %v11168_v22 = vpop.f32.mrf.mxu1 }
 0x4b1   :  { %v5685_v7 = vadd.f32 %v11115_v61, %v5519_v18 }
 0x4b2   :  { %v11170_v33 = vpop.f32.mrf.mxu1 }
 0x4b3   :  { %11773 = vst [vmem:[#allocation33_spill] sm:$0xff] %v11170_v33  ;;  %v11776_v33 = vld [vmem:[#allocation13_spill] sm:$0xff] }
 0x4b4   :  { %v11174_v36 = vpop.f32.mrf.mxu1  ;;  %v5351_v56 = vadd.f32 %v11776_v33, %v11101_v21  ;;  %v5349_v21 = vadd.f32 %v11778_v13, %v11104_v1  ;;  %v11780_v1 = vld [vmem:[#allocation18_spill] sm:$0xff]  ;;  %v11783_v13 = vld [vmem:[#allocation27_spill] sm:$0xff] }
 0x4b5   :  { %v5347_v35 = vadd.f32 %v11780_v1, %v11082_v42  ;;  %v11787_v9 = vld [vmem:[#allocation31_spill] sm:$0xff] }
 0x4b6   :  { %v11176_v27 = vpop.f32.mrf.mxu1  ;;  %v5517_v44 = vadd.f32 %v7913_v32, %v5351_v56  ;;  %v5515_v38 = vadd.f32 %v5478_v31, %v5349_v21  ;;  %v5992_v31 = vpop.f32.mrf.mxu0 }
 0x4b8   :  { %v7948_v5 = vpop.f32.mrf.mxu1  ;;  %v5683_v50 = vadd.f32 %v11080_v20, %v5517_v44  ;;  %v5513_v20 = vadd.f32 %v11140_v6, %v5347_v35  ;;  %v5681_v23 = vadd.f32 %v11088_v16, %v5515_v38  ;;  %v11789_v38 = vld [vmem:[#allocation26_spill] sm:$0xff]  ;;  %v11793_v35 = vld [vmem:[#allocation23_spill] sm:$0xff] }
 0x4b9   :  { %v5848_v61 = vadd.f32 %v7948_v5, %v5682_v62  ;;  %v5672_v62 = vadd.f32 %v11794_v58, %v11793_v35  ;;  %v6313_v35 = vld [vmem:[%s11551_s6 + $0xd0] sm:$0xff] }
 0x4ba   :  { %v5807_v60 = vpop.f32.mrf.mxu1  ;;  %v5679_v16 = vadd.f32 %v11060_v25, %v5513_v20  ;;  %v11784_v21 = vld [vmem:[#allocation33_spill] sm:$0xff] }
 0x4bb   :  { %v6014_v18 = vadd.f32 %v11160_v26, %v5848_v61  ;;  %v11797_v61 = vld [vmem:[#allocation24_spill] sm:$0xff] }
 0x4bc   :  { %v7949_v12 = vpop.f32.mrf.mxu1  ;;  %v5845_v43 = vadd.f32 %v11174_v36, %v5679_v16  ;;  %v11782_v36 = vld [vmem:[#allocation15_spill] sm:$0xff] }
 0x4bd   :  { %v5849_v49 = vadd.f32 %v7949_v12, %v5683_v50  ;;  %v11781_v12 = vld [vmem:[#allocation16_spill] sm:$0xff] }
 0x4be   :  { %v5810_v14 = vpop.f32.mrf.mxu1  ;;  %v5345_v0 = vadd.f32 %v11781_v12, %v11085_v34  ;;  %v5678_v34 = vadd.f32 %v11050_v11, %v11133_v29  ;;  %v6011_v11 = vadd.f32 %v11152_v57, %v5845_v43 }
 0x4bf   :  { %v6015_v6 = vadd.f32 %v7967_v17, %v5849_v49  ;;  %v5847_v44 = vadd.f32 %v5810_v14, %v5681_v23 }
 0x4c0   :  { %v7952_v59 = vpop.f32.mrf.mxu1  ;;  %v5511_v5 = vadd.f32 %v11142_v2, %v5345_v0  ;;  %v5844_v25 = vadd.f32 %v11168_v22, %v5678_v34  ;;  %v11799_v0 = vld [vmem:[#allocation28_spill] sm:$0xff] }
 0x4c1   :  { %v5852_v8 = vadd.f32 %v7952_v59, %v5686_v47  ;;  %v6013_v14 = vadd.f32 %v11180_v51, %v5847_v44 }
 0x4c2   :  { %v5823_v33 = vpop.f32.mrf.mxu1  ;;  %v5677_v2 = vadd.f32 %v11068_v63, %v5511_v5  ;;  %v5675_v63 = vadd.f32 %v11782_v36, %v11125_v46  ;;  %v6010_v22 = vadd.f32 %v11783_v13, %v5844_v25  ;;  %v11790_v46 = vld [vmem:[#allocation19_spill] sm:$0xff] }
 0x4c3   :  { %v6018_v32 = vadd.f32 %v7970_v3, %v5852_v8  ;;  %v5850_v45 = vadd.f32 %v5823_v33, %v5684_v28  ;;  %v11209_v3 = vld [vmem:[%s11549_s4] ss:$0 sm:$0xff]  ;;  %v5842_v33 = vadd.f32 %v11784_v21, %v5676_v19  ;;  %v11785_v28 = vld [vmem:[#allocation21_spill] sm:$0xff]  ;;  %v5673_v50 = vadd.f32 %v11790_v46, %v11789_v38  ;;  %v6060_v19 = vld [vmem:[%s11550_s5 + $0x8] sm:$0xff] }
 0x4c4   :  { %v7953_v56 = vpop.f32.mrf.mxu1  ;;  %v6038_v17 = vadd.f32 %v11209_v3, %v6015_v6  ;;  %v6037_v26 = vadd.f32 %v11209_v3, %v6014_v18  ;;  %v5843_v29 = vadd.f32 %v11176_v27, %v5677_v2  ;;  %v6036_v51 = vadd.f32 %v11209_v3, %v6013_v14  ;;  %v6318_v21 = vld [vmem:[%s11551_s6 + $0xf8] sm:$0xff]  ;;  %v6299_v38 = vld [vmem:[%s11551_s6 + $0x60] sm:$0xff] }
 0x4c5   :  { %v5853_v55 = vadd.f32 %v7953_v56, %v5687_v37  ;;  %v6041_v42 = vadd.f32 %v11209_v3, %v6018_v32  ;;  %v6016_v30 = vadd.f32 %v5989_v53, %v5850_v45  ;;  %v5846_v53 = vadd.f32 %v5807_v60, %v5680_v48  ;;  %v11786_v37 = vld [vmem:[#allocation29_spill] sm:$0xff]  ;;  %v11791_v56 = vld [vmem:[#allocation20_spill] sm:$0xff]  ;;  %7305 = vmatprep.subr.mxu0 %v6318_v21 }
 0x4c6   :  { %v5826_v24 = vpop.f32.mrf.mxu1  ;;  %v5674_v54 = vadd.f32 %v11786_v37, %v11785_v28  ;;  %v5841_v57 = vadd.f32 %v11787_v9, %v5675_v63  ;;  %v6034_v27 = vadd.f32 %v11209_v3, %v6011_v11  ;;  %v6033_v45 = vadd.f32 %v11209_v3, %v6010_v22  ;;  %v6061_v11 = vld [vmem:[%s11550_s5 + $0x10] sm:$0xff] }
 0x4c7   :  { %v6019_v15 = vadd.f32 %v7971_v39, %v5853_v55  ;;  %v5851_v41 = vadd.f32 %v5826_v24, %v5685_v7  ;;  %v6039_v8 = vadd.f32 %v11209_v3, %v6016_v30  ;;  %v6012_v60 = vadd.f32 %v11166_v10, %v5846_v53  ;;  %v11788_v39 = vld [vmem:[#allocation12_spill] sm:$0xff]  ;;  %v11792_v55 = vld [vmem:[#allocation10_spill] sm:$0xff] }
 0x4c8   :  { %v6009_v52 = vadd.f32 %v11788_v39, %v5843_v29  ;;  %v5840_v32 = vadd.f32 %v11791_v56, %v5674_v54  ;;  %v6008_v7 = vadd.f32 %v11792_v55, %v5842_v33  ;;  %v11795_v24 = vld [vmem:[#allocation30_spill] sm:$0xff]  ;;  %v6154_v63 = vlaneseq  ;;  %v6317_v28 = vld [vmem:[%s11551_s6 + $0xf0] sm:$0xff]  ;;  %v6316_v54 = vld [vmem:[%s11551_s6 + $0xe8] sm:$0xff] }
 0x4c9   :  { %v6042_v4 = vadd.f32 %v11209_v3, %v6019_v15  ;;  %v6017_v47 = vadd.f32 %v5992_v31, %v5851_v41  ;;  %v6035_v10 = vadd.f32 %v11209_v3, %v6012_v60  ;;  %v6007_v49 = vadd.f32 %v11795_v24, %v5841_v57  ;;  %v11796_v15 = vld [vmem:[#allocation32_spill] sm:$0xff]  ;;  %v6062_v29 = vld [vmem:[%s11550_s5 + $0x18] sm:$0xff] }
 0x4ca   :  { %v5839_v41 = vadd.f32 %v11796_v15, %v5673_v50  ;;  %v6032_v31 = vadd.f32 %v11209_v3, %v6009_v52  ;;  %v6006_v23 = vadd.f32 %v11797_v61, %v5840_v32  ;;  %v6155_v22 = vshrl.u32 %v6154_v63, 7  ;;  %v6301_v37 = vld [vmem:[%s11551_s6 + $0x70] sm:$0xff]  ;;  %v6300_v52 = vld [vmem:[%s11551_s6 + $0x68] sm:$0xff]  ;;  %v6311_v61 = vld [vmem:[%s11551_s6 + $0xc0] sm:$0xff] }
 0x4cb   :  { %8478 = vtanh.f32 %v6042_v4  ;;  %v6040_v59 = vadd.f32 %v11209_v3, %v6017_v47  ;;  %v6031_v4 = vadd.f32 %v11209_v3, %v6008_v7  ;;  %v6030_v12 = vadd.f32 %v11209_v3, %v6007_v49  ;;  %v6298_v7 = vld [vmem:[%s11551_s6 + $0x58] sm:$0xff]  ;;  %v6312_v24 = vld [vmem:[%s11551_s6 + $0xc8] sm:$0xff]  ;;  %v6420_v63 = vld [vmem:[%s11553_s8 + $0x60] sm:$0xff] }
 0x4cc   :  { %8480 = vtanh.f32 %v6041_v42  ;;  %v11798_v42 = vld [vmem:[#allocation22_spill] sm:$0xff]  ;;  %v6005_v48 = vadd.f32 %v11799_v0, %v5839_v41  ;;  %v6029_v44 = vadd.f32 %v11209_v3, %v6006_v23  ;;  %v6296_v49 = vld [vmem:[%s11551_s6 + $0x48] sm:$0xff] }
 0x4cd   :  { %8482 = vtanh.f32 %v6040_v59  ;;  %v5838_v30 = vadd.f32 %v11798_v42, %v5672_v62  ;;  %v11800_v59 = vld [vmem:[#allocation25_spill] sm:$0xff]  ;;  %v6295_v23 = vld [vmem:[%s11551_s6 + $0x40] sm:$0xff] }
 0x4ce   :  { %8484 = vtanh.f32 %v6039_v8  ;;  %v6028_v18 = vadd.f32 %v11209_v3, %v6005_v48  ;;  %v6297_v62 = vld [vmem:[%s11551_s6 + $0x50] sm:$0xff]  ;;  %v6310_v42 = vld [vmem:[%s11551_s6 + $0xb8] sm:$0xff] }
 0x4cf   :  { %8486 = vtanh.f32 %v6038_v17  ;;  %v6004_v5 = vadd.f32 %v11800_v59, %v5838_v30  ;;  %v6294_v0 = vld [vmem:[%s11551_s6 + $0x38] sm:$0xff]  ;;  %v6309_v48 = vld [vmem:[%s11551_s6 + $0xb0] sm:$0xff] }
 0x4d0   :  { %8488 = vtanh.f32 %v6037_v26 }
 0x4d1   :  { %8490 = vtanh.f32 %v6036_v51  ;;  %v6027_v8 = vadd.f32 %v11209_v3, %v6004_v5  ;;  %v8537_v51 = vmov 1983009808   ;;  %v6308_v5 = vld [vmem:[%s11551_s6 + $0xa8] sm:$0xff] }
 0x4d2   :  { %8492 = vtanh.f32 %v6035_v10  ;;  %v6152_v36 = vunpack.c.l.s4 %v8537_v51  ;;  %v6302_v10 = vld [vmem:[%s11551_s6 + $0x78] sm:$0xff]  ;;  %v6287_v51 = vld [vmem:[%s11551_s6] sm:$0xff] }
 0x4d3   :  { %8494 = vtanh.f32 %v6034_v27  ;;  %7306 = vmatpush3.msra.mxu0 %v6302_v10 }
 0x4d4   :  { %8496 = vtanh.f32 %v6033_v45  ;;  %v6153_v13 = vunpack.c.0.s8 %v6152_v36  ;;  %7307 = vmatprep.subr.mxu0 %v6317_v28  ;;  %v6314_v45 = vld [vmem:[%s11551_s6 + $0xd8] sm:$0xff]  ;;  %v6421_v36 = vld [vmem:[%s11553_s8 + $0x68] sm:$0xff] }
 0x4d5   :  { %8498 = vtanh.f32 %v6032_v31  ;;  %7308 = vmatpush3.msra.mxu0 %v6301_v37 }
 0x4d6   :  { %8500 = vtanh.f32 %v6031_v4  ;;  %v11277_v33 = vsub.s32 %v6153_v13, %v6155_v22  ;;  %7309 = vmatprep.subr.mxu0 %v6316_v54  ;;  %v6419_v13 = vld [vmem:[%s11553_s8 + $0x58] sm:$0xff] }
 0x4d7   :  { %8502 = vtanh.f32 %v6030_v12  ;;  %7310 = vmatpush3.msra.mxu0 %v6300_v52 }
 0x4d8   :  { %v8479_v40 = vpop.eup %8478  ;;  %8504 = vtanh.f32 %v6029_v44 }
 0x4d9   :  { %7972 = vmatprep.subr.mxu1 %v8479_v40  ;;  %v8481_v1 = vpop.eup %8480  ;;  %8506 = vtanh.f32 %v6028_v18  ;;  %v6307_v18 = vld [vmem:[%s11551_s6 + $0xa0] sm:$0xff] }
 0x4da   :  { %7973 = vmatpush3.msra.mxu1 %v8479_v40  ;;  %v8483_v20 = vpop.eup %8482  ;;  %8508 = vtanh.f32 %v6027_v8  ;;  %v6315_v40 = vld [vmem:[%s11551_s6 + $0xe0] sm:$0xff] }
 0x4db   :  { %7974 = vmatprep.subr.mxu1 %v8481_v1  ;;  %v8485_v47 = vpop.eup %8484  ;;  %7311 = vmatprep.subr.mxu0 %v6315_v40 }
 0x4dc   :  { %7975 = vmatpush3.msra.mxu1 %v8481_v1  ;;  %v8487_v6 = vpop.eup %8486  ;;  %7312 = vmatpush3.msra.mxu0 %v6299_v38 }
 0x4dd   :  { %7976 = vmatprep.subr.mxu1 %v8483_v20  ;;  %v8489_v16 = vpop.eup %8488  ;;  %7313 = vmatprep.subr.mxu0 %v6314_v45  ;;  %v6416_v45 = vld [vmem:[%s11553_s8 + $0x40] sm:$0xff] }
 0x4de   :  { %7977 = vmatpush3.msra.mxu1 %v8483_v20  ;;  %v8491_v53 = vpop.eup %8490  ;;  %7314 = vmatpush3.msra.mxu0 %v6298_v7  ;;  %v6414_v7 = vld [vmem:[%s11553_s8 + $0x30] sm:$0xff] }
 0x4df   :  { %7978 = vmatprep.subr.mxu1 %v8485_v47  ;;  %v8493_v34 = vpop.eup %8492  ;;  %7315 = vmatprep.subr.mxu0 %v6313_v35  ;;  %v6412_v35 = vld [vmem:[%s11553_s8 + $0x20] sm:$0xff] }
 0x4e0   :  { %7979 = vmatpush3.msra.mxu1 %v8485_v47  ;;  %v8495_v43 = vpop.eup %8494  ;;  %7316 = vmatpush3.msra.mxu0 %v6297_v62  ;;  %v6410_v62 = vld [vmem:[%s11553_s8 + $0x10] sm:$0xff] }
 0x4e1   :  { %7980 = vmatprep.subr.mxu1 %v8487_v6  ;;  %v8497_v17 = vpop.eup %8496  ;;  %7317 = vmatprep.subr.mxu0 %v6312_v24  ;;  %v6409_v24 = vld [vmem:[%s11553_s8 + $0x8] sm:$0xff] }
 0x4e2   :  { %7981 = vmatpush3.msra.mxu1 %v8487_v6  ;;  %v8499_v14 = vpop.eup %8498  ;;  %7318 = vmatpush3.msra.mxu0 %v6296_v49  ;;  %v6293_v6 = vld [vmem:[%s11551_s6 + $0x30] sm:$0xff]  ;;  %v6517_v49 = vld [vmem:[%s11555_s10 + $0x78] sm:$0xff] }
 0x4e3   :  { %7982 = vmatprep.subr.mxu1 %v8489_v16  ;;  %v8501_v2 = vpop.eup %8500  ;;  %7319 = vmatprep.subr.mxu0 %v6311_v61  ;;  %v6513_v61 = vld [vmem:[%s11555_s10 + $0x58] sm:$0xff] }
 0x4e4   :  { %7983 = vmatpush3.msra.mxu1 %v8489_v16  ;;  %v8503_v25 = vpop.eup %8502  ;;  %7320 = vmatpush3.msra.mxu0 %v6295_v23  ;;  %v6292_v16 = vld [vmem:[%s11551_s6 + $0x28] sm:$0xff]  ;;  %v6512_v23 = vld [vmem:[%s11555_s10 + $0x50] sm:$0xff] }
 0x4e5   :  { %7984 = vmatprep.subr.mxu1 %v8491_v53  ;;  %v8505_v3 = vpop.eup %8504  ;;  %7321 = vmatprep.subr.mxu0 %v6310_v42  ;;  %v6511_v42 = vld [vmem:[%s11555_s10 + $0x48] sm:$0xff] }
 0x4e6   :  { %7985 = vmatpush3.msra.mxu1 %v8491_v53  ;;  %v8507_v26 = vpop.eup %8506  ;;  %7322 = vmatpush3.msra.mxu0 %v6294_v0 }
 0x4e7   :  { %7986 = vmatprep.subr.mxu1 %v8493_v34  ;;  %v8509_v60 = vpop.eup %8508  ;;  %7323 = vmatprep.subr.mxu0 %v6309_v48 }
 0x4e8   :  { %7987 = vmatpush3.msra.mxu1 %v8493_v34  ;;  %7324 = vmatpush3.msra.mxu0 %v6293_v6  ;;  %v6291_v34 = vld [vmem:[%s11551_s6 + $0x20] sm:$0xff] }
 0x4e9   :  { %7988 = vmatprep.subr.mxu1 %v8495_v43  ;;  %7325 = vmatprep.subr.mxu0 %v6308_v5  ;;  %v6510_v6 = vld [vmem:[%s11555_s10 + $0x40] sm:$0xff]  ;;  %v6507_v5 = vld [vmem:[%s11555_s10 + $0x28] sm:$0xff] }
 0x4ea   :  { %7989 = vmatpush3.msra.mxu1 %v8495_v43  ;;  %7326 = vmatpush3.msra.mxu0 %v6292_v16  ;;  %v6306_v43 = vld [vmem:[%s11551_s6 + $0x98] sm:$0xff]  ;;  %v6506_v16 = vld [vmem:[%s11555_s10 + $0x20] sm:$0xff] }
 0x4eb   :  { %7990 = vmatprep.subr.mxu1 %v8497_v17  ;;  %7327 = vmatprep.subr.mxu0 %v6307_v18  ;;  %v6505_v18 = vld [vmem:[%s11555_s10 + $0x18] sm:$0xff] }
 0x4ec   :  { %7991 = vmatpush3.msra.mxu1 %v8497_v17  ;;  %v6290_v17 = vld [vmem:[%s11551_s6 + $0x18] sm:$0xff]  ;;  %7328 = vmatpush3.msra.mxu0 %v6291_v34  ;;  %v6502_v34 = vld [vmem:[%s11555_s10] sm:$0xff] }
 0x4ed   :  { %7992 = vmatprep.subr.mxu1 %v8499_v14  ;;  %7329 = vmatprep.subr.mxu0 %v6306_v43  ;;  %v6984_v43 = vld [vmem:[%s11554_s9] ss:$0 sm:$0xff] }
 0x4ee   :  { %7993 = vmatpush3.msra.mxu1 %v8499_v14  ;;  %v6305_v14 = vld [vmem:[%s11551_s6 + $0x90] sm:$0xff]  ;;  %7330 = vmatpush3.msra.mxu0 %v6290_v17 }
 0x4ef   :  { %7994 = vmatprep.subr.mxu1 %v8501_v2  ;;  %7331 = vmatprep.subr.mxu0 %v6305_v14 }
 0x4f0   :  { %7995 = vmatpush3.msra.mxu1 %v8501_v2 }
 0x4f1   :  { %7996 = vmatprep.subr.mxu1 %v8503_v25 }
 0x4f2   :  { %7997 = vmatpush3.msra.mxu1 %v8503_v25  ;;  %v6289_v25 = vld [vmem:[%s11551_s6 + $0x10] sm:$0xff] }
 0x4f3   :  { %7998 = vmatprep.subr.mxu1 %v8505_v3  ;;  %7332 = vmatpush3.msra.mxu0 %v6289_v25 }
 0x4f4   :  { %7999 = vmatpush3.msra.mxu1 %v8505_v3  ;;  %v6423_v3 = vld [vmem:[%s11553_s8 + $0x78] sm:$0xff] }
 0x4f5   :  { %8000 = vmatprep.subr.mxu1 %v8507_v26 }
 0x4f6   :  { %8001 = vmatpush3.msra.mxu1 %v8507_v26  ;;  %v6304_v26 = vld [vmem:[%s11551_s6 + $0x88] sm:$0xff] }
 0x4f7   :  { %8002 = vmatprep.subr.mxu1 %v8509_v60  ;;  %7333 = vmatprep.subr.mxu0 %v6304_v26 }
 0x4f8   :  { %8003 = vmatpush3.msra.mxu1 %v8509_v60  ;;  %v8545_v60 = vmov 0.0  }
 0x4f9   :  { %8005 = vmatmul.mubr.f32.vlgmr.msra.gmra.mxu1 %v6060_v19  ;;  %8010 = vmatprep.subr.mxu1 %v8545_v60  ;;  %v6288_v19 = vld [vmem:[%s11551_s6 + $0x8] sm:$0xff] }
 0x4fa   :  { %8007 = vmatprep.mubr.f32.mxu1 %v6061_v11  ;;  %v6422_v11 = vld [vmem:[%s11553_s8 + $0x70] sm:$0xff]  ;;  %8011 = vmatpush3.msra.mxu1 %v6423_v3  ;;  %v6985_v3 = vld [vmem:[%s11556_s11] ss:$0 sm:$0xff] }
 0x4fb   :  { %8012 = vmatprep.subr.mxu1 %v8545_v60  ;;  %7334 = vmatpush3.msra.mxu0 %v6288_v19 }
 0x4fc   :  { %8013 = vmatpush3.msra.mxu1 %v6422_v11 }
 0x4fd   :  { %8008 = vmatmul.mubr.f32.gmra.mxu1 %v6062_v29  ;;  %v6303_v29 = vld [vmem:[%s11551_s6 + $0x80] sm:$0xff]  ;;  %8014 = vmatprep.subr.mxu1 %v8545_v60 }
 0x4fe   :  { %7335 = vmatprep.subr.mxu0 %v6303_v29  ;;  %8015 = vmatpush3.msra.mxu1 %v6421_v36 }
 0x4ff   :  { %7336 = vmatpush3.msra.mxu0 %v6287_v51  ;;  %8016 = vmatprep.subr.mxu1 %v8545_v60 }
 0x500   :  { %8045 = vmatprep.subr.mxu0 %v8545_v60  ;;  %8017 = vmatpush3.msra.mxu1 %v6420_v63 }
 0x501   :  { %8018 = vmatprep.subr.mxu1 %v8545_v60  ;;  %8042 = vmatprep.mubr.msk.f32.mxu1 %vm8546_vm13, %v8545_v60 }
 0x502   :  { %8019 = vmatpush3.msra.mxu1 %v6419_v13 }
 0x503   :  { %8020 = vmatprep.subr.mxu1 %v8545_v60 }
 0x5b9   :  { %v11291_v9 = vpop.f32.mrf.mxu1 }
 0x5ba   :  { %v6190_v57 = vrot.slane %v11291_v9, %v11277_v33  ;;  %v6202_v30 = vcombine.high %v11291_v9, %v11291_v9 }
 0x5bb   :  { %v6129_v27 = vpop.f32.mrf.mxu1 }
 0x5bc   :  { %6149 = vst.msk [vmem:[#allocation3] sm:$0x3] %vm6148_vm5, %v6129_v27  ;;  %6191 = vrot.lane.b32.xlu0 %v6190_v57, %s8538_s24  ;;  %v6164_v39 = vcombine.high %v6129_v27, %v6129_v27  ;;  %v6157_v50 = vrot.slane %v6129_v27, %v11277_v33  ;;  %v6196_v56 = vcombine.high %v6190_v57, %v6190_v57 }
 0x5bd   :  { %v8009_v46 = vpop.f32.mrf.mxu1  ;;  %v6209_v44 = vrot.slane %v6202_v30, %v11277_v33 }
 0x5be   :  { %v6171_v32 = vrot.slane %v6164_v39, %v11277_v33  ;;  %v6259_v1 = vrot.slane %v8009_v46, %v11277_v33  ;;  %v6158_v58 = vcombine.high %v6157_v50, %v6157_v50  ;;  %v6269_v31 = vcombine.high %v8009_v46, %v8009_v46 }
 0x5bf   :  { %v6139_v55 = vpop.f32.mrf.mxu1  ;;  %v6215_v8 = vcombine.high %v6209_v44, %v6209_v44 }
 0x5c0   :  { %6197 = vrot.lane.b32.xlu0 %v6196_v56, %s8539_s13  ;;  %6172 = vrot.lane.b32.xlu1 %v6171_v32, %s8540_s14  ;;  %6221 = vst.msk [vmem:[#allocation3 + $0x2] sm:$0x3] %vm6148_vm5, %v6139_v55  ;;  %v6177_v15 = vcombine.high %v6171_v32, %v6171_v32  ;;  %v6264_v41 = vcombine.high %v6259_v1, %v6259_v1  ;;  %v6418_v56 = vld [vmem:[%s11553_s8 + $0x50] sm:$0xff]  ;;  %v6417_v32 = vld [vmem:[%s11553_s8 + $0x48] sm:$0xff] }
 0x5c1   :  { %v6229_v20 = vrot.slane %v6139_v55, %v11277_v33  ;;  %v6276_v4 = vrot.slane %v6269_v31, %v11277_v33  ;;  %v6235_v47 = vcombine.high %v6139_v55, %v6139_v55  ;;  %8021 = vmatpush3.msra.mxu1 %v6418_v56  ;;  %v6415_v55 = vld [vmem:[%s11553_s8 + $0x38] sm:$0xff]  ;;  %v6515_v31 = vld [vmem:[%s11555_s10 + $0x68] sm:$0xff] }
 0x5c2   :  { %8022 = vmatprep.subr.mxu1 %v8545_v60 }
 0x5c3   :  { %v6230_v12 = vcombine.high %v6229_v20, %v6229_v20  ;;  %v6242_v59 = vrot.slane %v6235_v47, %v11277_v33  ;;  %v6281_v2 = vcombine.high %v6276_v4, %v6276_v4  ;;  %8023 = vmatpush3.msra.mxu1 %v6417_v32  ;;  %v6514_v20 = vld [vmem:[%s11555_s10 + $0x60] sm:$0xff] }
 0x5c4   :  { %6159 = vrot.lane.b32.xlu0 %v6158_v58, %s8541_s20  ;;  %6260 = vrot.lane.b32.xlu1 %v6259_v1, %s8538_s24  ;;  %s8542_s24 = smov 48   ;;  %v6413_v1 = vld [vmem:[%s11553_s8 + $0x28] sm:$0xff]  ;;  %v6411_v58 = vld [vmem:[%s11553_s8 + $0x18] sm:$0xff] }
 0x5c5   :  { %v6247_v53 = vcombine.high %v6242_v59, %v6242_v59  ;;  %8024 = vmatprep.subr.mxu1 %v8545_v60 }
 0x5c6   :  { %8025 = vmatpush3.msra.mxu1 %v6416_v45 }
 0x5c7   :  { %8026 = vmatprep.subr.mxu1 %v8545_v60 }
 0x5c8   :  { %6178 = vrot.lane.b32.xlu0 %v6177_v15, %s8542_s24  ;;  %6265 = vrot.lane.b32.xlu1 %v6264_v41, %s8539_s13  ;;  %v6516_v15 = vld [vmem:[%s11555_s10 + $0x70] sm:$0xff]  ;;  %v6408_v41 = vld [vmem:[%s11553_s8] sm:$0xff] }
 0x5c9   :  { %8027 = vmatpush3.msra.mxu1 %v6415_v55 }
 0x5ca   :  { %8028 = vmatprep.subr.mxu1 %v8545_v60 }
 0x5cb   :  { %8029 = vmatpush3.msra.mxu1 %v6414_v7 }
 0x5cc   :  { %6277 = vrot.lane.b32.xlu1 %v6276_v4, %s8543_s30  ;;  %6231 = vrot.lane.b32.xlu0 %v6230_v12, %s8541_s20  ;;  %v6982_v4 = vld [vmem:[%s11552_s7] ss:$0 sm:$0xff] }
 0x5cd   :  { %8030 = vmatprep.subr.mxu1 %v8545_v60 }
 0x5ce   :  { %8031 = vmatpush3.msra.mxu1 %v6413_v1 }
 0x5cf   :  { %8032 = vmatprep.subr.mxu1 %v8545_v60 }
 0x5d0   :  { %6243 = vrot.lane.b32.xlu1 %v6242_v59, %s8540_s14  ;;  %6210 = vrot.lane.b32.xlu0 %v6209_v44, %s8543_s30  ;;  %s8544_s14 = smov 112   ;;  %v6509_v44 = vld [vmem:[%s11555_s10 + $0x38] sm:$0xff]  ;;  %v6508_v59 = vld [vmem:[%s11555_s10 + $0x30] sm:$0xff] }
 0x5d1   :  { %8033 = vmatpush3.msra.mxu1 %v6412_v35 }
 0x5d2   :  { %8034 = vmatprep.subr.mxu1 %v8545_v60 }
 0x5d3   :  { %8035 = vmatpush3.msra.mxu1 %v6411_v58 }
 0x5d4   :  { %6248 = vrot.lane.b32.xlu1 %v6247_v53, %s8542_s24  ;;  %6216 = vrot.lane.b32.xlu0 %v6215_v8, %s8544_s14  ;;  %v6504_v53 = vld [vmem:[%s11555_s10 + $0x10] sm:$0xff]  ;;  %v6503_v8 = vld [vmem:[%s11555_s10 + $0x8] sm:$0xff]  ;;  %s6602_s10 = sshll.u32 %s8547_s28, 4  ;;  %s6603_s10 = int_to_ptr.vmem [resolvable:$true] %s6602_s10 }
 0x5d5   :  { %8036 = vmatprep.subr.mxu1 %v8545_v60  ;;  %s8515_s29 = scalar_lea.vmem %s6603_s10, 32  ;;  %p8520_p1 = scmp.lt.s32.totalorder %s6603_s10, %s6603_s10 }
 0x5d6   :  { %8037 = vmatpush3.msra.mxu1 %v6410_v62  ;;  %p8516_p0 = scmp.ne.s32.totalorder %s6603_s10, %s8515_s29  ;;  %p8521_p2 = scmp.lt.s32.totalorder %s8515_s29, %s8515_s29 }
 0x5d7   :  { %8038 = vmatprep.subr.mxu1 %v8545_v60 }
 0x5d8   :  { %6282 = vrot.lane.b32.xlu1 %v6281_v2, %s8544_s14  ;;  %8039 = vmatpush3.msra.mxu1 %v6409_v24  ;;  %p8522_p3 = por %p8521_p2, %p8520_p1 }
 0x5d9   :  { %8040 = vmatprep.subr.mxu1 %v8545_v60 }
 0x5da   :  { %8041 = vmatpush3.msra.mxu1 %v6408_v41  ;;  %p8523_p4 = pnand %p8522_p3, %p8516_p0 }
 0x62e   :  { %v6192_v22 = vpop.permute.xlu0 %6191 }
 0x632   :  { %v6198_v21 = vpop.permute.xlu0 %6197  ;;  %v6173_v33 = vpop.permute.xlu1 %6172 }
 0x636   :  { %v6160_v10 = vpop.permute.xlu0 %6159  ;;  %v6261_v28 = vpop.permute.xlu1 %6260 }
 0x637   :  { %6163 = vst.msk [vmem:[#allocation3] sm:$0x3] %vm6162_vm6, %v6160_v10 }
 0x638   :  { %6176 = vst.msk [vmem:[#allocation3] sm:$0x3] %vm6175_vm7, %v6173_v33 }
 0x63a   :  { %v6179_v37 = vpop.permute.xlu0 %6178  ;;  %v6266_v54 = vpop.permute.xlu1 %6265 }
 0x63b   :  { %6182 = vst.msk [vmem:[#allocation3] sm:$0x3] %vm6181_vm8, %v6179_v37 }
 0x63c   :  { %6195 = vst.msk [vmem:[#allocation3] sm:$0x3] %vm6194_vm9, %v6192_v22 }
 0x63d   :  { %6201 = vst.msk [vmem:[#allocation3] sm:$0x3] %vm6200_vm10, %v6198_v21 }
 0x63e   :  { %v6278_v9 = vpop.permute.xlu1 %6277  ;;  %v6232_v57 = vpop.permute.xlu0 %6231 }
 0x63f   :  { %6234 = vst.msk [vmem:[#allocation3 + $0x2] sm:$0x3] %vm6162_vm6, %v6232_v57 }
 0x642   :  { %v6244_v27 = vpop.permute.xlu1 %6243  ;;  %v6211_v39 = vpop.permute.xlu0 %6210 }
 0x643   :  { %6246 = vst.msk [vmem:[#allocation3 + $0x2] sm:$0x3] %vm6175_vm7, %v6244_v27 }
 0x644   :  { %6214 = vst.msk [vmem:[#allocation3] sm:$0x3] %vm6213_vm11, %v6211_v39 }
 0x646   :  { %v6249_v52 = vpop.permute.xlu1 %6248  ;;  %v6217_v40 = vpop.permute.xlu0 %6216 }
 0x647   :  { %6251 = vst.msk [vmem:[#allocation3 + $0x2] sm:$0x3] %vm6181_vm8, %v6249_v52 }
 0x648   :  { %6220 = vst.msk [vmem:[#allocation3] sm:$0x3] %vm6219_vm12, %v6217_v40 }
 0x649   :  { %6263 = vst.msk [vmem:[#allocation3 + $0x2] sm:$0x3] %vm6194_vm9, %v6261_v28 }
 0x64a   :  { %6268 = vst.msk [vmem:[#allocation3 + $0x2] sm:$0x3] %vm6200_vm10, %v6266_v54  ;;  %v6283_v38 = vpop.permute.xlu1 %6282 }
 0x64b   :  { %6280 = vst.msk [vmem:[#allocation3 + $0x2] sm:$0x3] %vm6213_vm11, %v6278_v9 }
 0x64c   :  { %6285 = vst.msk [vmem:[#allocation3 + $0x2] sm:$0x3] %vm6219_vm12, %v6283_v38 }
 0x653   :  { %v6983_v46 = vld.sshfl [vmem:[#allocation3] sm:$0x33 pattern:$0x76325410] }
 0x654   :  { %v6334_v50 = vcombine.high %v6983_v46, %v6983_v46 }
 0x656   :  { %6401 = vmatprep.mubr.f32.mxu0 %v6334_v50 }
 0x657   :  { %6402 = vmatmul.mubr.f32.vlgmr.msra.gmra.mxu0 %v6983_v46 }
 0x658   :  { %8077 = vmatprep.mubr.msk.f32.mxu0 %vm8546_vm13, %v8545_v60  ;;  %8046 = vmatpush3.msra.mxu0 %v6517_v49 }
 0x659   :  { %8047 = vmatprep.subr.mxu0 %v8545_v60 }
 0x65a   :  { %8048 = vmatpush3.msra.mxu0 %v6516_v15 }
 0x65b   :  { %8049 = vmatprep.subr.mxu0 %v8545_v60 }
 0x65c   :  { %8050 = vmatpush3.msra.mxu0 %v6515_v31 }
 0x65d   :  { %8051 = vmatprep.subr.mxu0 %v8545_v60 }
 0x65e   :  { %8052 = vmatpush3.msra.mxu0 %v6514_v20 }
 0x65f   :  { %8053 = vmatprep.subr.mxu0 %v8545_v60 }
 0x660   :  { %8054 = vmatpush3.msra.mxu0 %v6513_v61 }
 0x661   :  { %8055 = vmatprep.subr.mxu0 %v8545_v60 }
 0x662   :  { %8056 = vmatpush3.msra.mxu0 %v6512_v23 }
 0x663   :  { %8057 = vmatprep.subr.mxu0 %v8545_v60 }
 0x664   :  { %8058 = vmatpush3.msra.mxu0 %v6511_v42 }
 0x665   :  { %8059 = vmatprep.subr.mxu0 %v8545_v60 }
 0x666   :  { %8060 = vmatpush3.msra.mxu0 %v6510_v6 }
 0x667   :  { %8061 = vmatprep.subr.mxu0 %v8545_v60 }
 0x668   :  { %8062 = vmatpush3.msra.mxu0 %v6509_v44 }
 0x669   :  { %8063 = vmatprep.subr.mxu0 %v8545_v60 }
 0x66a   :  { %8064 = vmatpush3.msra.mxu0 %v6508_v59 }
 0x66b   :  { %8065 = vmatprep.subr.mxu0 %v8545_v60 }
 0x66c   :  { %8066 = vmatpush3.msra.mxu0 %v6507_v5 }
 0x66d   :  { %8067 = vmatprep.subr.mxu0 %v8545_v60 }
 0x66e   :  { %8068 = vmatpush3.msra.mxu0 %v6506_v16 }
 0x66f   :  { %8069 = vmatprep.subr.mxu0 %v8545_v60 }
 0x670   :  { %8070 = vmatpush3.msra.mxu0 %v6505_v18 }
 0x671   :  { %8071 = vmatprep.subr.mxu0 %v8545_v60 }
 0x672   :  { %8072 = vmatpush3.msra.mxu0 %v6504_v53 }
 0x673   :  { %8073 = vmatprep.subr.mxu0 %v8545_v60 }
 0x674   :  { %8074 = vmatpush3.msra.mxu0 %v6503_v8 }
 0x675   :  { %8075 = vmatprep.subr.mxu0 %v8545_v60 }
 0x676   :  { %8076 = vmatpush3.msra.mxu0 %v6502_v34 }
 0x717   :  { %v7337_v30 = vpop.f32.mrf.mxu0 }
 0x719   :  { %v7338_v47 = vpop.f32.mrf.mxu0 }
 0x71a   :  { %v7339_v12 = vadd.f32 %v7338_v47, %v7337_v30 }
 0x71c   :  { %v6404_v0 = vadd.f32 %v7339_v12, %v6982_v4 }
 0x71e   :  { %8510 = vtanh.f32 %v6404_v0 }
 0x72b   :  { %v8511_v48 = vpop.eup %8510 }
 0x72c   :  { %8043 = vmatmul.mubr.f32.vlgmr.msra.gmra.mxu1 %v8511_v48 }
 0x7ec   :  { %v6497_v17 = vpop.f32.mrf.mxu1 }
 0x7ed   :  { %v6498_v14 = vadd.f32 %v6984_v43, %v6497_v17 }
 0x7ee   :  { %v8044_v2 = vpop.f32.mrf.mxu1 }
 0x7ef   :  { %8512 = vtanh.f32 %v6498_v14 }
 0x7fc   :  { %v8513_v25 = vpop.eup %8512 }
 0x7fd   :  { %8078 = vmatmul.mubr.f32.vlgmr.msra.gmra.mxu0 %v8513_v25 }
 0x8bd   :  { %v6591_v26 = vpop.f32.mrf.mxu0 }
 0x8be   :  { %v6592_v19 = vadd.f32 %v6985_v3, %v6591_v26 }
 0x8bf   :  { %v8079_v60 = vpop.f32.mrf.mxu0 }
 0x8c0   :  { %6595 = vst [vmem:[#allocation4] sm:$0x3] %v6592_v19 }
 0x8c1   :  { %8526 = shalt.err (!%p8523_p4)
}
 0x8c2   :  { %6605 = dma.vmem_to_hbm [thread:$0]  %s6603_s10, 32, %s11557_s12, [#allocation5]  }
 0x8c3   :  { %8535 = dma.done.wait [#allocation5], 32  }
 0x8c4   :  { %8536 = vsyncadd [#allocation5], 4294967264 }
 0x8c5   :  { %6609 = vsyncpa [#allocation5], 1 }

</bundles_post_ra>
